<compile_context>
chip_gen: v5e
topology: v5e:2x2
jax: 0.10.0
libtpu: 0.0.40
codegen_flags: <defaults>
</compile_context>

<pallas_src>
import functools
import math

import jax
import jax.numpy as jnp
from jax.experimental import pallas as pl
from jax.experimental.pallas import tpu as pltpu


def _round_up(x, m):
    return (x + m - 1) // m * m


def _pick_t_chunk(T, max_chunk=8):
    """Largest divisor of T that is <= max_chunk (timesteps per grid step)."""
    for c in range(min(T, max_chunk), 0, -1):
        if T % c == 0:
            return c
    return 1


# ----------------------------- LSTM cell update -------------------------------
def _lstm_cell_step(gates_x, h_prev, c_prev, w_hh, hidden):
    """One LSTM cell update.

    gates_x : (B, 4H) f32  pre-activation input projection (bias already folded)
    h_prev  : (B, H)  f32
    c_prev  : (B, H)  f32
    w_hh    : (H, 4H) bf16 pre-transposed hidden->hidden weights
    Gate blocks (i, f, g, o) sit at lane-aligned column offsets k*hidden.
    """
    gates = gates_x + jnp.dot(
        h_prev.astype(w_hh.dtype), w_hh, preferred_element_type=jnp.float32)
    i_g = jax.nn.sigmoid(gates[:, 0 * hidden:1 * hidden])
    f_g = jax.nn.sigmoid(gates[:, 1 * hidden:2 * hidden])
    g_g = jnp.tanh(gates[:, 2 * hidden:3 * hidden])
    o_g = jax.nn.sigmoid(gates[:, 3 * hidden:4 * hidden])
    c_new = f_g * c_prev + i_g * g_g
    h_new = o_g * jnp.tanh(c_new)
    return h_new, c_new


# ------------------- intermediate-layer recurrence kernel ---------------------
def _lstm_seq_kernel(gx_ref, whh_hbm, hseq_ref,
                     whh_vmem, h_scr, c_scr, sem, *, t_chunk):
    """One grid step == t_chunk timesteps of one LSTM layer.

    gx_ref   : (t_chunk, B, 4H) f32  precomputed x-projection (+bias)
    whh_hbm  : (H, 4H) bf16          raw HBM ref (copied once into whh_vmem)
    hseq_ref : (t_chunk, B, H) f32   hidden sequence output (next layer's input)
    """
    c = pl.program_id(0)

    @pl.when(c == 0)
    def _():
        cp = pltpu.make_async_copy(whh_hbm, whh_vmem, sem)
        cp.start()
        cp.wait()
        h_scr[...] = jnp.zeros_like(h_scr)
        c_scr[...] = jnp.zeros_like(c_scr)

    hidden = h_scr.shape[1]
    w_hh = whh_vmem[...]

    def step(t, carry):
        h_prev, c_prev = carry
        h_new, c_new = _lstm_cell_step(gx_ref[t], h_prev, c_prev, w_hh, hidden)
        hseq_ref[t] = h_new.astype(hseq_ref.dtype)
        return h_new, c_new

    h_fin, c_fin = jax.lax.fori_loop(
        0, t_chunk, step, (h_scr[...], c_scr[...]), unroll=True)
    h_scr[...] = h_fin
    c_scr[...] = c_fin


def run_lstm_layer(gx, w_hh_t):
    """gx: (T, B_pad, 4H_pad) f32 -> hidden sequence (T, B_pad, H_pad) f32."""
    T, B_pad, GH = gx.shape
    H_pad = GH // 4
    tc = _pick_t_chunk(T)
    return pl.pallas_call(
        functools.partial(_lstm_seq_kernel, t_chunk=tc),
        out_shape=jax.ShapeDtypeStruct((T, B_pad, H_pad), jnp.float32),
        grid_spec=pltpu.PrefetchScalarGridSpec(
            num_scalar_prefetch=0,
            grid=(T // tc,),
            in_specs=[
                pl.BlockSpec((tc, B_pad, GH), lambda c: (c, 0, 0)),
                pl.BlockSpec(memory_space=pl.ANY),  # W_hh: single-buffered via DMA
            ],
            out_specs=pl.BlockSpec((tc, B_pad, H_pad), lambda c: (c, 0, 0)),
            scratch_shapes=[
                pltpu.VMEM((H_pad, GH), w_hh_t.dtype),   # resident weights
                pltpu.VMEM((B_pad, H_pad), jnp.float32),  # h state
                pltpu.VMEM((B_pad, H_pad), jnp.float32),  # c state
                pltpu.SemaphoreType.DMA(()),
            ],
        ),
        compiler_params=pltpu.CompilerParams(
            dimension_semantics=("arbitrary",),          # time is sequential
            vmem_limit_bytes=32 * 1024 * 1024,           # safe on v5e/v6e/v7x
        ),
    )(gx, w_hh_t)


# ------------- last-layer recurrence kernel with fused ReLU + FC --------------
def _lstm_head_kernel(gx_ref, whh_hbm, wfc_ref, bfc_ref, out_ref,
                      whh_vmem, h_scr, c_scr, sem, *, t_chunk):
    """Last LSTM layer: only the final h is needed -> skip the (T,B,H) sequence
    writeback and fuse relu(h_T) @ W_fc + b_fc into the final grid step."""
    c = pl.program_id(0)

    @pl.when(c == 0)
    def _():
        cp = pltpu.make_async_copy(whh_hbm, whh_vmem, sem)
        cp.start()
        cp.wait()
        h_scr[...] = jnp.zeros_like(h_scr)
        c_scr[...] = jnp.zeros_like(c_scr)

    hidden = h_scr.shape[1]
    w_hh = whh_vmem[...]

    def step(t, carry):
        h_prev, c_prev = carry
        return _lstm_cell_step(gx_ref[t], h_prev, c_prev, w_hh, hidden)

    h_fin, c_fin = jax.lax.fori_loop(
        0, t_chunk, step, (h_scr[...], c_scr[...]), unroll=True)
    h_scr[...] = h_fin
    c_scr[...] = c_fin

    @pl.when(c == pl.num_programs(0) - 1)
    def _():
        h_relu = jnp.maximum(h_fin, 0.0)                       # ReLU(hn[-1])
        out_ref[...] = (jnp.dot(h_relu, wfc_ref[...],
                                preferred_element_type=jnp.float32)
                        + bfc_ref[...])


def run_lstm_head_layer(gx, w_hh_t, w_fc_pad, b_fc_pad):
    """gx: (T, B_pad, 4H_pad) f32 -> fused head output (B_pad, 128) f32."""
    T, B_pad, GH = gx.shape
    H_pad = GH // 4
    tc = _pick_t_chunk(T)
    return pl.pallas_call(
        functools.partial(_lstm_head_kernel, t_chunk=tc),
        out_shape=jax.ShapeDtypeStruct((B_pad, 128), jnp.float32),
        grid_spec=pltpu.PrefetchScalarGridSpec(
            num_scalar_prefetch=0,
            grid=(T // tc,),
            in_specs=[
                pl.BlockSpec((tc, B_pad, GH), lambda c: (c, 0, 0)),
                pl.BlockSpec(memory_space=pl.ANY),  # W_hh: single-buffered via DMA
                pl.BlockSpec((H_pad, 128), lambda c: (0, 0)),
                pl.BlockSpec((1, 128), lambda c: (0, 0)),
            ],
            out_specs=pl.BlockSpec((B_pad, 128), lambda c: (0, 0)),
            scratch_shapes=[
                pltpu.VMEM((H_pad, GH), w_hh_t.dtype),
                pltpu.VMEM((B_pad, H_pad), jnp.float32),
                pltpu.VMEM((B_pad, H_pad), jnp.float32),
                pltpu.SemaphoreType.DMA(()),
            ],
        ),
        compiler_params=pltpu.CompilerParams(
            dimension_semantics=("arbitrary",),
            vmem_limit_bytes=32 * 1024 * 1024,
        ),
    )(gx, w_hh_t, w_fc_pad, b_fc_pad)


# --------------------------------- params --------------------------------------
def init_params(key, input_size, hidden_size, num_layers):
    """PyTorch-style U(-1/sqrt(H), 1/sqrt(H)) init, then host-side re-layout:
    pre-transposed weights with each gate block padded to a 128-lane-aligned
    column offset; W_ih/W_hh stored bf16 (MXU operands), bias pre-summed."""
    H = hidden_size
    H_pad = _round_up(H, 128)
    GH = 4 * H_pad
    k = 1.0 / math.sqrt(hidden_size)
    layers = []
    for l in range(num_layers):
        d_in = input_size if l == 0 else hidden_size
        d_in_pad = input_size if l == 0 else H_pad
        key, k1, k2, k3, k4 = jax.random.split(key, 5)
        w_ih = jax.random.uniform(k1, (4 * H, d_in), jnp.float32, -k, k)
        w_hh = jax.random.uniform(k2, (4 * H, H), jnp.float32, -k, k)
        b_ih = jax.random.uniform(k3, (4 * H,), jnp.float32, -k, k)
        b_hh = jax.random.uniform(k4, (4 * H,), jnp.float32, -k, k)
        b_sum = b_ih + b_hh

        w_ih_t = jnp.zeros((d_in_pad, GH), jnp.float32)
        w_hh_t = jnp.zeros((H_pad, GH), jnp.float32)
        b_pad = jnp.zeros((GH,), jnp.float32)
        for g in range(4):  # PyTorch gate order: i, f, g, o
            w_ih_t = w_ih_t.at[:d_in, g * H_pad:g * H_pad + H].set(
                w_ih[g * H:(g + 1) * H, :].T)
            w_hh_t = w_hh_t.at[:H, g * H_pad:g * H_pad + H].set(
                w_hh[g * H:(g + 1) * H, :].T)
            b_pad = b_pad.at[g * H_pad:g * H_pad + H].set(b_sum[g * H:(g + 1) * H])
        layers.append({
            "w_ih_t": w_ih_t.astype(jnp.bfloat16),
            "w_hh_t": w_hh_t.astype(jnp.bfloat16),
            "b": b_pad,
        })

    key, k5, k6 = jax.random.split(key, 3)
    w_fc = jax.random.uniform(k5, (H, 1), jnp.float32, -k, k)
    b_fc = jax.random.uniform(k6, (1,), jnp.float32, -k, k)
    w_fc_pad = jnp.zeros((H_pad, 128), jnp.float32).at[:H, 0].set(w_fc[:, 0])
    b_fc_pad = jnp.zeros((1, 128), jnp.float32).at[0, 0].set(b_fc[0])
    return {"layers": layers, "w_fc": w_fc_pad, "b_fc": b_fc_pad}


# --------------------------------- forward --------------------------------------
@jax.jit
def lstm_model_forward(params, x):
    """x: (B, T, input_size) batch_first, as in the PyTorch module (eval mode)."""
    B, T, _ = x.shape
    B_pad = _round_up(B, 8)                     # full f32 sublane multiple
    x_pad = jnp.pad(x, ((0, B_pad - B), (0, 0), (0, 0)))
    seq = jnp.transpose(x_pad, (1, 0, 2))       # time-major (T, B_pad, D)

    n_layers = len(params["layers"])
    out_pad = None
    for l, layer in enumerate(params["layers"]):
        # Hoisted input projection for ALL timesteps: one big MXU matmul
        # (bf16 operands, f32 accumulation), bias folded in here.
        gx = jnp.einsum(
            "tbd,dg->tbg", seq.astype(jnp.bfloat16), layer["w_ih_t"],
            preferred_element_type=jnp.float32) + layer["b"]
        if l < n_layers - 1:
            seq = run_lstm_layer(gx, layer["w_hh_t"])
            # (inter-layer dropout is identity in eval mode)
        else:
            out_pad = run_lstm_head_layer(
                gx, layer["w_hh_t"], params["w_fc"], params["b_fc"])
    # Strip batch padding and the padded FC lanes: padded rows never mix with
    # real rows (LSTM is row-wise independent), padded hidden columns are
    # exactly zero by construction.
    return out_pad[:B, 0]


if __name__ == "__main__":
    B, T = 2, 8
    input_size, hidden_size, num_layers = 16, 32, 2

    key = jax.random.PRNGKey(0)
    key_x, key_p = jax.random.split(key)

    x = jax.random.normal(key_x, (B, T, input_size), dtype=jnp.float32)
    params = init_params(key_p, input_size, hidden_size, num_layers)

    out = lstm_model_forward(params, x)
    out = jax.block_until_ready(out)

    assert out.shape == (B,), out.shape
    assert bool(jnp.all(jnp.isfinite(out)))
    print("KERNEL_OK")
</pallas_src>

<mosaic_0001>
module attributes {stable_mosaic.version = 11 : i64} {
  func.func @_lstm_seq_kernel(%arg0: i32, %arg1: memref<8x8x512xf32, #tpu.memory_space<vmem>>, %arg2: memref<128x512xbf16, #tpu.memory_space<any>>, %arg3: memref<8x8x128xf32, #tpu.memory_space<vmem>>, %arg4: memref<128x512xbf16, #tpu.memory_space<vmem>>, %arg5: memref<8x128xf32, #tpu.memory_space<vmem>>, %arg6: memref<8x128xf32, #tpu.memory_space<vmem>>, %arg7: memref<!tpu.dma_semaphore, #tpu.memory_space<semaphore_mem>>) attributes {dimension_semantics = [#tpu.dimension_semantics<arbitrary>], iteration_bounds = array<i64: 1>, scalar_prefetch = 0 : i64, scratch_operands = 4 : i64, tpu.core_type = #tpu.core_type<tc>, window_params = [{transform_indices = @transform_0, window_bounds = array<i64: 8, 8, 512>}, {}, {transform_indices = @transform_2, window_bounds = array<i64: 8, 8, 128>}]} {
    %c0_i32 = arith.constant 0 : i32
    %0 = arith.cmpi eq, %arg0, %c0_i32 : i32
    %1 = arith.extui %0 : i1 to i32
    %c0_i32_0 = arith.constant 0 : i32
    %2 = arith.cmpi ne, %1, %c0_i32_0 : i32
    scf.if %2 {
      tpu.enqueue_dma source(%arg2 : memref<128x512xbf16, #tpu.memory_space<any>>) target(%arg4 : memref<128x512xbf16, #tpu.memory_space<vmem>>) target_semaphore(%arg7 : memref<!tpu.dma_semaphore, #tpu.memory_space<semaphore_mem>>)
      tpu.wait_dma2 semaphore(%arg7 : memref<!tpu.dma_semaphore, #tpu.memory_space<semaphore_mem>>) src(%arg2 : memref<128x512xbf16, #tpu.memory_space<any>>) dst(%arg4 : memref<128x512xbf16, #tpu.memory_space<vmem>>)
      %cst_74 = arith.constant 0.000000e+00 : f32
      %288 = vector.broadcast %cst_74 : f32 to vector<8x128xf32>
      %c0_75 = arith.constant 0 : index
      %c0_76 = arith.constant 0 : index
      %289 = vector.load %arg5[%c0_75, %c0_76] : memref<8x128xf32, #tpu.memory_space<vmem>>, vector<8x128xf32>
      tpu.vector_store %arg5[%c0_75, %c0_76], %288 {strides = array<i32>} : memref<8x128xf32, #tpu.memory_space<vmem>>, vector<8x128xf32>,
      %cst_77 = arith.constant 0.000000e+00 : f32
      %290 = vector.broadcast %cst_77 : f32 to vector<8x128xf32>
      %c0_78 = arith.constant 0 : index
      %c0_79 = arith.constant 0 : index
      %291 = vector.load %arg6[%c0_78, %c0_79] : memref<8x128xf32, #tpu.memory_space<vmem>>, vector<8x128xf32>
      tpu.vector_store %arg6[%c0_78, %c0_79], %290 {strides = array<i32>} : memref<8x128xf32, #tpu.memory_space<vmem>>, vector<8x128xf32>,
    } else {
    }
    %c0 = arith.constant 0 : index
    %c0_1 = arith.constant 0 : index
    %3 = vector.load %arg4[%c0, %c0_1] : memref<128x512xbf16, #tpu.memory_space<vmem>>, vector<128x512xbf16>
    %c0_2 = arith.constant 0 : index
    %c0_3 = arith.constant 0 : index
    %4 = vector.load %arg5[%c0_2, %c0_3] : memref<8x128xf32, #tpu.memory_space<vmem>>, vector<8x128xf32>
    %c0_4 = arith.constant 0 : index
    %c0_5 = arith.constant 0 : index
    %5 = vector.load %arg6[%c0_4, %c0_5] : memref<8x128xf32, #tpu.memory_space<vmem>>, vector<8x128xf32>
    %c0_i32_6 = arith.constant 0 : i32
    %6 = arith.index_cast %c0_i32_6 : i32 to index
    %c0_7 = arith.constant 0 : index
    %c0_8 = arith.constant 0 : index
    %7 = vector.load %arg1[%6, %c0_7, %c0_8] : memref<8x8x512xf32, #tpu.memory_space<vmem>>, vector<1x8x512xf32>
    %8 = vector.shape_cast %7 : vector<1x8x512xf32> to vector<8x512xf32>
    %9 = arith.truncf %4 : vector<8x128xf32> to vector<8x128xbf16>
    %cst = arith.constant dense<0.000000e+00> : vector<8x512xf32>
    %10 = tpu.matmul %9, %3, %cst {dimension_numbers = #tpu.dot_dimension_numbers<[1], [0], [0], [1], [0, 0, 1, 1], [], []>} : vector<8x128xbf16>, vector<128x512xbf16>, vector<8x512xf32> -> vector<8x512xf32>
    %11 = arith.addf %8, %10 : vector<8x512xf32>
    %12 = vector.extract_strided_slice %11 {offsets = [0, 0], sizes = [8, 128], strides = [1, 1]} : vector<8x512xf32> to vector<8x128xf32>
    %13 = arith.negf %12 : vector<8x128xf32>
    %14 = math.exp %13 : vector<8x128xf32>
    %cst_9 = arith.constant 1.000000e+00 : f32
    %15 = vector.broadcast %cst_9 : f32 to vector<8x128xf32>
    %16 = arith.addf %15, %14 : vector<8x128xf32>
    %17 = arith.divf %15, %16 : vector<8x128xf32>
    %18 = vector.extract_strided_slice %11 {offsets = [0, 128], sizes = [8, 128], strides = [1, 1]} : vector<8x512xf32> to vector<8x128xf32>
    %19 = arith.negf %18 : vector<8x128xf32>
    %20 = math.exp %19 : vector<8x128xf32>
    %cst_10 = arith.constant 1.000000e+00 : f32
    %21 = vector.broadcast %cst_10 : f32 to vector<8x128xf32>
    %22 = arith.addf %21, %20 : vector<8x128xf32>
    %23 = arith.divf %21, %22 : vector<8x128xf32>
    %24 = vector.extract_strided_slice %11 {offsets = [0, 256], sizes = [8, 128], strides = [1, 1]} : vector<8x512xf32> to vector<8x128xf32>
    %25 = math.tanh %24 : vector<8x128xf32>
    %26 = vector.extract_strided_slice %11 {offsets = [0, 384], sizes = [8, 128], strides = [1, 1]} : vector<8x512xf32> to vector<8x128xf32>
    %27 = arith.negf %26 : vector<8x128xf32>
    %28 = math.exp %27 : vector<8x128xf32>
    %cst_11 = arith.constant 1.000000e+00 : f32
    %29 = vector.broadcast %cst_11 : f32 to vector<8x128xf32>
    %30 = arith.addf %29, %28 : vector<8x128xf32>
    %31 = arith.divf %29, %30 : vector<8x128xf32>
    %32 = arith.mulf %23, %5 : vector<8x128xf32>
    %33 = arith.mulf %17, %25 : vector<8x128xf32>
    %34 = arith.addf %32, %33 : vector<8x128xf32>
    %35 = math.tanh %34 : vector<8x128xf32>
    %36 = arith.mulf %31, %35 : vector<8x128xf32>
    %37 = arith.index_cast %c0_i32_6 : i32 to index
    %c0_12 = arith.constant 0 : index
    %c0_13 = arith.constant 0 : index
    %38 = vector.load %arg3[%37, %c0_12, %c0_13] : memref<8x8x128xf32, #tpu.memory_space<vmem>>, vector<1x8x128xf32>
    %39 = vector.shape_cast %38 : vector<1x8x128xf32> to vector<8x128xf32>
    %40 = vector.shape_cast %36 : vector<8x128xf32> to vector<1x8x128xf32>
    tpu.vector_store %arg3[%37, %c0_12, %c0_13], %40 {strides = array<i32>} : memref<8x8x128xf32, #tpu.memory_space<vmem>>, vector<1x8x128xf32>,
    %c1_i32 = arith.constant 1 : i32
    %41 = arith.index_cast %c1_i32 : i32 to index
    %c0_14 = arith.constant 0 : index
    %c0_15 = arith.constant 0 : index
    %42 = vector.load %arg1[%41, %c0_14, %c0_15] : memref<8x8x512xf32, #tpu.memory_space<vmem>>, vector<1x8x512xf32>
    %43 = vector.shape_cast %42 : vector<1x8x512xf32> to vector<8x512xf32>
    %44 = arith.truncf %36 : vector<8x128xf32> to vector<8x128xbf16>
    %cst_16 = arith.constant dense<0.000000e+00> : vector<8x512xf32>
    %45 = tpu.matmul %44, %3, %cst_16 {dimension_numbers = #tpu.dot_dimension_numbers<[1], [0], [0], [1], [0, 0, 1, 1], [], []>} : vector<8x128xbf16>, vector<128x512xbf16>, vector<8x512xf32> -> vector<8x512xf32>
    %46 = arith.addf %43, %45 : vector<8x512xf32>
    %47 = vector.extract_strided_slice %46 {offsets = [0, 0], sizes = [8, 128], strides = [1, 1]} : vector<8x512xf32> to vector<8x128xf32>
    %48 = arith.negf %47 : vector<8x128xf32>
    %49 = math.exp %48 : vector<8x128xf32>
    %cst_17 = arith.constant 1.000000e+00 : f32
    %50 = vector.broadcast %cst_17 : f32 to vector<8x128xf32>
    %51 = arith.addf %50, %49 : vector<8x128xf32>
    %52 = arith.divf %50, %51 : vector<8x128xf32>
    %53 = vector.extract_strided_slice %46 {offsets = [0, 128], sizes = [8, 128], strides = [1, 1]} : vector<8x512xf32> to vector<8x128xf32>
    %54 = arith.negf %53 : vector<8x128xf32>
    %55 = math.exp %54 : vector<8x128xf32>
    %cst_18 = arith.constant 1.000000e+00 : f32
    %56 = vector.broadcast %cst_18 : f32 to vector<8x128xf32>
    %57 = arith.addf %56, %55 : vector<8x128xf32>
    %58 = arith.divf %56, %57 : vector<8x128xf32>
    %59 = vector.extract_strided_slice %46 {offsets = [0, 256], sizes = [8, 128], strides = [1, 1]} : vector<8x512xf32> to vector<8x128xf32>
    %60 = math.tanh %59 : vector<8x128xf32>
    %61 = vector.extract_strided_slice %46 {offsets = [0, 384], sizes = [8, 128], strides = [1, 1]} : vector<8x512xf32> to vector<8x128xf32>
    %62 = arith.negf %61 : vector<8x128xf32>
    %63 = math.exp %62 : vector<8x128xf32>
    %cst_19 = arith.constant 1.000000e+00 : f32
    %64 = vector.broadcast %cst_19 : f32 to vector<8x128xf32>
    %65 = arith.addf %64, %63 : vector<8x128xf32>
    %66 = arith.divf %64, %65 : vector<8x128xf32>
    %67 = arith.mulf %58, %34 : vector<8x128xf32>
    %68 = arith.mulf %52, %60 : vector<8x128xf32>
    %69 = arith.addf %67, %68 : vector<8x128xf32>
    %70 = math.tanh %69 : vector<8x128xf32>
    %71 = arith.mulf %66, %70 : vector<8x128xf32>
    %72 = arith.index_cast %c1_i32 : i32 to index
    %c0_20 = arith.constant 0 : index
    %c0_21 = arith.constant 0 : index
    %73 = vector.load %arg3[%72, %c0_20, %c0_21] : memref<8x8x128xf32, #tpu.memory_space<vmem>>, vector<1x8x128xf32>
    %74 = vector.shape_cast %73 : vector<1x8x128xf32> to vector<8x128xf32>
    %75 = vector.shape_cast %71 : vector<8x128xf32> to vector<1x8x128xf32>
    tpu.vector_store %arg3[%72, %c0_20, %c0_21], %75 {strides = array<i32>} : memref<8x8x128xf32, #tpu.memory_space<vmem>>, vector<1x8x128xf32>,
    %c2_i32 = arith.constant 2 : i32
    %76 = arith.index_cast %c2_i32 : i32 to index
    %c0_22 = arith.constant 0 : index
    %c0_23 = arith.constant 0 : index
    %77 = vector.load %arg1[%76, %c0_22, %c0_23] : memref<8x8x512xf32, #tpu.memory_space<vmem>>, vector<1x8x512xf32>
    %78 = vector.shape_cast %77 : vector<1x8x512xf32> to vector<8x512xf32>
    %79 = arith.truncf %71 : vector<8x128xf32> to vector<8x128xbf16>
    %cst_24 = arith.constant dense<0.000000e+00> : vector<8x512xf32>
    %80 = tpu.matmul %79, %3, %cst_24 {dimension_numbers = #tpu.dot_dimension_numbers<[1], [0], [0], [1], [0, 0, 1, 1], [], []>} : vector<8x128xbf16>, vector<128x512xbf16>, vector<8x512xf32> -> vector<8x512xf32>
    %81 = arith.addf %78, %80 : vector<8x512xf32>
    %82 = vector.extract_strided_slice %81 {offsets = [0, 0], sizes = [8, 128], strides = [1, 1]} : vector<8x512xf32> to vector<8x128xf32>
    %83 = arith.negf %82 : vector<8x128xf32>
    %84 = math.exp %83 : vector<8x128xf32>
    %cst_25 = arith.constant 1.000000e+00 : f32
    %85 = vector.broadcast %cst_25 : f32 to vector<8x128xf32>
    %86 = arith.addf %85, %84 : vector<8x128xf32>
    %87 = arith.divf %85, %86 : vector<8x128xf32>
    %88 = vector.extract_strided_slice %81 {offsets = [0, 128], sizes = [8, 128], strides = [1, 1]} : vector<8x512xf32> to vector<8x128xf32>
    %89 = arith.negf %88 : vector<8x128xf32>
    %90 = math.exp %89 : vector<8x128xf32>
    %cst_26 = arith.constant 1.000000e+00 : f32
    %91 = vector.broadcast %cst_26 : f32 to vector<8x128xf32>
    %92 = arith.addf %91, %90 : vector<8x128xf32>
    %93 = arith.divf %91, %92 : vector<8x128xf32>
    %94 = vector.extract_strided_slice %81 {offsets = [0, 256], sizes = [8, 128], strides = [1, 1]} : vector<8x512xf32> to vector<8x128xf32>
    %95 = math.tanh %94 : vector<8x128xf32>
    %96 = vector.extract_strided_slice %81 {offsets = [0, 384], sizes = [8, 128], strides = [1, 1]} : vector<8x512xf32> to vector<8x128xf32>
    %97 = arith.negf %96 : vector<8x128xf32>
    %98 = math.exp %97 : vector<8x128xf32>
    %cst_27 = arith.constant 1.000000e+00 : f32
    %99 = vector.broadcast %cst_27 : f32 to vector<8x128xf32>
    %100 = arith.addf %99, %98 : vector<8x128xf32>
    %101 = arith.divf %99, %100 : vector<8x128xf32>
    %102 = arith.mulf %93, %69 : vector<8x128xf32>
    %103 = arith.mulf %87, %95 : vector<8x128xf32>
    %104 = arith.addf %102, %103 : vector<8x128xf32>
    %105 = math.tanh %104 : vector<8x128xf32>
    %106 = arith.mulf %101, %105 : vector<8x128xf32>
    %107 = arith.index_cast %c2_i32 : i32 to index
    %c0_28 = arith.constant 0 : index
    %c0_29 = arith.constant 0 : index
    %108 = vector.load %arg3[%107, %c0_28, %c0_29] : memref<8x8x128xf32, #tpu.memory_space<vmem>>, vector<1x8x128xf32>
    %109 = vector.shape_cast %108 : vector<1x8x128xf32> to vector<8x128xf32>
    %110 = vector.shape_cast %106 : vector<8x128xf32> to vector<1x8x128xf32>
    tpu.vector_store %arg3[%107, %c0_28, %c0_29], %110 {strides = array<i32>} : memref<8x8x128xf32, #tpu.memory_space<vmem>>, vector<1x8x128xf32>,
    %c3_i32 = arith.constant 3 : i32
    %111 = arith.index_cast %c3_i32 : i32 to index
    %c0_30 = arith.constant 0 : index
    %c0_31 = arith.constant 0 : index
    %112 = vector.load %arg1[%111, %c0_30, %c0_31] : memref<8x8x512xf32, #tpu.memory_space<vmem>>, vector<1x8x512xf32>
    %113 = vector.shape_cast %112 : vector<1x8x512xf32> to vector<8x512xf32>
    %114 = arith.truncf %106 : vector<8x128xf32> to vector<8x128xbf16>
    %cst_32 = arith.constant dense<0.000000e+00> : vector<8x512xf32>
    %115 = tpu.matmul %114, %3, %cst_32 {dimension_numbers = #tpu.dot_dimension_numbers<[1], [0], [0], [1], [0, 0, 1, 1], [], []>} : vector<8x128xbf16>, vector<128x512xbf16>, vector<8x512xf32> -> vector<8x512xf32>
    %116 = arith.addf %113, %115 : vector<8x512xf32>
    %117 = vector.extract_strided_slice %116 {offsets = [0, 0], sizes = [8, 128], strides = [1, 1]} : vector<8x512xf32> to vector<8x128xf32>
    %118 = arith.negf %117 : vector<8x128xf32>
    %119 = math.exp %118 : vector<8x128xf32>
    %cst_33 = arith.constant 1.000000e+00 : f32
    %120 = vector.broadcast %cst_33 : f32 to vector<8x128xf32>
    %121 = arith.addf %120, %119 : vector<8x128xf32>
    %122 = arith.divf %120, %121 : vector<8x128xf32>
    %123 = vector.extract_strided_slice %116 {offsets = [0, 128], sizes = [8, 128], strides = [1, 1]} : vector<8x512xf32> to vector<8x128xf32>
    %124 = arith.negf %123 : vector<8x128xf32>
    %125 = math.exp %124 : vector<8x128xf32>
    %cst_34 = arith.constant 1.000000e+00 : f32
    %126 = vector.broadcast %cst_34 : f32 to vector<8x128xf32>
    %127 = arith.addf %126, %125 : vector<8x128xf32>
    %128 = arith.divf %126, %127 : vector<8x128xf32>
    %129 = vector.extract_strided_slice %116 {offsets = [0, 256], sizes = [8, 128], strides = [1, 1]} : vector<8x512xf32> to vector<8x128xf32>
    %130 = math.tanh %129 : vector<8x128xf32>
    %131 = vector.extract_strided_slice %116 {offsets = [0, 384], sizes = [8, 128], strides = [1, 1]} : vector<8x512xf32> to vector<8x128xf32>
    %132 = arith.negf %131 : vector<8x128xf32>
    %133 = math.exp %132 : vector<8x128xf32>
    %cst_35 = arith.constant 1.000000e+00 : f32
    %134 = vector.broadcast %cst_35 : f32 to vector<8x128xf32>
    %135 = arith.addf %134, %133 : vector<8x128xf32>
    %136 = arith.divf %134, %135 : vector<8x128xf32>
    %137 = arith.mulf %128, %104 : vector<8x128xf32>
    %138 = arith.mulf %122, %130 : vector<8x128xf32>
    %139 = arith.addf %137, %138 : vector<8x128xf32>
    %140 = math.tanh %139 : vector<8x128xf32>
    %141 = arith.mulf %136, %140 : vector<8x128xf32>
    %142 = arith.index_cast %c3_i32 : i32 to index
    %c0_36 = arith.constant 0 : index
    %c0_37 = arith.constant 0 : index
    %143 = vector.load %arg3[%142, %c0_36, %c0_37] : memref<8x8x128xf32, #tpu.memory_space<vmem>>, vector<1x8x128xf32>
    %144 = vector.shape_cast %143 : vector<1x8x128xf32> to vector<8x128xf32>
    %145 = vector.shape_cast %141 : vector<8x128xf32> to vector<1x8x128xf32>
    tpu.vector_store %arg3[%142, %c0_36, %c0_37], %145 {strides = array<i32>} : memref<8x8x128xf32, #tpu.memory_space<vmem>>, vector<1x8x128xf32>,
    %c4_i32 = arith.constant 4 : i32
    %146 = arith.index_cast %c4_i32 : i32 to index
    %c0_38 = arith.constant 0 : index
    %c0_39 = arith.constant 0 : index
    %147 = vector.load %arg1[%146, %c0_38, %c0_39] : memref<8x8x512xf32, #tpu.memory_space<vmem>>, vector<1x8x512xf32>
    %148 = vector.shape_cast %147 : vector<1x8x512xf32> to vector<8x512xf32>
    %149 = arith.truncf %141 : vector<8x128xf32> to vector<8x128xbf16>
    %cst_40 = arith.constant dense<0.000000e+00> : vector<8x512xf32>
    %150 = tpu.matmul %149, %3, %cst_40 {dimension_numbers = #tpu.dot_dimension_numbers<[1], [0], [0], [1], [0, 0, 1, 1], [], []>} : vector<8x128xbf16>, vector<128x512xbf16>, vector<8x512xf32> -> vector<8x512xf32>
    %151 = arith.addf %148, %150 : vector<8x512xf32>
    %152 = vector.extract_strided_slice %151 {offsets = [0, 0], sizes = [8, 128], strides = [1, 1]} : vector<8x512xf32> to vector<8x128xf32>
    %153 = arith.negf %152 : vector<8x128xf32>
    %154 = math.exp %153 : vector<8x128xf32>
    %cst_41 = arith.constant 1.000000e+00 : f32
    %155 = vector.broadcast %cst_41 : f32 to vector<8x128xf32>
    %156 = arith.addf %155, %154 : vector<8x128xf32>
    %157 = arith.divf %155, %156 : vector<8x128xf32>
    %158 = vector.extract_strided_slice %151 {offsets = [0, 128], sizes = [8, 128], strides = [1, 1]} : vector<8x512xf32> to vector<8x128xf32>
    %159 = arith.negf %158 : vector<8x128xf32>
    %160 = math.exp %159 : vector<8x128xf32>
    %cst_42 = arith.constant 1.000000e+00 : f32
    %161 = vector.broadcast %cst_42 : f32 to vector<8x128xf32>
    %162 = arith.addf %161, %160 : vector<8x128xf32>
    %163 = arith.divf %161, %162 : vector<8x128xf32>
    %164 = vector.extract_strided_slice %151 {offsets = [0, 256], sizes = [8, 128], strides = [1, 1]} : vector<8x512xf32> to vector<8x128xf32>
    %165 = math.tanh %164 : vector<8x128xf32>
    %166 = vector.extract_strided_slice %151 {offsets = [0, 384], sizes = [8, 128], strides = [1, 1]} : vector<8x512xf32> to vector<8x128xf32>
    %167 = arith.negf %166 : vector<8x128xf32>
    %168 = math.exp %167 : vector<8x128xf32>
    %cst_43 = arith.constant 1.000000e+00 : f32
    %169 = vector.broadcast %cst_43 : f32 to vector<8x128xf32>
    %170 = arith.addf %169, %168 : vector<8x128xf32>
    %171 = arith.divf %169, %170 : vector<8x128xf32>
    %172 = arith.mulf %163, %139 : vector<8x128xf32>
    %173 = arith.mulf %157, %165 : vector<8x128xf32>
    %174 = arith.addf %172, %173 : vector<8x128xf32>
    %175 = math.tanh %174 : vector<8x128xf32>
    %176 = arith.mulf %171, %175 : vector<8x128xf32>
    %177 = arith.index_cast %c4_i32 : i32 to index
    %c0_44 = arith.constant 0 : index
    %c0_45 = arith.constant 0 : index
    %178 = vector.load %arg3[%177, %c0_44, %c0_45] : memref<8x8x128xf32, #tpu.memory_space<vmem>>, vector<1x8x128xf32>
    %179 = vector.shape_cast %178 : vector<1x8x128xf32> to vector<8x128xf32>
    %180 = vector.shape_cast %176 : vector<8x128xf32> to vector<1x8x128xf32>
    tpu.vector_store %arg3[%177, %c0_44, %c0_45], %180 {strides = array<i32>} : memref<8x8x128xf32, #tpu.memory_space<vmem>>, vector<1x8x128xf32>,
    %c5_i32 = arith.constant 5 : i32
    %181 = arith.index_cast %c5_i32 : i32 to index
    %c0_46 = arith.constant 0 : index
    %c0_47 = arith.constant 0 : index
    %182 = vector.load %arg1[%181, %c0_46, %c0_47] : memref<8x8x512xf32, #tpu.memory_space<vmem>>, vector<1x8x512xf32>
    %183 = vector.shape_cast %182 : vector<1x8x512xf32> to vector<8x512xf32>
    %184 = arith.truncf %176 : vector<8x128xf32> to vector<8x128xbf16>
    %cst_48 = arith.constant dense<0.000000e+00> : vector<8x512xf32>
    %185 = tpu.matmul %184, %3, %cst_48 {dimension_numbers = #tpu.dot_dimension_numbers<[1], [0], [0], [1], [0, 0, 1, 1], [], []>} : vector<8x128xbf16>, vector<128x512xbf16>, vector<8x512xf32> -> vector<8x512xf32>
    %186 = arith.addf %183, %185 : vector<8x512xf32>
    %187 = vector.extract_strided_slice %186 {offsets = [0, 0], sizes = [8, 128], strides = [1, 1]} : vector<8x512xf32> to vector<8x128xf32>
    %188 = arith.negf %187 : vector<8x128xf32>
    %189 = math.exp %188 : vector<8x128xf32>
    %cst_49 = arith.constant 1.000000e+00 : f32
    %190 = vector.broadcast %cst_49 : f32 to vector<8x128xf32>
    %191 = arith.addf %190, %189 : vector<8x128xf32>
    %192 = arith.divf %190, %191 : vector<8x128xf32>
    %193 = vector.extract_strided_slice %186 {offsets = [0, 128], sizes = [8, 128], strides = [1, 1]} : vector<8x512xf32> to vector<8x128xf32>
    %194 = arith.negf %193 : vector<8x128xf32>
    %195 = math.exp %194 : vector<8x128xf32>
    %cst_50 = arith.constant 1.000000e+00 : f32
    %196 = vector.broadcast %cst_50 : f32 to vector<8x128xf32>
    %197 = arith.addf %196, %195 : vector<8x128xf32>
    %198 = arith.divf %196, %197 : vector<8x128xf32>
    %199 = vector.extract_strided_slice %186 {offsets = [0, 256], sizes = [8, 128], strides = [1, 1]} : vector<8x512xf32> to vector<8x128xf32>
    %200 = math.tanh %199 : vector<8x128xf32>
    %201 = vector.extract_strided_slice %186 {offsets = [0, 384], sizes = [8, 128], strides = [1, 1]} : vector<8x512xf32> to vector<8x128xf32>
    %202 = arith.negf %201 : vector<8x128xf32>
    %203 = math.exp %202 : vector<8x128xf32>
    %cst_51 = arith.constant 1.000000e+00 : f32
    %204 = vector.broadcast %cst_51 : f32 to vector<8x128xf32>
    %205 = arith.addf %204, %203 : vector<8x128xf32>
    %206 = arith.divf %204, %205 : vector<8x128xf32>
    %207 = arith.mulf %198, %174 : vector<8x128xf32>
    %208 = arith.mulf %192, %200 : vector<8x128xf32>
    %209 = arith.addf %207, %208 : vector<8x128xf32>
    %210 = math.tanh %209 : vector<8x128xf32>
    %211 = arith.mulf %206, %210 : vector<8x128xf32>
    %212 = arith.index_cast %c5_i32 : i32 to index
    %c0_52 = arith.constant 0 : index
    %c0_53 = arith.constant 0 : index
    %213 = vector.load %arg3[%212, %c0_52, %c0_53] : memref<8x8x128xf32, #tpu.memory_space<vmem>>, vector<1x8x128xf32>
    %214 = vector.shape_cast %213 : vector<1x8x128xf32> to vector<8x128xf32>
    %215 = vector.shape_cast %211 : vector<8x128xf32> to vector<1x8x128xf32>
    tpu.vector_store %arg3[%212, %c0_52, %c0_53], %215 {strides = array<i32>} : memref<8x8x128xf32, #tpu.memory_space<vmem>>, vector<1x8x128xf32>,
    %c6_i32 = arith.constant 6 : i32
    %216 = arith.index_cast %c6_i32 : i32 to index
    %c0_54 = arith.constant 0 : index
    %c0_55 = arith.constant 0 : index
    %217 = vector.load %arg1[%216, %c0_54, %c0_55] : memref<8x8x512xf32, #tpu.memory_space<vmem>>, vector<1x8x512xf32>
    %218 = vector.shape_cast %217 : vector<1x8x512xf32> to vector<8x512xf32>
    %219 = arith.truncf %211 : vector<8x128xf32> to vector<8x128xbf16>
    %cst_56 = arith.constant dense<0.000000e+00> : vector<8x512xf32>
    %220 = tpu.matmul %219, %3, %cst_56 {dimension_numbers = #tpu.dot_dimension_numbers<[1], [0], [0], [1], [0, 0, 1, 1], [], []>} : vector<8x128xbf16>, vector<128x512xbf16>, vector<8x512xf32> -> vector<8x512xf32>
    %221 = arith.addf %218, %220 : vector<8x512xf32>
    %222 = vector.extract_strided_slice %221 {offsets = [0, 0], sizes = [8, 128], strides = [1, 1]} : vector<8x512xf32> to vector<8x128xf32>
    %223 = arith.negf %222 : vector<8x128xf32>
    %224 = math.exp %223 : vector<8x128xf32>
    %cst_57 = arith.constant 1.000000e+00 : f32
    %225 = vector.broadcast %cst_57 : f32 to vector<8x128xf32>
    %226 = arith.addf %225, %224 : vector<8x128xf32>
    %227 = arith.divf %225, %226 : vector<8x128xf32>
    %228 = vector.extract_strided_slice %221 {offsets = [0, 128], sizes = [8, 128], strides = [1, 1]} : vector<8x512xf32> to vector<8x128xf32>
    %229 = arith.negf %228 : vector<8x128xf32>
    %230 = math.exp %229 : vector<8x128xf32>
    %cst_58 = arith.constant 1.000000e+00 : f32
    %231 = vector.broadcast %cst_58 : f32 to vector<8x128xf32>
    %232 = arith.addf %231, %230 : vector<8x128xf32>
    %233 = arith.divf %231, %232 : vector<8x128xf32>
    %234 = vector.extract_strided_slice %221 {offsets = [0, 256], sizes = [8, 128], strides = [1, 1]} : vector<8x512xf32> to vector<8x128xf32>
    %235 = math.tanh %234 : vector<8x128xf32>
    %236 = vector.extract_strided_slice %221 {offsets = [0, 384], sizes = [8, 128], strides = [1, 1]} : vector<8x512xf32> to vector<8x128xf32>
    %237 = arith.negf %236 : vector<8x128xf32>
    %238 = math.exp %237 : vector<8x128xf32>
    %cst_59 = arith.constant 1.000000e+00 : f32
    %239 = vector.broadcast %cst_59 : f32 to vector<8x128xf32>
    %240 = arith.addf %239, %238 : vector<8x128xf32>
    %241 = arith.divf %239, %240 : vector<8x128xf32>
    %242 = arith.mulf %233, %209 : vector<8x128xf32>
    %243 = arith.mulf %227, %235 : vector<8x128xf32>
    %244 = arith.addf %242, %243 : vector<8x128xf32>
    %245 = math.tanh %244 : vector<8x128xf32>
    %246 = arith.mulf %241, %245 : vector<8x128xf32>
    %247 = arith.index_cast %c6_i32 : i32 to index
    %c0_60 = arith.constant 0 : index
    %c0_61 = arith.constant 0 : index
    %248 = vector.load %arg3[%247, %c0_60, %c0_61] : memref<8x8x128xf32, #tpu.memory_space<vmem>>, vector<1x8x128xf32>
    %249 = vector.shape_cast %248 : vector<1x8x128xf32> to vector<8x128xf32>
    %250 = vector.shape_cast %246 : vector<8x128xf32> to vector<1x8x128xf32>
    tpu.vector_store %arg3[%247, %c0_60, %c0_61], %250 {strides = array<i32>} : memref<8x8x128xf32, #tpu.memory_space<vmem>>, vector<1x8x128xf32>,
    %c7_i32 = arith.constant 7 : i32
    %251 = arith.index_cast %c7_i32 : i32 to index
    %c0_62 = arith.constant 0 : index
    %c0_63 = arith.constant 0 : index
    %252 = vector.load %arg1[%251, %c0_62, %c0_63] : memref<8x8x512xf32, #tpu.memory_space<vmem>>, vector<1x8x512xf32>
    %253 = vector.shape_cast %252 : vector<1x8x512xf32> to vector<8x512xf32>
    %254 = arith.truncf %246 : vector<8x128xf32> to vector<8x128xbf16>
    %cst_64 = arith.constant dense<0.000000e+00> : vector<8x512xf32>
    %255 = tpu.matmul %254, %3, %cst_64 {dimension_numbers = #tpu.dot_dimension_numbers<[1], [0], [0], [1], [0, 0, 1, 1], [], []>} : vector<8x128xbf16>, vector<128x512xbf16>, vector<8x512xf32> -> vector<8x512xf32>
    %256 = arith.addf %253, %255 : vector<8x512xf32>
    %257 = vector.extract_strided_slice %256 {offsets = [0, 0], sizes = [8, 128], strides = [1, 1]} : vector<8x512xf32> to vector<8x128xf32>
    %258 = arith.negf %257 : vector<8x128xf32>
    %259 = math.exp %258 : vector<8x128xf32>
    %cst_65 = arith.constant 1.000000e+00 : f32
    %260 = vector.broadcast %cst_65 : f32 to vector<8x128xf32>
    %261 = arith.addf %260, %259 : vector<8x128xf32>
    %262 = arith.divf %260, %261 : vector<8x128xf32>
    %263 = vector.extract_strided_slice %256 {offsets = [0, 128], sizes = [8, 128], strides = [1, 1]} : vector<8x512xf32> to vector<8x128xf32>
    %264 = arith.negf %263 : vector<8x128xf32>
    %265 = math.exp %264 : vector<8x128xf32>
    %cst_66 = arith.constant 1.000000e+00 : f32
    %266 = vector.broadcast %cst_66 : f32 to vector<8x128xf32>
    %267 = arith.addf %266, %265 : vector<8x128xf32>
    %268 = arith.divf %266, %267 : vector<8x128xf32>
    %269 = vector.extract_strided_slice %256 {offsets = [0, 256], sizes = [8, 128], strides = [1, 1]} : vector<8x512xf32> to vector<8x128xf32>
    %270 = math.tanh %269 : vector<8x128xf32>
    %271 = vector.extract_strided_slice %256 {offsets = [0, 384], sizes = [8, 128], strides = [1, 1]} : vector<8x512xf32> to vector<8x128xf32>
    %272 = arith.negf %271 : vector<8x128xf32>
    %273 = math.exp %272 : vector<8x128xf32>
    %cst_67 = arith.constant 1.000000e+00 : f32
    %274 = vector.broadcast %cst_67 : f32 to vector<8x128xf32>
    %275 = arith.addf %274, %273 : vector<8x128xf32>
    %276 = arith.divf %274, %275 : vector<8x128xf32>
    %277 = arith.mulf %268, %244 : vector<8x128xf32>
    %278 = arith.mulf %262, %270 : vector<8x128xf32>
    %279 = arith.addf %277, %278 : vector<8x128xf32>
    %280 = math.tanh %279 : vector<8x128xf32>
    %281 = arith.mulf %276, %280 : vector<8x128xf32>
    %282 = arith.index_cast %c7_i32 : i32 to index
    %c0_68 = arith.constant 0 : index
    %c0_69 = arith.constant 0 : index
    %283 = vector.load %arg3[%282, %c0_68, %c0_69] : memref<8x8x128xf32, #tpu.memory_space<vmem>>, vector<1x8x128xf32>
    %284 = vector.shape_cast %283 : vector<1x8x128xf32> to vector<8x128xf32>
    %285 = vector.shape_cast %281 : vector<8x128xf32> to vector<1x8x128xf32>
    tpu.vector_store %arg3[%282, %c0_68, %c0_69], %285 {strides = array<i32>} : memref<8x8x128xf32, #tpu.memory_space<vmem>>, vector<1x8x128xf32>,
    %c8_i32 = arith.constant 8 : i32
    %c0_70 = arith.constant 0 : index
    %c0_71 = arith.constant 0 : index
    %286 = vector.load %arg5[%c0_70, %c0_71] : memref<8x128xf32, #tpu.memory_space<vmem>>, vector<8x128xf32>
    tpu.vector_store %arg5[%c0_70, %c0_71], %281 {strides = array<i32>} : memref<8x128xf32, #tpu.memory_space<vmem>>, vector<8x128xf32>,
    %c0_72 = arith.constant 0 : index
    %c0_73 = arith.constant 0 : index
    %287 = vector.load %arg6[%c0_72, %c0_73] : memref<8x128xf32, #tpu.memory_space<vmem>>, vector<8x128xf32>
    tpu.vector_store %arg6[%c0_72, %c0_73], %279 {strides = array<i32>} : memref<8x128xf32, #tpu.memory_space<vmem>>, vector<8x128xf32>,
    return
  }
  func.func @transform_0(%arg0: i32) -> (i32, i32, i32) {
    %c0_i32 = arith.constant 0 : i32
    %c0_i32_0 = arith.constant 0 : i32
    %c0_i32_1 = arith.constant 0 : i32
    return %arg0, %c0_i32, %c0_i32_0 : i32, i32, i32
  }
  func.func @transform_2(%arg0: i32) -> (i32, i32, i32) {
    %c0_i32 = arith.constant 0 : i32
    %c0_i32_0 = arith.constant 0 : i32
    %c0_i32_1 = arith.constant 0 : i32
    return %arg0, %c0_i32, %c0_i32_0 : i32, i32, i32
  }
}

module attributes {stable_mosaic.version = 11 : i64} {
  func.func @_lstm_head_kernel(%arg0: i32, %arg1: memref<8x8x512xf32, #tpu.memory_space<vmem>>, %arg2: memref<128x512xbf16, #tpu.memory_space<any>>, %arg3: memref<128x128xf32, #tpu.memory_space<vmem>>, %arg4: memref<1x128xf32, #tpu.memory_space<vmem>>, %arg5: memref<8x128xf32, #tpu.memory_space<vmem>>, %arg6: memref<128x512xbf16, #tpu.memory_space<vmem>>, %arg7: memref<8x128xf32, #tpu.memory_space<vmem>>, %arg8: memref<8x128xf32, #tpu.memory_space<vmem>>, %arg9: memref<!tpu.dma_semaphore, #tpu.memory_space<semaphore_mem>>) attributes {dimension_semantics = [#tpu.dimension_semantics<arbitrary>], iteration_bounds = array<i64: 1>, scalar_prefetch = 0 : i64, scratch_operands = 4 : i64, tpu.core_type = #tpu.core_type<tc>, window_params = [{transform_indices = @transform_0, window_bounds = array<i64: 8, 8, 512>}, {}, {pipeline_mode = #tpu.pipeline_mode<synchronous>, transform_indices = @transform_2, window_bounds = array<i64: 128, 128>}, {pipeline_mode = #tpu.pipeline_mode<synchronous>, transform_indices = @transform_3, window_bounds = array<i64: 1, 128>}, {pipeline_mode = #tpu.pipeline_mode<synchronous>, transform_indices = @transform_4, window_bounds = array<i64: 8, 128>}]} {
    %c0_i32 = arith.constant 0 : i32
    %0 = arith.cmpi eq, %arg0, %c0_i32 : i32
    %1 = arith.extui %0 : i1 to i32
    %c0_i32_0 = arith.constant 0 : i32
    %2 = arith.cmpi ne, %1, %c0_i32_0 : i32
    scf.if %2 {
      tpu.enqueue_dma source(%arg2 : memref<128x512xbf16, #tpu.memory_space<any>>) target(%arg6 : memref<128x512xbf16, #tpu.memory_space<vmem>>) target_semaphore(%arg9 : memref<!tpu.dma_semaphore, #tpu.memory_space<semaphore_mem>>)
      tpu.wait_dma2 semaphore(%arg9 : memref<!tpu.dma_semaphore, #tpu.memory_space<semaphore_mem>>) src(%arg2 : memref<128x512xbf16, #tpu.memory_space<any>>) dst(%arg6 : memref<128x512xbf16, #tpu.memory_space<vmem>>)
      %cst_60 = arith.constant 0.000000e+00 : f32
      %259 = vector.broadcast %cst_60 : f32 to vector<8x128xf32>
      %c0_61 = arith.constant 0 : index
      %c0_62 = arith.constant 0 : index
      %260 = vector.load %arg7[%c0_61, %c0_62] : memref<8x128xf32, #tpu.memory_space<vmem>>, vector<8x128xf32>
      tpu.vector_store %arg7[%c0_61, %c0_62], %259 {strides = array<i32>} : memref<8x128xf32, #tpu.memory_space<vmem>>, vector<8x128xf32>,
      %cst_63 = arith.constant 0.000000e+00 : f32
      %261 = vector.broadcast %cst_63 : f32 to vector<8x128xf32>
      %c0_64 = arith.constant 0 : index
      %c0_65 = arith.constant 0 : index
      %262 = vector.load %arg8[%c0_64, %c0_65] : memref<8x128xf32, #tpu.memory_space<vmem>>, vector<8x128xf32>
      tpu.vector_store %arg8[%c0_64, %c0_65], %261 {strides = array<i32>} : memref<8x128xf32, #tpu.memory_space<vmem>>, vector<8x128xf32>,
    } else {
    }
    %c0 = arith.constant 0 : index
    %c0_1 = arith.constant 0 : index
    %3 = vector.load %arg6[%c0, %c0_1] : memref<128x512xbf16, #tpu.memory_space<vmem>>, vector<128x512xbf16>
    %c0_2 = arith.constant 0 : index
    %c0_3 = arith.constant 0 : index
    %4 = vector.load %arg7[%c0_2, %c0_3] : memref<8x128xf32, #tpu.memory_space<vmem>>, vector<8x128xf32>
    %c0_4 = arith.constant 0 : index
    %c0_5 = arith.constant 0 : index
    %5 = vector.load %arg8[%c0_4, %c0_5] : memref<8x128xf32, #tpu.memory_space<vmem>>, vector<8x128xf32>
    %c0_i32_6 = arith.constant 0 : i32
    %6 = arith.index_cast %c0_i32_6 : i32 to index
    %c0_7 = arith.constant 0 : index
    %c0_8 = arith.constant 0 : index
    %7 = vector.load %arg1[%6, %c0_7, %c0_8] : memref<8x8x512xf32, #tpu.memory_space<vmem>>, vector<1x8x512xf32>
    %8 = vector.shape_cast %7 : vector<1x8x512xf32> to vector<8x512xf32>
    %9 = arith.truncf %4 : vector<8x128xf32> to vector<8x128xbf16>
    %cst = arith.constant dense<0.000000e+00> : vector<8x512xf32>
    %10 = tpu.matmul %9, %3, %cst {dimension_numbers = #tpu.dot_dimension_numbers<[1], [0], [0], [1], [0, 0, 1, 1], [], []>} : vector<8x128xbf16>, vector<128x512xbf16>, vector<8x512xf32> -> vector<8x512xf32>
    %11 = arith.addf %8, %10 : vector<8x512xf32>
    %12 = vector.extract_strided_slice %11 {offsets = [0, 0], sizes = [8, 128], strides = [1, 1]} : vector<8x512xf32> to vector<8x128xf32>
    %13 = arith.negf %12 : vector<8x128xf32>
    %14 = math.exp %13 : vector<8x128xf32>
    %cst_9 = arith.constant 1.000000e+00 : f32
    %15 = vector.broadcast %cst_9 : f32 to vector<8x128xf32>
    %16 = arith.addf %15, %14 : vector<8x128xf32>
    %17 = arith.divf %15, %16 : vector<8x128xf32>
    %18 = vector.extract_strided_slice %11 {offsets = [0, 128], sizes = [8, 128], strides = [1, 1]} : vector<8x512xf32> to vector<8x128xf32>
    %19 = arith.negf %18 : vector<8x128xf32>
    %20 = math.exp %19 : vector<8x128xf32>
    %cst_10 = arith.constant 1.000000e+00 : f32
    %21 = vector.broadcast %cst_10 : f32 to vector<8x128xf32>
    %22 = arith.addf %21, %20 : vector<8x128xf32>
    %23 = arith.divf %21, %22 : vector<8x128xf32>
    %24 = vector.extract_strided_slice %11 {offsets = [0, 256], sizes = [8, 128], strides = [1, 1]} : vector<8x512xf32> to vector<8x128xf32>
    %25 = math.tanh %24 : vector<8x128xf32>
    %26 = vector.extract_strided_slice %11 {offsets = [0, 384], sizes = [8, 128], strides = [1, 1]} : vector<8x512xf32> to vector<8x128xf32>
    %27 = arith.negf %26 : vector<8x128xf32>
    %28 = math.exp %27 : vector<8x128xf32>
    %cst_11 = arith.constant 1.000000e+00 : f32
    %29 = vector.broadcast %cst_11 : f32 to vector<8x128xf32>
    %30 = arith.addf %29, %28 : vector<8x128xf32>
    %31 = arith.divf %29, %30 : vector<8x128xf32>
    %32 = arith.mulf %23, %5 : vector<8x128xf32>
    %33 = arith.mulf %17, %25 : vector<8x128xf32>
    %34 = arith.addf %32, %33 : vector<8x128xf32>
    %35 = math.tanh %34 : vector<8x128xf32>
    %36 = arith.mulf %31, %35 : vector<8x128xf32>
    %c1_i32 = arith.constant 1 : i32
    %37 = arith.index_cast %c1_i32 : i32 to index
    %c0_12 = arith.constant 0 : index
    %c0_13 = arith.constant 0 : index
    %38 = vector.load %arg1[%37, %c0_12, %c0_13] : memref<8x8x512xf32, #tpu.memory_space<vmem>>, vector<1x8x512xf32>
    %39 = vector.shape_cast %38 : vector<1x8x512xf32> to vector<8x512xf32>
    %40 = arith.truncf %36 : vector<8x128xf32> to vector<8x128xbf16>
    %cst_14 = arith.constant dense<0.000000e+00> : vector<8x512xf32>
    %41 = tpu.matmul %40, %3, %cst_14 {dimension_numbers = #tpu.dot_dimension_numbers<[1], [0], [0], [1], [0, 0, 1, 1], [], []>} : vector<8x128xbf16>, vector<128x512xbf16>, vector<8x512xf32> -> vector<8x512xf32>
    %42 = arith.addf %39, %41 : vector<8x512xf32>
    %43 = vector.extract_strided_slice %42 {offsets = [0, 0], sizes = [8, 128], strides = [1, 1]} : vector<8x512xf32> to vector<8x128xf32>
    %44 = arith.negf %43 : vector<8x128xf32>
    %45 = math.exp %44 : vector<8x128xf32>
    %cst_15 = arith.constant 1.000000e+00 : f32
    %46 = vector.broadcast %cst_15 : f32 to vector<8x128xf32>
    %47 = arith.addf %46, %45 : vector<8x128xf32>
    %48 = arith.divf %46, %47 : vector<8x128xf32>
    %49 = vector.extract_strided_slice %42 {offsets = [0, 128], sizes = [8, 128], strides = [1, 1]} : vector<8x512xf32> to vector<8x128xf32>
    %50 = arith.negf %49 : vector<8x128xf32>
    %51 = math.exp %50 : vector<8x128xf32>
    %cst_16 = arith.constant 1.000000e+00 : f32
    %52 = vector.broadcast %cst_16 : f32 to vector<8x128xf32>
    %53 = arith.addf %52, %51 : vector<8x128xf32>
    %54 = arith.divf %52, %53 : vector<8x128xf32>
    %55 = vector.extract_strided_slice %42 {offsets = [0, 256], sizes = [8, 128], strides = [1, 1]} : vector<8x512xf32> to vector<8x128xf32>
    %56 = math.tanh %55 : vector<8x128xf32>
    %57 = vector.extract_strided_slice %42 {offsets = [0, 384], sizes = [8, 128], strides = [1, 1]} : vector<8x512xf32> to vector<8x128xf32>
    %58 = arith.negf %57 : vector<8x128xf32>
    %59 = math.exp %58 : vector<8x128xf32>
    %cst_17 = arith.constant 1.000000e+00 : f32
    %60 = vector.broadcast %cst_17 : f32 to vector<8x128xf32>
    %61 = arith.addf %60, %59 : vector<8x128xf32>
    %62 = arith.divf %60, %61 : vector<8x128xf32>
    %63 = arith.mulf %54, %34 : vector<8x128xf32>
    %64 = arith.mulf %48, %56 : vector<8x128xf32>
    %65 = arith.addf %63, %64 : vector<8x128xf32>
    %66 = math.tanh %65 : vector<8x128xf32>
    %67 = arith.mulf %62, %66 : vector<8x128xf32>
    %c2_i32 = arith.constant 2 : i32
    %68 = arith.index_cast %c2_i32 : i32 to index
    %c0_18 = arith.constant 0 : index
    %c0_19 = arith.constant 0 : index
    %69 = vector.load %arg1[%68, %c0_18, %c0_19] : memref<8x8x512xf32, #tpu.memory_space<vmem>>, vector<1x8x512xf32>
    %70 = vector.shape_cast %69 : vector<1x8x512xf32> to vector<8x512xf32>
    %71 = arith.truncf %67 : vector<8x128xf32> to vector<8x128xbf16>
    %cst_20 = arith.constant dense<0.000000e+00> : vector<8x512xf32>
    %72 = tpu.matmul %71, %3, %cst_20 {dimension_numbers = #tpu.dot_dimension_numbers<[1], [0], [0], [1], [0, 0, 1, 1], [], []>} : vector<8x128xbf16>, vector<128x512xbf16>, vector<8x512xf32> -> vector<8x512xf32>
    %73 = arith.addf %70, %72 : vector<8x512xf32>
    %74 = vector.extract_strided_slice %73 {offsets = [0, 0], sizes = [8, 128], strides = [1, 1]} : vector<8x512xf32> to vector<8x128xf32>
    %75 = arith.negf %74 : vector<8x128xf32>
    %76 = math.exp %75 : vector<8x128xf32>
    %cst_21 = arith.constant 1.000000e+00 : f32
    %77 = vector.broadcast %cst_21 : f32 to vector<8x128xf32>
    %78 = arith.addf %77, %76 : vector<8x128xf32>
    %79 = arith.divf %77, %78 : vector<8x128xf32>
    %80 = vector.extract_strided_slice %73 {offsets = [0, 128], sizes = [8, 128], strides = [1, 1]} : vector<8x512xf32> to vector<8x128xf32>
    %81 = arith.negf %80 : vector<8x128xf32>
    %82 = math.exp %81 : vector<8x128xf32>
    %cst_22 = arith.constant 1.000000e+00 : f32
    %83 = vector.broadcast %cst_22 : f32 to vector<8x128xf32>
    %84 = arith.addf %83, %82 : vector<8x128xf32>
    %85 = arith.divf %83, %84 : vector<8x128xf32>
    %86 = vector.extract_strided_slice %73 {offsets = [0, 256], sizes = [8, 128], strides = [1, 1]} : vector<8x512xf32> to vector<8x128xf32>
    %87 = math.tanh %86 : vector<8x128xf32>
    %88 = vector.extract_strided_slice %73 {offsets = [0, 384], sizes = [8, 128], strides = [1, 1]} : vector<8x512xf32> to vector<8x128xf32>
    %89 = arith.negf %88 : vector<8x128xf32>
    %90 = math.exp %89 : vector<8x128xf32>
    %cst_23 = arith.constant 1.000000e+00 : f32
    %91 = vector.broadcast %cst_23 : f32 to vector<8x128xf32>
    %92 = arith.addf %91, %90 : vector<8x128xf32>
    %93 = arith.divf %91, %92 : vector<8x128xf32>
    %94 = arith.mulf %85, %65 : vector<8x128xf32>
    %95 = arith.mulf %79, %87 : vector<8x128xf32>
    %96 = arith.addf %94, %95 : vector<8x128xf32>
    %97 = math.tanh %96 : vector<8x128xf32>
    %98 = arith.mulf %93, %97 : vector<8x128xf32>
    %c3_i32 = arith.constant 3 : i32
    %99 = arith.index_cast %c3_i32 : i32 to index
    %c0_24 = arith.constant 0 : index
    %c0_25 = arith.constant 0 : index
    %100 = vector.load %arg1[%99, %c0_24, %c0_25] : memref<8x8x512xf32, #tpu.memory_space<vmem>>, vector<1x8x512xf32>
    %101 = vector.shape_cast %100 : vector<1x8x512xf32> to vector<8x512xf32>
    %102 = arith.truncf %98 : vector<8x128xf32> to vector<8x128xbf16>
    %cst_26 = arith.constant dense<0.000000e+00> : vector<8x512xf32>
    %103 = tpu.matmul %102, %3, %cst_26 {dimension_numbers = #tpu.dot_dimension_numbers<[1], [0], [0], [1], [0, 0, 1, 1], [], []>} : vector<8x128xbf16>, vector<128x512xbf16>, vector<8x512xf32> -> vector<8x512xf32>
    %104 = arith.addf %101, %103 : vector<8x512xf32>
    %105 = vector.extract_strided_slice %104 {offsets = [0, 0], sizes = [8, 128], strides = [1, 1]} : vector<8x512xf32> to vector<8x128xf32>
    %106 = arith.negf %105 : vector<8x128xf32>
    %107 = math.exp %106 : vector<8x128xf32>
    %cst_27 = arith.constant 1.000000e+00 : f32
    %108 = vector.broadcast %cst_27 : f32 to vector<8x128xf32>
    %109 = arith.addf %108, %107 : vector<8x128xf32>
    %110 = arith.divf %108, %109 : vector<8x128xf32>
    %111 = vector.extract_strided_slice %104 {offsets = [0, 128], sizes = [8, 128], strides = [1, 1]} : vector<8x512xf32> to vector<8x128xf32>
    %112 = arith.negf %111 : vector<8x128xf32>
    %113 = math.exp %112 : vector<8x128xf32>
    %cst_28 = arith.constant 1.000000e+00 : f32
    %114 = vector.broadcast %cst_28 : f32 to vector<8x128xf32>
    %115 = arith.addf %114, %113 : vector<8x128xf32>
    %116 = arith.divf %114, %115 : vector<8x128xf32>
    %117 = vector.extract_strided_slice %104 {offsets = [0, 256], sizes = [8, 128], strides = [1, 1]} : vector<8x512xf32> to vector<8x128xf32>
    %118 = math.tanh %117 : vector<8x128xf32>
    %119 = vector.extract_strided_slice %104 {offsets = [0, 384], sizes = [8, 128], strides = [1, 1]} : vector<8x512xf32> to vector<8x128xf32>
    %120 = arith.negf %119 : vector<8x128xf32>
    %121 = math.exp %120 : vector<8x128xf32>
    %cst_29 = arith.constant 1.000000e+00 : f32
    %122 = vector.broadcast %cst_29 : f32 to vector<8x128xf32>
    %123 = arith.addf %122, %121 : vector<8x128xf32>
    %124 = arith.divf %122, %123 : vector<8x128xf32>
    %125 = arith.mulf %116, %96 : vector<8x128xf32>
    %126 = arith.mulf %110, %118 : vector<8x128xf32>
    %127 = arith.addf %125, %126 : vector<8x128xf32>
    %128 = math.tanh %127 : vector<8x128xf32>
    %129 = arith.mulf %124, %128 : vector<8x128xf32>
    %c4_i32 = arith.constant 4 : i32
    %130 = arith.index_cast %c4_i32 : i32 to index
    %c0_30 = arith.constant 0 : index
    %c0_31 = arith.constant 0 : index
    %131 = vector.load %arg1[%130, %c0_30, %c0_31] : memref<8x8x512xf32, #tpu.memory_space<vmem>>, vector<1x8x512xf32>
    %132 = vector.shape_cast %131 : vector<1x8x512xf32> to vector<8x512xf32>
    %133 = arith.truncf %129 : vector<8x128xf32> to vector<8x128xbf16>
    %cst_32 = arith.constant dense<0.000000e+00> : vector<8x512xf32>
    %134 = tpu.matmul %133, %3, %cst_32 {dimension_numbers = #tpu.dot_dimension_numbers<[1], [0], [0], [1], [0, 0, 1, 1], [], []>} : vector<8x128xbf16>, vector<128x512xbf16>, vector<8x512xf32> -> vector<8x512xf32>
    %135 = arith.addf %132, %134 : vector<8x512xf32>
    %136 = vector.extract_strided_slice %135 {offsets = [0, 0], sizes = [8, 128], strides = [1, 1]} : vector<8x512xf32> to vector<8x128xf32>
    %137 = arith.negf %136 : vector<8x128xf32>
    %138 = math.exp %137 : vector<8x128xf32>
    %cst_33 = arith.constant 1.000000e+00 : f32
    %139 = vector.broadcast %cst_33 : f32 to vector<8x128xf32>
    %140 = arith.addf %139, %138 : vector<8x128xf32>
    %141 = arith.divf %139, %140 : vector<8x128xf32>
    %142 = vector.extract_strided_slice %135 {offsets = [0, 128], sizes = [8, 128], strides = [1, 1]} : vector<8x512xf32> to vector<8x128xf32>
    %143 = arith.negf %142 : vector<8x128xf32>
    %144 = math.exp %143 : vector<8x128xf32>
    %cst_34 = arith.constant 1.000000e+00 : f32
    %145 = vector.broadcast %cst_34 : f32 to vector<8x128xf32>
    %146 = arith.addf %145, %144 : vector<8x128xf32>
    %147 = arith.divf %145, %146 : vector<8x128xf32>
    %148 = vector.extract_strided_slice %135 {offsets = [0, 256], sizes = [8, 128], strides = [1, 1]} : vector<8x512xf32> to vector<8x128xf32>
    %149 = math.tanh %148 : vector<8x128xf32>
    %150 = vector.extract_strided_slice %135 {offsets = [0, 384], sizes = [8, 128], strides = [1, 1]} : vector<8x512xf32> to vector<8x128xf32>
    %151 = arith.negf %150 : vector<8x128xf32>
    %152 = math.exp %151 : vector<8x128xf32>
    %cst_35 = arith.constant 1.000000e+00 : f32
    %153 = vector.broadcast %cst_35 : f32 to vector<8x128xf32>
    %154 = arith.addf %153, %152 : vector<8x128xf32>
    %155 = arith.divf %153, %154 : vector<8x128xf32>
    %156 = arith.mulf %147, %127 : vector<8x128xf32>
    %157 = arith.mulf %141, %149 : vector<8x128xf32>
    %158 = arith.addf %156, %157 : vector<8x128xf32>
    %159 = math.tanh %158 : vector<8x128xf32>
    %160 = arith.mulf %155, %159 : vector<8x128xf32>
    %c5_i32 = arith.constant 5 : i32
    %161 = arith.index_cast %c5_i32 : i32 to index
    %c0_36 = arith.constant 0 : index
    %c0_37 = arith.constant 0 : index
    %162 = vector.load %arg1[%161, %c0_36, %c0_37] : memref<8x8x512xf32, #tpu.memory_space<vmem>>, vector<1x8x512xf32>
    %163 = vector.shape_cast %162 : vector<1x8x512xf32> to vector<8x512xf32>
    %164 = arith.truncf %160 : vector<8x128xf32> to vector<8x128xbf16>
    %cst_38 = arith.constant dense<0.000000e+00> : vector<8x512xf32>
    %165 = tpu.matmul %164, %3, %cst_38 {dimension_numbers = #tpu.dot_dimension_numbers<[1], [0], [0], [1], [0, 0, 1, 1], [], []>} : vector<8x128xbf16>, vector<128x512xbf16>, vector<8x512xf32> -> vector<8x512xf32>
    %166 = arith.addf %163, %165 : vector<8x512xf32>
    %167 = vector.extract_strided_slice %166 {offsets = [0, 0], sizes = [8, 128], strides = [1, 1]} : vector<8x512xf32> to vector<8x128xf32>
    %168 = arith.negf %167 : vector<8x128xf32>
    %169 = math.exp %168 : vector<8x128xf32>
    %cst_39 = arith.constant 1.000000e+00 : f32
    %170 = vector.broadcast %cst_39 : f32 to vector<8x128xf32>
    %171 = arith.addf %170, %169 : vector<8x128xf32>
    %172 = arith.divf %170, %171 : vector<8x128xf32>
    %173 = vector.extract_strided_slice %166 {offsets = [0, 128], sizes = [8, 128], strides = [1, 1]} : vector<8x512xf32> to vector<8x128xf32>
    %174 = arith.negf %173 : vector<8x128xf32>
    %175 = math.exp %174 : vector<8x128xf32>
    %cst_40 = arith.constant 1.000000e+00 : f32
    %176 = vector.broadcast %cst_40 : f32 to vector<8x128xf32>
    %177 = arith.addf %176, %175 : vector<8x128xf32>
    %178 = arith.divf %176, %177 : vector<8x128xf32>
    %179 = vector.extract_strided_slice %166 {offsets = [0, 256], sizes = [8, 128], strides = [1, 1]} : vector<8x512xf32> to vector<8x128xf32>
    %180 = math.tanh %179 : vector<8x128xf32>
    %181 = vector.extract_strided_slice %166 {offsets = [0, 384], sizes = [8, 128], strides = [1, 1]} : vector<8x512xf32> to vector<8x128xf32>
    %182 = arith.negf %181 : vector<8x128xf32>
    %183 = math.exp %182 : vector<8x128xf32>
    %cst_41 = arith.constant 1.000000e+00 : f32
    %184 = vector.broadcast %cst_41 : f32 to vector<8x128xf32>
    %185 = arith.addf %184, %183 : vector<8x128xf32>
    %186 = arith.divf %184, %185 : vector<8x128xf32>
    %187 = arith.mulf %178, %158 : vector<8x128xf32>
    %188 = arith.mulf %172, %180 : vector<8x128xf32>
    %189 = arith.addf %187, %188 : vector<8x128xf32>
    %190 = math.tanh %189 : vector<8x128xf32>
    %191 = arith.mulf %186, %190 : vector<8x128xf32>
    %c6_i32 = arith.constant 6 : i32
    %192 = arith.index_cast %c6_i32 : i32 to index
    %c0_42 = arith.constant 0 : index
    %c0_43 = arith.constant 0 : index
    %193 = vector.load %arg1[%192, %c0_42, %c0_43] : memref<8x8x512xf32, #tpu.memory_space<vmem>>, vector<1x8x512xf32>
    %194 = vector.shape_cast %193 : vector<1x8x512xf32> to vector<8x512xf32>
    %195 = arith.truncf %191 : vector<8x128xf32> to vector<8x128xbf16>
    %cst_44 = arith.constant dense<0.000000e+00> : vector<8x512xf32>
    %196 = tpu.matmul %195, %3, %cst_44 {dimension_numbers = #tpu.dot_dimension_numbers<[1], [0], [0], [1], [0, 0, 1, 1], [], []>} : vector<8x128xbf16>, vector<128x512xbf16>, vector<8x512xf32> -> vector<8x512xf32>
    %197 = arith.addf %194, %196 : vector<8x512xf32>
    %198 = vector.extract_strided_slice %197 {offsets = [0, 0], sizes = [8, 128], strides = [1, 1]} : vector<8x512xf32> to vector<8x128xf32>
    %199 = arith.negf %198 : vector<8x128xf32>
    %200 = math.exp %199 : vector<8x128xf32>
    %cst_45 = arith.constant 1.000000e+00 : f32
    %201 = vector.broadcast %cst_45 : f32 to vector<8x128xf32>
    %202 = arith.addf %201, %200 : vector<8x128xf32>
    %203 = arith.divf %201, %202 : vector<8x128xf32>
    %204 = vector.extract_strided_slice %197 {offsets = [0, 128], sizes = [8, 128], strides = [1, 1]} : vector<8x512xf32> to vector<8x128xf32>
    %205 = arith.negf %204 : vector<8x128xf32>
    %206 = math.exp %205 : vector<8x128xf32>
    %cst_46 = arith.constant 1.000000e+00 : f32
    %207 = vector.broadcast %cst_46 : f32 to vector<8x128xf32>
    %208 = arith.addf %207, %206 : vector<8x128xf32>
    %209 = arith.divf %207, %208 : vector<8x128xf32>
    %210 = vector.extract_strided_slice %197 {offsets = [0, 256], sizes = [8, 128], strides = [1, 1]} : vector<8x512xf32> to vector<8x128xf32>
    %211 = math.tanh %210 : vector<8x128xf32>
    %212 = vector.extract_strided_slice %197 {offsets = [0, 384], sizes = [8, 128], strides = [1, 1]} : vector<8x512xf32> to vector<8x128xf32>
    %213 = arith.negf %212 : vector<8x128xf32>
    %214 = math.exp %213 : vector<8x128xf32>
    %cst_47 = arith.constant 1.000000e+00 : f32
    %215 = vector.broadcast %cst_47 : f32 to vector<8x128xf32>
    %216 = arith.addf %215, %214 : vector<8x128xf32>
    %217 = arith.divf %215, %216 : vector<8x128xf32>
    %218 = arith.mulf %209, %189 : vector<8x128xf32>
    %219 = arith.mulf %203, %211 : vector<8x128xf32>
    %220 = arith.addf %218, %219 : vector<8x128xf32>
    %221 = math.tanh %220 : vector<8x128xf32>
    %222 = arith.mulf %217, %221 : vector<8x128xf32>
    %c7_i32 = arith.constant 7 : i32
    %223 = arith.index_cast %c7_i32 : i32 to index
    %c0_48 = arith.constant 0 : index
    %c0_49 = arith.constant 0 : index
    %224 = vector.load %arg1[%223, %c0_48, %c0_49] : memref<8x8x512xf32, #tpu.memory_space<vmem>>, vector<1x8x512xf32>
    %225 = vector.shape_cast %224 : vector<1x8x512xf32> to vector<8x512xf32>
    %226 = arith.truncf %222 : vector<8x128xf32> to vector<8x128xbf16>
    %cst_50 = arith.constant dense<0.000000e+00> : vector<8x512xf32>
    %227 = tpu.matmul %226, %3, %cst_50 {dimension_numbers = #tpu.dot_dimension_numbers<[1], [0], [0], [1], [0, 0, 1, 1], [], []>} : vector<8x128xbf16>, vector<128x512xbf16>, vector<8x512xf32> -> vector<8x512xf32>
    %228 = arith.addf %225, %227 : vector<8x512xf32>
    %229 = vector.extract_strided_slice %228 {offsets = [0, 0], sizes = [8, 128], strides = [1, 1]} : vector<8x512xf32> to vector<8x128xf32>
    %230 = arith.negf %229 : vector<8x128xf32>
    %231 = math.exp %230 : vector<8x128xf32>
    %cst_51 = arith.constant 1.000000e+00 : f32
    %232 = vector.broadcast %cst_51 : f32 to vector<8x128xf32>
    %233 = arith.addf %232, %231 : vector<8x128xf32>
    %234 = arith.divf %232, %233 : vector<8x128xf32>
    %235 = vector.extract_strided_slice %228 {offsets = [0, 128], sizes = [8, 128], strides = [1, 1]} : vector<8x512xf32> to vector<8x128xf32>
    %236 = arith.negf %235 : vector<8x128xf32>
    %237 = math.exp %236 : vector<8x128xf32>
    %cst_52 = arith.constant 1.000000e+00 : f32
    %238 = vector.broadcast %cst_52 : f32 to vector<8x128xf32>
    %239 = arith.addf %238, %237 : vector<8x128xf32>
    %240 = arith.divf %238, %239 : vector<8x128xf32>
    %241 = vector.extract_strided_slice %228 {offsets = [0, 256], sizes = [8, 128], strides = [1, 1]} : vector<8x512xf32> to vector<8x128xf32>
    %242 = math.tanh %241 : vector<8x128xf32>
    %243 = vector.extract_strided_slice %228 {offsets = [0, 384], sizes = [8, 128], strides = [1, 1]} : vector<8x512xf32> to vector<8x128xf32>
    %244 = arith.negf %243 : vector<8x128xf32>
    %245 = math.exp %244 : vector<8x128xf32>
    %cst_53 = arith.constant 1.000000e+00 : f32
    %246 = vector.broadcast %cst_53 : f32 to vector<8x128xf32>
    %247 = arith.addf %246, %245 : vector<8x128xf32>
    %248 = arith.divf %246, %247 : vector<8x128xf32>
    %249 = arith.mulf %240, %220 : vector<8x128xf32>
    %250 = arith.mulf %234, %242 : vector<8x128xf32>
    %251 = arith.addf %249, %250 : vector<8x128xf32>
    %252 = math.tanh %251 : vector<8x128xf32>
    %253 = arith.mulf %248, %252 : vector<8x128xf32>
    %c8_i32 = arith.constant 8 : i32
    %c0_54 = arith.constant 0 : index
    %c0_55 = arith.constant 0 : index
    %254 = vector.load %arg7[%c0_54, %c0_55] : memref<8x128xf32, #tpu.memory_space<vmem>>, vector<8x128xf32>
    tpu.vector_store %arg7[%c0_54, %c0_55], %253 {strides = array<i32>} : memref<8x128xf32, #tpu.memory_space<vmem>>, vector<8x128xf32>,
    %c0_56 = arith.constant 0 : index
    %c0_57 = arith.constant 0 : index
    %255 = vector.load %arg8[%c0_56, %c0_57] : memref<8x128xf32, #tpu.memory_space<vmem>>, vector<8x128xf32>
    tpu.vector_store %arg8[%c0_56, %c0_57], %251 {strides = array<i32>} : memref<8x128xf32, #tpu.memory_space<vmem>>, vector<8x128xf32>,
    %c0_i32_58 = arith.constant 0 : i32
    %256 = arith.cmpi eq, %arg0, %c0_i32_58 : i32
    %257 = arith.extui %256 : i1 to i32
    %c0_i32_59 = arith.constant 0 : i32
    %258 = arith.cmpi ne, %257, %c0_i32_59 : i32
    scf.if %258 {
      %cst_60 = arith.constant 0.000000e+00 : f32
      %259 = vector.broadcast %cst_60 : f32 to vector<8x128xf32>
      %260 = arith.maximumf %253, %259 : vector<8x128xf32>
      %c0_61 = arith.constant 0 : index
      %c0_62 = arith.constant 0 : index
      %261 = vector.load %arg3[%c0_61, %c0_62] : memref<128x128xf32, #tpu.memory_space<vmem>>, vector<128x128xf32>
      %cst_63 = arith.constant dense<0.000000e+00> : vector<8x128xf32>
      %262 = tpu.matmul %260, %261, %cst_63 {dimension_numbers = #tpu.dot_dimension_numbers<[1], [0], [0], [1], [0, 0, 1, 1], [], []>} : vector<8x128xf32>, vector<128x128xf32>, vector<8x128xf32> -> vector<8x128xf32>
      %c0_64 = arith.constant 0 : index
      %c0_65 = arith.constant 0 : index
      %263 = vector.load %arg4[%c0_64, %c0_65] : memref<1x128xf32, #tpu.memory_space<vmem>>, vector<1x128xf32>
      %264 = vector.broadcast %263 : vector<1x128xf32> to vector<8x128xf32>
      %265 = arith.addf %262, %264 : vector<8x128xf32>
      %c0_66 = arith.constant 0 : index
      %c0_67 = arith.constant 0 : index
      %266 = vector.load %arg5[%c0_66, %c0_67] : memref<8x128xf32, #tpu.memory_space<vmem>>, vector<8x128xf32>
      tpu.vector_store %arg5[%c0_66, %c0_67], %265 {strides = array<i32>} : memref<8x128xf32, #tpu.memory_space<vmem>>, vector<8x128xf32>,
    } else {
    }
    return
  }
  func.func @transform_0(%arg0: i32) -> (i32, i32, i32) {
    %c0_i32 = arith.constant 0 : i32
    %c0_i32_0 = arith.constant 0 : i32
    %c0_i32_1 = arith.constant 0 : i32
    return %arg0, %c0_i32, %c0_i32_0 : i32, i32, i32
  }
  func.func @transform_2(%arg0: i32) -> (i32, i32) {
    %c0_i32 = arith.constant 0 : i32
    %c0_i32_0 = arith.constant 0 : i32
    %c0_i32_1 = arith.constant 0 : i32
    return %c0_i32, %c0_i32_0 : i32, i32
  }
  func.func @transform_3(%arg0: i32) -> (i32, i32) {
    %c0_i32 = arith.constant 0 : i32
    %c0_i32_0 = arith.constant 0 : i32
    %c0_i32_1 = arith.constant 0 : i32
    return %c0_i32, %c0_i32_0 : i32, i32
  }
  func.func @transform_4(%arg0: i32) -> (i32, i32) {
    %c0_i32 = arith.constant 0 : i32
    %c0_i32_0 = arith.constant 0 : i32
    %c0_i32_1 = arith.constant 0 : i32
    return %c0_i32, %c0_i32_0 : i32, i32
  }
}

</mosaic_0001>

<bundles_post_ra>
// kernel: lstm_model_forward.2
= control target key start
LH: loop header
LB: loop body
LE: loop exit
PB: predicated region body
PF: predicated region fallthrough
CT: control target
= control target key end

     0   :  { %s2254_s0 = inlined_call_operand.vmem [shape: f32[8,8,512], index: 0, kind: input, shape index: {}]   ;;  %s2255_s1 = inlined_call_operand.vmem [shape: bf16[128,512], index: 1, kind: input, shape index: {}]   ;;  %s2256_s2 = inlined_call_operand.vmem [shape: f32[8,8,128], index: 2, kind: output, shape index: {}]  }
   0x1   :  { %v23_v0 = vld [vmem:[%s2255_s1] sm:$0xff]  ;;  %v25_v1 = vld [vmem:[%s2255_s1 + $0x8] sm:$0xff]  ;;  %v27_v2 = vld [vmem:[%s2255_s1 + $0x10] sm:$0xff] }
   0x2   :  { %24 = vst [vmem:[#allocation2] sm:$0xff] %v23_v0  ;;  %v29_v3 = vld [vmem:[%s2255_s1 + $0x18] sm:$0xff]  ;;  %v31_v4 = vld [vmem:[%s2255_s1 + $0x20] sm:$0xff]  ;;  %v33_v5 = vld [vmem:[%s2255_s1 + $0x28] sm:$0xff] }
   0x3   :  { %26 = vst [vmem:[#allocation2 + $0x8] sm:$0xff] %v25_v1  ;;  %v35_v6 = vld [vmem:[%s2255_s1 + $0x30] sm:$0xff]  ;;  %v37_v7 = vld [vmem:[%s2255_s1 + $0x38] sm:$0xff]  ;;  %v39_v8 = vld [vmem:[%s2255_s1 + $0x40] sm:$0xff] }
   0x4   :  { %28 = vst [vmem:[#allocation2 + $0x10] sm:$0xff] %v27_v2  ;;  %v41_v9 = vld [vmem:[%s2255_s1 + $0x48] sm:$0xff]  ;;  %v43_v10 = vld [vmem:[%s2255_s1 + $0x50] sm:$0xff]  ;;  %v45_v11 = vld [vmem:[%s2255_s1 + $0x58] sm:$0xff] }
   0x5   :  { %30 = vst [vmem:[#allocation2 + $0x18] sm:$0xff] %v29_v3  ;;  %v47_v12 = vld [vmem:[%s2255_s1 + $0x60] sm:$0xff]  ;;  %v49_v13 = vld [vmem:[%s2255_s1 + $0x68] sm:$0xff]  ;;  %v51_v14 = vld [vmem:[%s2255_s1 + $0x70] sm:$0xff] }
   0x6   :  { %32 = vst [vmem:[#allocation2 + $0x20] sm:$0xff] %v31_v4  ;;  %v53_v15 = vld [vmem:[%s2255_s1 + $0x78] sm:$0xff]  ;;  %v55_v16 = vld [vmem:[%s2255_s1 + $0x80] sm:$0xff]  ;;  %v57_v17 = vld [vmem:[%s2255_s1 + $0x88] sm:$0xff] }
   0x7   :  { %34 = vst [vmem:[#allocation2 + $0x28] sm:$0xff] %v33_v5  ;;  %v59_v18 = vld [vmem:[%s2255_s1 + $0x90] sm:$0xff]  ;;  %v61_v19 = vld [vmem:[%s2255_s1 + $0x98] sm:$0xff]  ;;  %v63_v20 = vld [vmem:[%s2255_s1 + $0xa0] sm:$0xff] }
   0x8   :  { %36 = vst [vmem:[#allocation2 + $0x30] sm:$0xff] %v35_v6  ;;  %v65_v21 = vld [vmem:[%s2255_s1 + $0xa8] sm:$0xff]  ;;  %v67_v22 = vld [vmem:[%s2255_s1 + $0xb0] sm:$0xff]  ;;  %v69_v23 = vld [vmem:[%s2255_s1 + $0xb8] sm:$0xff] }
   0x9   :  { %38 = vst [vmem:[#allocation2 + $0x38] sm:$0xff] %v37_v7  ;;  %v71_v24 = vld [vmem:[%s2255_s1 + $0xc0] sm:$0xff]  ;;  %v73_v25 = vld [vmem:[%s2255_s1 + $0xc8] sm:$0xff]  ;;  %v75_v26 = vld [vmem:[%s2255_s1 + $0xd0] sm:$0xff] }
   0xa   :  { %40 = vst [vmem:[#allocation2 + $0x40] sm:$0xff] %v39_v8  ;;  %v77_v27 = vld [vmem:[%s2255_s1 + $0xd8] sm:$0xff]  ;;  %v79_v28 = vld [vmem:[%s2255_s1 + $0xe0] sm:$0xff]  ;;  %v81_v29 = vld [vmem:[%s2255_s1 + $0xe8] sm:$0xff] }
   0xb   :  { %42 = vst [vmem:[#allocation2 + $0x48] sm:$0xff] %v41_v9  ;;  %v83_v30 = vld [vmem:[%s2255_s1 + $0xf0] sm:$0xff]  ;;  %v85_v31 = vld [vmem:[%s2255_s1 + $0xf8] sm:$0xff] }
   0xc   :  { %44 = vst [vmem:[#allocation2 + $0x50] sm:$0xff] %v43_v10 }
   0xd   :  { %46 = vst [vmem:[#allocation2 + $0x58] sm:$0xff] %v45_v11 }
   0xe   :  { %48 = vst [vmem:[#allocation2 + $0x60] sm:$0xff] %v47_v12 }
   0xf   :  { %50 = vst [vmem:[#allocation2 + $0x68] sm:$0xff] %v49_v13 }
  0x10   :  { %52 = vst [vmem:[#allocation2 + $0x70] sm:$0xff] %v51_v14 }
  0x11   :  { %54 = vst [vmem:[#allocation2 + $0x78] sm:$0xff] %v53_v15 }
  0x12   :  { %56 = vst [vmem:[#allocation2 + $0x80] sm:$0xff] %v55_v16 }
  0x13   :  { %58 = vst [vmem:[#allocation2 + $0x88] sm:$0xff] %v57_v17 }
  0x14   :  { %60 = vst [vmem:[#allocation2 + $0x90] sm:$0xff] %v59_v18 }
  0x15   :  { %62 = vst [vmem:[#allocation2 + $0x98] sm:$0xff] %v61_v19 }
  0x16   :  { %64 = vst [vmem:[#allocation2 + $0xa0] sm:$0xff] %v63_v20 }
  0x17   :  { %66 = vst [vmem:[#allocation2 + $0xa8] sm:$0xff] %v65_v21 }
  0x18   :  { %68 = vst [vmem:[#allocation2 + $0xb0] sm:$0xff] %v67_v22 }
  0x19   :  { %70 = vst [vmem:[#allocation2 + $0xb8] sm:$0xff] %v69_v23 }
  0x1a   :  { %72 = vst [vmem:[#allocation2 + $0xc0] sm:$0xff] %v71_v24 }
  0x1b   :  { %74 = vst [vmem:[#allocation2 + $0xc8] sm:$0xff] %v73_v25 }
  0x1c   :  { %76 = vst [vmem:[#allocation2 + $0xd0] sm:$0xff] %v75_v26 }
  0x1d   :  { %78 = vst [vmem:[#allocation2 + $0xd8] sm:$0xff] %v77_v27 }
  0x1e   :  { %80 = vst [vmem:[#allocation2 + $0xe0] sm:$0xff] %v79_v28 }
  0x1f   :  { %82 = vst [vmem:[#allocation2 + $0xe8] sm:$0xff] %v81_v29 }
  0x20   :  { %84 = vst [vmem:[#allocation2 + $0xf0] sm:$0xff] %v83_v30 }
  0x21   :  { %86 = vst [vmem:[#allocation2 + $0xf8] sm:$0xff] %v85_v31 }
  0x22   :  { %92 = vsyncadd [#allocation5], 4096 }
  0x23   :  { %1672 = dma.done.wait [#allocation5], 4096 }
  0x24   :  { %1673 = vsyncadd [#allocation5], 4294963200  ;;  %v1421_v41 = vld [vmem:[#allocation2 + $0xc0] sm:$0xf]  ;;  %v1537_v42 = vld [vmem:[#allocation2 + $0xcc] sm:$0xf0] }
  0x25   :  { %v1437_v32 = vld [vmem:[#allocation2 + $0xe0] sm:$0xf]  ;;  %v1539_v34 = vld [vmem:[#allocation2 + $0xe4] sm:$0xf]  ;;  %v1793_v44 = vor.u32 %v1537_v42, %v1421_v41  ;;  %v1423_v45 = vld [vmem:[#allocation2 + $0xd0] sm:$0xf0] }
  0x26   :  { %v1540_v37 = vld [vmem:[#allocation2 + $0xec] sm:$0xf]  ;;  %v1535_v43 = vld [vmem:[#allocation2 + $0xc4] sm:$0xf]  ;;  %v1431_v47 = vld [vmem:[#allocation2 + $0xd8] sm:$0xf0] }
  0x27   :  { %v1541_v33 = vld [vmem:[#allocation2 + $0xec] sm:$0xf0]  ;;  %v1439_v36 = vld [vmem:[#allocation2 + $0xf0] sm:$0xf0]  ;;  %v1536_v46 = vld [vmem:[#allocation2 + $0xcc] sm:$0xf]  ;;  %v1797_v48 = vor.u32 %v1535_v43, %v1423_v45 }
  0x28   :  { %v1786_v35 = vor.u32 %v1541_v33, %v1437_v32  ;;  %v1447_v38 = vld [vmem:[#allocation2 + $0xf8] sm:$0xf0]  ;;  %v1788_v39 = vor.u32 %v1539_v34, %v1439_v36  ;;  %v1799_v49 = vor.u32 %v1536_v46, %v1431_v47  ;;  %v1445_v50 = vld [vmem:[#allocation2 + $0xe8] sm:$0xf]  ;;  %v1542_v51 = vld [vmem:[#allocation2 + $0xf4] sm:$0xf0] }
  0x29   :  { %v1790_v40 = vor.u32 %v1540_v37, %v1447_v38  ;;  %v1405_v52 = vld [vmem:[#allocation2 + $0xa0] sm:$0xf]  ;;  %v1801_v53 = vor.u32 %v1542_v51, %v1445_v50  ;;  %v1533_v54 = vld [vmem:[#allocation2 + $0xac] sm:$0xf0]  ;;  %v1531_v55 = vld [vmem:[#allocation2 + $0xa4] sm:$0xf] }
  0x2a   :  { %298 = vmatpush.bf16.msra.mxu0 %v1786_v35  ;;  %311 = vmatpush.bf16.msra.mxu1 %v1788_v39  ;;  %v1407_v56 = vld [vmem:[#allocation2 + $0xb0] sm:$0xf0]  ;;  %v1532_v57 = vld [vmem:[#allocation2 + $0xac] sm:$0xf]  ;;  %v1415_v58 = vld [vmem:[#allocation2 + $0xb8] sm:$0xf0]  ;;  %v1805_v60 = vor.u32 %v1533_v54, %v1405_v52 }
  0x2b   :  { %337 = vmatpush.bf16.msra.mxu3 %v1790_v40  ;;  %v1429_v59 = vld [vmem:[#allocation2 + $0xc8] sm:$0xf]  ;;  %324 = vmatpush.bf16.msra.mxu2 %v1801_v53  ;;  %v1538_v61 = vld [vmem:[#allocation2 + $0xd4] sm:$0xf0]  ;;  %v1389_v62 = vld [vmem:[#allocation2 + $0x80] sm:$0xf]  ;;  %v1809_v0 = vor.u32 %v1531_v55, %v1407_v56  ;;  %v1811_v1 = vor.u32 %v1532_v57, %v1415_v58 }
  0x2c   :  { %v1529_v63 = vld [vmem:[#allocation2 + $0x8c] sm:$0xf0]  ;;  %v1813_v2 = vor.u32 %v1538_v61, %v1429_v59  ;;  %v1527_v3 = vld [vmem:[#allocation2 + $0x84] sm:$0xf]  ;;  %v1391_v4 = vld [vmem:[#allocation2 + $0x90] sm:$0xf0] }
  0x2d   :  { %v1528_v5 = vld [vmem:[#allocation2 + $0x8c] sm:$0xf]  ;;  %v1399_v6 = vld [vmem:[#allocation2 + $0x98] sm:$0xf0]  ;;  %v1413_v7 = vld [vmem:[#allocation2 + $0xa8] sm:$0xf]  ;;  %v1817_v9 = vor.u32 %v1529_v63, %v1389_v62  ;;  %v1823_v13 = vor.u32 %v1527_v3, %v1391_v4 }
  0x2e   :  { %299 = vmatpush.bf16.msra.mxu0 %v1793_v44  ;;  %312 = vmatpush.bf16.msra.mxu1 %v1797_v48  ;;  %v1534_v8 = vld [vmem:[#allocation2 + $0xb4] sm:$0xf0]  ;;  %v1373_v11 = vld [vmem:[#allocation2 + $0x60] sm:$0xf]  ;;  %v1525_v12 = vld [vmem:[#allocation2 + $0x6c] sm:$0xf0]  ;;  %v1825_v14 = vor.u32 %v1528_v5, %v1399_v6 }
  0x2f   :  { %338 = vmatpush.bf16.msra.mxu3 %v1799_v49  ;;  %325 = vmatpush.bf16.msra.mxu2 %v1813_v2  ;;  %v1819_v10 = vor.u32 %v1534_v8, %v1413_v7  ;;  %v1523_v15 = vld [vmem:[#allocation2 + $0x64] sm:$0xf]  ;;  %v1397_v16 = vld [vmem:[#allocation2 + $0x88] sm:$0xf]  ;;  %v1530_v17 = vld [vmem:[#allocation2 + $0x94] sm:$0xf0]  ;;  %v1829_v21 = vor.u32 %v1525_v12, %v1373_v11 }
  0x30   :  { %v1375_v18 = vld [vmem:[#allocation2 + $0x70] sm:$0xf0]  ;;  %v1524_v19 = vld [vmem:[#allocation2 + $0x6c] sm:$0xf]  ;;  %v1383_v20 = vld [vmem:[#allocation2 + $0x78] sm:$0xf0]  ;;  %v1831_v22 = vor.u32 %v1530_v17, %v1397_v16 }
  0x31   :  { %v1357_v23 = vld [vmem:[#allocation2 + $0x40] sm:$0xf]  ;;  %v1521_v24 = vld [vmem:[#allocation2 + $0x4c] sm:$0xf0]  ;;  %v1835_v25 = vor.u32 %v1523_v15, %v1375_v18  ;;  %v1837_v26 = vor.u32 %v1524_v19, %v1383_v20  ;;  %v1519_v27 = vld [vmem:[#allocation2 + $0x44] sm:$0xf] }
  0x32   :  { %300 = vmatpush.bf16.msra.mxu0 %v1805_v60  ;;  %313 = vmatpush.bf16.msra.mxu1 %v1809_v0  ;;  %v1381_v28 = vld [vmem:[#allocation2 + $0x68] sm:$0xf]  ;;  %v1526_v29 = vld [vmem:[#allocation2 + $0x74] sm:$0xf0]  ;;  %v1359_v30 = vld [vmem:[#allocation2 + $0x50] sm:$0xf0]  ;;  %v1841_v33 = vor.u32 %v1521_v24, %v1357_v23 }
  0x33   :  { %339 = vmatpush.bf16.msra.mxu3 %v1811_v1  ;;  %326 = vmatpush.bf16.msra.mxu2 %v1819_v10  ;;  %v1520_v31 = vld [vmem:[#allocation2 + $0x4c] sm:$0xf]  ;;  %v1367_v32 = vld [vmem:[#allocation2 + $0x58] sm:$0xf0]  ;;  %v1843_v34 = vor.u32 %v1526_v29, %v1381_v28  ;;  %v1341_v36 = vld [vmem:[#allocation2 + $0x20] sm:$0xf]  ;;  %v1847_v38 = vor.u32 %v1519_v27, %v1359_v30 }
  0x34   :  { %v1517_v37 = vld [vmem:[#allocation2 + $0x2c] sm:$0xf0]  ;;  %v1849_v41 = vor.u32 %v1520_v31, %v1367_v32  ;;  %v1515_v42 = vld [vmem:[#allocation2 + $0x24] sm:$0xf]  ;;  %v1365_v43 = vld [vmem:[#allocation2 + $0x48] sm:$0xf] }
  0x35   :  { %v1522_v45 = vld [vmem:[#allocation2 + $0x54] sm:$0xf0]  ;;  %v1343_v46 = vld [vmem:[#allocation2 + $0x30] sm:$0xf0]  ;;  %v1516_v47 = vld [vmem:[#allocation2 + $0x2c] sm:$0xf]  ;;  %v1853_v51 = vor.u32 %v1517_v37, %v1341_v36 }
  0x36   :  { %301 = vmatpush.bf16.msra.mxu0 %v1817_v9  ;;  %314 = vmatpush.bf16.msra.mxu1 %v1823_v13  ;;  %v1351_v50 = vld [vmem:[#allocation2 + $0x38] sm:$0xf0]  ;;  %v1855_v52 = vor.u32 %v1522_v45, %v1365_v43  ;;  %v1325_v54 = vld [vmem:[#allocation2] sm:$0xf]  ;;  %v1513_v55 = vld [vmem:[#allocation2 + $0xc] sm:$0xf0]  ;;  %v1859_v56 = vor.u32 %v1515_v42, %v1343_v46 }
  0x37   :  { %340 = vmatpush.bf16.msra.mxu3 %v1825_v14  ;;  %327 = vmatpush.bf16.msra.mxu2 %v1831_v22  ;;  %v1861_v57 = vor.u32 %v1516_v47, %v1351_v50  ;;  %v1511_v58 = vld [vmem:[#allocation2 + $0x4] sm:$0xf]  ;;  %v1349_v59 = vld [vmem:[#allocation2 + $0x28] sm:$0xf]  ;;  %v1518_v61 = vld [vmem:[#allocation2 + $0x34] sm:$0xf0]  ;;  %v1865_v4 = vor.u32 %v1513_v55, %v1325_v54 }
  0x38   :  { %v1327_v62 = vld [vmem:[#allocation2 + $0x10] sm:$0xf0]  ;;  %v1512_v63 = vld [vmem:[#allocation2 + $0xc] sm:$0xf]  ;;  %v1335_v3 = vld [vmem:[#allocation2 + $0x18] sm:$0xf0]  ;;  %v1867_v5 = vor.u32 %v1518_v61, %v1349_v59 }
  0x39   :  { %v1871_v6 = vor.u32 %v1511_v58, %v1327_v62  ;;  %v1873_v7 = vor.u32 %v1512_v63, %v1335_v3  ;;  %v1333_v8 = vld [vmem:[#allocation2 + $0x8] sm:$0xf]  ;;  %v1514_v11 = vld [vmem:[#allocation2 + $0x14] sm:$0xf0]  ;;  %v1674_v15 = vmov 0.0|0.0   ;;  %v133_v16 = vld [vmem:[%s2254_s0] sm:$0xff] }
  0x3a   :  { %302 = vmatpush.bf16.msra.mxu0 %v1829_v21  ;;  %315 = vmatpush.bf16.msra.mxu1 %v1835_v25  ;;  %v1879_v12 = vor.u32 %v1514_v11, %v1333_v8  ;;  %v134_v17 = vld [vmem:[%s2254_s0 + $0x8] sm:$0xff]  ;;  %v136_v28 = vld [vmem:[%s2254_s0 + $0x18] sm:$0xff]  ;;  %v135_v47 = vld [vmem:[%s2254_s0 + $0x10] sm:$0xff] }
  0x3b   :  { %341 = vmatpush.bf16.msra.mxu3 %v1837_v26  ;;  %328 = vmatpush.bf16.msra.mxu2 %v1843_v34 }
  0x3e   :  { %303 = vmatpush.bf16.msra.mxu0 %v1841_v33  ;;  %316 = vmatpush.bf16.msra.mxu1 %v1847_v38 }
  0x3f   :  { %342 = vmatpush.bf16.msra.mxu3 %v1849_v41  ;;  %329 = vmatpush.bf16.msra.mxu2 %v1855_v52 }
  0x42   :  { %304 = vmatpush.bf16.msra.mxu0 %v1853_v51  ;;  %317 = vmatpush.bf16.msra.mxu1 %v1859_v56 }
  0x43   :  { %343 = vmatpush.bf16.msra.mxu3 %v1861_v57  ;;  %330 = vmatpush.bf16.msra.mxu2 %v1867_v5 }
  0x46   :  { %305 = vmatpush.bf16.msra.mxu0 %v1865_v4  ;;  %318 = vmatpush.bf16.msra.mxu1 %v1871_v6 }
  0x47   :  { %344 = vmatpush.bf16.msra.mxu3 %v1873_v7  ;;  %331 = vmatpush.bf16.msra.mxu2 %v1879_v12 }
  0x49   :  { %306 = vmatmul.bf16.vlgmr.msra.gmra.mxu0 %v1674_v15  ;;  %319 = vmatmul.bf16.vlgmr.msra.gmra.mxu1 %v1674_v15 }
  0x4a   :  { %424 = vmatpush.bf16.msrb.mxu0 %v1786_v35  ;;  %437 = vmatpush.bf16.msrb.mxu1 %v1788_v39 }
  0x4b   :  { %463 = vmatpush.bf16.msrb.mxu3 %v1790_v40  ;;  %450 = vmatpush.bf16.msrb.mxu2 %v1801_v53 }
  0x4c   :  { %345 = vmatmul.bf16.vlgmr.msra.gmra.mxu3 %v1674_v15  ;;  %332 = vmatmul.bf16.vlgmr.msra.gmra.mxu2 %v1674_v15 }
  0x4e   :  { %425 = vmatpush.bf16.msrb.mxu0 %v1793_v44  ;;  %438 = vmatpush.bf16.msrb.mxu1 %v1797_v48 }
  0x4f   :  { %464 = vmatpush.bf16.msrb.mxu3 %v1799_v49  ;;  %451 = vmatpush.bf16.msrb.mxu2 %v1813_v2 }
  0x52   :  { %426 = vmatpush.bf16.msrb.mxu0 %v1805_v60  ;;  %439 = vmatpush.bf16.msrb.mxu1 %v1809_v0 }
  0x53   :  { %465 = vmatpush.bf16.msrb.mxu3 %v1811_v1  ;;  %452 = vmatpush.bf16.msrb.mxu2 %v1819_v10 }
  0x56   :  { %427 = vmatpush.bf16.msrb.mxu0 %v1817_v9  ;;  %440 = vmatpush.bf16.msrb.mxu1 %v1823_v13 }
  0x57   :  { %466 = vmatpush.bf16.msrb.mxu3 %v1825_v14  ;;  %453 = vmatpush.bf16.msrb.mxu2 %v1831_v22 }
  0x5a   :  { %428 = vmatpush.bf16.msrb.mxu0 %v1829_v21  ;;  %441 = vmatpush.bf16.msrb.mxu1 %v1835_v25 }
  0x5b   :  { %467 = vmatpush.bf16.msrb.mxu3 %v1837_v26  ;;  %454 = vmatpush.bf16.msrb.mxu2 %v1843_v34 }
  0x5e   :  { %429 = vmatpush.bf16.msrb.mxu0 %v1841_v33  ;;  %442 = vmatpush.bf16.msrb.mxu1 %v1847_v38 }
  0x5f   :  { %468 = vmatpush.bf16.msrb.mxu3 %v1849_v41  ;;  %455 = vmatpush.bf16.msrb.mxu2 %v1855_v52 }
  0x62   :  { %430 = vmatpush.bf16.msrb.mxu0 %v1853_v51  ;;  %443 = vmatpush.bf16.msrb.mxu1 %v1859_v56 }
  0x63   :  { %469 = vmatpush.bf16.msrb.mxu3 %v1861_v57  ;;  %456 = vmatpush.bf16.msrb.mxu2 %v1867_v5 }
  0x66   :  { %431 = vmatpush.bf16.msrb.mxu0 %v1865_v4  ;;  %444 = vmatpush.bf16.msrb.mxu1 %v1871_v6 }
  0x67   :  { %470 = vmatpush.bf16.msrb.mxu3 %v1873_v7  ;;  %457 = vmatpush.bf16.msrb.mxu2 %v1879_v12 }
  0x6a   :  { %551 = vmatpush.bf16.msra.mxu0 %v1786_v35  ;;  %564 = vmatpush.bf16.msra.mxu1 %v1788_v39 }
  0x6b   :  { %590 = vmatpush.bf16.msra.mxu3 %v1790_v40  ;;  %577 = vmatpush.bf16.msra.mxu2 %v1801_v53 }
  0x6e   :  { %552 = vmatpush.bf16.msra.mxu0 %v1793_v44  ;;  %565 = vmatpush.bf16.msra.mxu1 %v1797_v48 }
  0x6f   :  { %591 = vmatpush.bf16.msra.mxu3 %v1799_v49  ;;  %578 = vmatpush.bf16.msra.mxu2 %v1813_v2 }
  0x72   :  { %553 = vmatpush.bf16.msra.mxu0 %v1805_v60  ;;  %566 = vmatpush.bf16.msra.mxu1 %v1809_v0 }
  0x73   :  { %592 = vmatpush.bf16.msra.mxu3 %v1811_v1  ;;  %579 = vmatpush.bf16.msra.mxu2 %v1819_v10 }
  0x76   :  { %554 = vmatpush.bf16.msra.mxu0 %v1817_v9  ;;  %567 = vmatpush.bf16.msra.mxu1 %v1823_v13 }
  0x77   :  { %593 = vmatpush.bf16.msra.mxu3 %v1825_v14  ;;  %580 = vmatpush.bf16.msra.mxu2 %v1831_v22 }
  0x7a   :  { %555 = vmatpush.bf16.msra.mxu0 %v1829_v21  ;;  %568 = vmatpush.bf16.msra.mxu1 %v1835_v25 }
  0x7b   :  { %594 = vmatpush.bf16.msra.mxu3 %v1837_v26  ;;  %581 = vmatpush.bf16.msra.mxu2 %v1843_v34 }
  0x7e   :  { %556 = vmatpush.bf16.msra.mxu0 %v1841_v33  ;;  %569 = vmatpush.bf16.msra.mxu1 %v1847_v38 }
  0x7f   :  { %595 = vmatpush.bf16.msra.mxu3 %v1849_v41  ;;  %582 = vmatpush.bf16.msra.mxu2 %v1855_v52 }
  0x82   :  { %557 = vmatpush.bf16.msra.mxu0 %v1853_v51  ;;  %570 = vmatpush.bf16.msra.mxu1 %v1859_v56 }
  0x83   :  { %596 = vmatpush.bf16.msra.mxu3 %v1861_v57  ;;  %583 = vmatpush.bf16.msra.mxu2 %v1867_v5 }
  0x86   :  { %558 = vmatpush.bf16.msra.mxu0 %v1865_v4  ;;  %571 = vmatpush.bf16.msra.mxu1 %v1871_v6 }
  0x87   :  { %597 = vmatpush.bf16.msra.mxu3 %v1873_v7  ;;  %584 = vmatpush.bf16.msra.mxu2 %v1879_v12 }
  0xc6   :  { %v307_v18 = vpop.f32.mrf.mxu0  ;;  %v320_v20 = vpop.f32.mrf.mxu1 }
  0xc7   :  { %v350_v19 = vadd.f32 %v307_v18, %v133_v16  ;;  %v351_v23 = vadd.f32 %v320_v20, %v134_v17 }
  0xc9   :  { %v1451_v24 = vmul.f32 -1.442695, %v350_v19  ;;  %v1452_v27 = vmul.f32 -1.442695, %v351_v23 }
  0xcb   :  { %1544 = vpow2.f32 %v1451_v24 }
  0xcc   :  { %1546 = vpow2.f32 %v1452_v27 }
  0xce   :  { %v309_v31 = vpop.f32.mrf.mxu0  ;;  %v322_v32 = vpop.f32.mrf.mxu1 }
  0xcf   :  { %v346_v29 = vpop.f32.mrf.mxu3  ;;  %v333_v42 = vpop.f32.mrf.mxu2 }
  0xd0   :  { %v353_v30 = vadd.f32 %v346_v29, %v136_v28  ;;  %v352_v55 = vadd.f32 %v333_v42, %v135_v47 }
  0xd1   :  { %v1545_v37 = vpop.eup %1544 }
  0xd2   :  { %v1453_v36 = vmul.f32 -1.442695, %v353_v30  ;;  %v1547_v43 = vpop.eup %1546  ;;  %v357_v45 = vadd.f32 1.0, %v1545_v37 }
  0xd3   :  { %v376_v46 = vadd.f32 1.0, %v1547_v43 }
  0xd4   :  { %1548 = vpow2.f32 %v1453_v36  ;;  %v369_v15 = vand.u32 2147483648, %v357_v45  ;;  %v367_v18 = vand.u32 2147483647, %v357_v45  ;;  %vm363_vm2 = vweird.f32 %v357_v45 }
  0xd5   :  { %1550 = vrcp.f32 %v357_v45  ;;  %v388_v16 = vand.u32 2147483648, %v376_v46  ;;  %v386_v20 = vand.u32 2147483647, %v376_v46  ;;  %vm382_vm3 = vweird.f32 %v376_v46 }
  0xd6   :  { %1552 = vrcp.f32 %v376_v46  ;;  %v370_v29 = vor.u32 1.1754944e-38, %v369_v15  ;;  %vm368_vm5 = vcmp.eq.f32.partialorder %v367_v18, 8.507059e+37  ;;  %v1455_v15 = vld [vmem:[%s2254_s0 + $0x28] sm:$0xff] }
  0xd7   :  { %v348_v50 = vpop.f32.mrf.mxu3  ;;  %v335_v59 = vpop.f32.mrf.mxu2  ;;  %v389_v31 = vor.u32 1.1754944e-38, %v388_v16  ;;  %vm387_vm7 = vcmp.eq.f32.partialorder %v386_v20, 8.507059e+37 }
  0xda   :  { %v1549_v54 = vpop.eup %1548 }
  0xdb   :  { %v396_v58 = vadd.f32 1.0, %v1549_v54  ;;  %v1551_v61 = vpop.eup %1550 }
  0xdc   :  { %v1553_v62 = vpop.eup %1552  ;;  %v359_v63 = vmul.f32 %v1551_v61, %v357_v45  ;;  %vm364_vm0 = vweird.f32 %v1551_v61 }
  0xdd   :  { %1554 = vrcp.f32 %v396_v58  ;;  %v378_v3 = vmul.f32 %v1553_v62, %v376_v46  ;;  %vm383_vm1 = vweird.f32 %v1553_v62  ;;  %vm365_vm4 = vmor %vm363_vm2, %vm364_vm0  ;;  %v408_v46 = vand.u32 2147483648, %v396_v58 }
  0xde   :  { %1556 = vtanh.f32 %v352_v55  ;;  %v360_v8 = vsub.f32 1.0, %v359_v63  ;;  %vm384_vm6 = vmor %vm382_vm3, %vm383_vm1  ;;  %vm402_vm9 = vweird.f32 %v396_v58  ;;  %v406_v59 = vand.u32 2147483647, %v396_v58 }
  0xdf   :  { %v379_v11 = vsub.f32 1.0, %v378_v3  ;;  %v409_v63 = vor.u32 1.1754944e-38, %v408_v46 }
  0xe0   :  { %v361_v17 = vmul.f32 %v1551_v61, %v360_v8  ;;  %vm407_vm11 = vcmp.eq.f32.partialorder %v406_v59, 8.507059e+37 }
  0xe1   :  { %v380_v19 = vmul.f32 %v1553_v62, %v379_v11 }
  0xe2   :  { %v362_v24 = vadd.f32 %v1551_v61, %v361_v17 }
  0xe3   :  { %v1555_v23 = vpop.eup %1554  ;;  %v381_v30 = vadd.f32 %v1553_v62, %v380_v19 }
  0xe4   :  { %v1557_v27 = vpop.eup %1556  ;;  %v398_v28 = vmul.f32 %v1555_v23, %v396_v58  ;;  %v366_v32 = vsel %vm365_vm4, %v1551_v61, %v362_v24  ;;  %vm403_vm8 = vweird.f32 %v1555_v23  ;;  %v1454_v58 = vld [vmem:[%s2254_s0 + $0x20] sm:$0xff]  ;;  %v1457_v24 = vld [vmem:[%s2254_s0 + $0x38] sm:$0xff] }
  0xe5   :  { %v371_v37 = vsel %vm368_vm5, %v370_v29, %v366_v32  ;;  %v385_v42 = vsel %vm384_vm6, %v1553_v62, %v381_v30  ;;  %vm404_vm10 = vmor %vm402_vm9, %vm403_vm8 }
  0xe6   :  { %v399_v36 = vsub.f32 1.0, %v398_v28  ;;  %v390_v43 = vsel %vm387_vm7, %v389_v31, %v385_v42  ;;  %v413_v47 = vmul.f32 %v1557_v27, %v371_v37 }
  0xe7   :  { %v412_v54 = vmul.f32 0.0, %v390_v43 }
  0xe8   :  { %v400_v50 = vmul.f32 %v1555_v23, %v399_v36 }
  0xe9   :  { %v1958_v55 = vadd.f32 %v413_v47, %v412_v54  ;;  %v1456_v54 = vld [vmem:[%s2254_s0 + $0x30] sm:$0xff] }
  0xea   :  { %v401_v45 = vadd.f32 %v1555_v23, %v400_v50 }
  0xeb   :  { %1558 = vtanh.f32 %v1958_v55 }
  0xec   :  { %v405_v61 = vsel %vm404_vm10, %v1555_v23, %v401_v45 }
  0xed   :  { %v410_v62 = vsel %vm407_vm11, %v409_v63, %v405_v61 }
  0xf1   :  { %v1559_v3 = vpop.eup %1558 }
  0xf2   :  { %v416_v8 = vmul.f32 %v1559_v3, %v410_v62 }
  0xf4   :  { %417 = vst [vmem:[%s2256_s2] sm:$0xff] %v416_v8  ;;  %v423_v11 = vpack.c.bf16 %v416_v8, %v416_v8 }
  0xf6   :  { %432 = vmatmul.bf16.vlgmr.msrb.gmra.mxu0 %v423_v11  ;;  %445 = vmatmul.bf16.vlgmr.msrb.gmra.mxu1 %v423_v11 }
  0xf7   :  { %458 = vmatmul.bf16.vlgmr.msrb.gmra.mxu2 %v423_v11  ;;  %471 = vmatmul.bf16.vlgmr.msrb.gmra.mxu3 %v423_v11 }
  0xf8   :  { %678 = vmatpush.bf16.msrb.mxu0 %v1786_v35  ;;  %691 = vmatpush.bf16.msrb.mxu1 %v1788_v39 }
  0xf9   :  { %704 = vmatpush.bf16.msrb.mxu2 %v1801_v53  ;;  %717 = vmatpush.bf16.msrb.mxu3 %v1790_v40 }
  0xfc   :  { %679 = vmatpush.bf16.msrb.mxu0 %v1793_v44  ;;  %692 = vmatpush.bf16.msrb.mxu1 %v1797_v48 }
  0xfd   :  { %705 = vmatpush.bf16.msrb.mxu2 %v1813_v2  ;;  %718 = vmatpush.bf16.msrb.mxu3 %v1799_v49 }
 0x100   :  { %680 = vmatpush.bf16.msrb.mxu0 %v1805_v60  ;;  %693 = vmatpush.bf16.msrb.mxu1 %v1809_v0 }
 0x101   :  { %706 = vmatpush.bf16.msrb.mxu2 %v1819_v10  ;;  %719 = vmatpush.bf16.msrb.mxu3 %v1811_v1 }
 0x104   :  { %681 = vmatpush.bf16.msrb.mxu0 %v1817_v9  ;;  %694 = vmatpush.bf16.msrb.mxu1 %v1823_v13 }
 0x105   :  { %707 = vmatpush.bf16.msrb.mxu2 %v1831_v22  ;;  %720 = vmatpush.bf16.msrb.mxu3 %v1825_v14 }
 0x108   :  { %682 = vmatpush.bf16.msrb.mxu0 %v1829_v21  ;;  %695 = vmatpush.bf16.msrb.mxu1 %v1835_v25 }
 0x109   :  { %708 = vmatpush.bf16.msrb.mxu2 %v1843_v34  ;;  %721 = vmatpush.bf16.msrb.mxu3 %v1837_v26 }
 0x10c   :  { %683 = vmatpush.bf16.msrb.mxu0 %v1841_v33  ;;  %696 = vmatpush.bf16.msrb.mxu1 %v1847_v38 }
 0x10d   :  { %709 = vmatpush.bf16.msrb.mxu2 %v1855_v52  ;;  %722 = vmatpush.bf16.msrb.mxu3 %v1849_v41 }
 0x110   :  { %684 = vmatpush.bf16.msrb.mxu0 %v1853_v51  ;;  %697 = vmatpush.bf16.msrb.mxu1 %v1859_v56 }
 0x111   :  { %710 = vmatpush.bf16.msrb.mxu2 %v1867_v5  ;;  %723 = vmatpush.bf16.msrb.mxu3 %v1861_v57 }
 0x114   :  { %685 = vmatpush.bf16.msrb.mxu0 %v1865_v4  ;;  %698 = vmatpush.bf16.msrb.mxu1 %v1871_v6 }
 0x115   :  { %711 = vmatpush.bf16.msrb.mxu2 %v1879_v12  ;;  %724 = vmatpush.bf16.msrb.mxu3 %v1873_v7 }
 0x173   :  { %v433_v16 = vpop.f32.mrf.mxu0  ;;  %v446_v17 = vpop.f32.mrf.mxu1 }
 0x174   :  { %v476_v18 = vadd.f32 %v1454_v58, %v433_v16  ;;  %v477_v19 = vadd.f32 %v1455_v15, %v446_v17 }
 0x176   :  { %v1458_v20 = vmul.f32 -1.442695, %v476_v18  ;;  %v1459_v23 = vmul.f32 -1.442695, %v477_v19 }
 0x178   :  { %1560 = vpow2.f32 %v1458_v20 }
 0x179   :  { %1562 = vpow2.f32 %v1459_v23 }
 0x17a   :  { %v459_v27 = vpop.f32.mrf.mxu2  ;;  %v472_v28 = vpop.f32.mrf.mxu3 }
 0x17b   :  { %v479_v29 = vadd.f32 %v1457_v24, %v472_v28  ;;  %v435_v30 = vpop.f32.mrf.mxu0  ;;  %v448_v31 = vpop.f32.mrf.mxu1  ;;  %v478_v61 = vadd.f32 %v1456_v54, %v459_v27 }
 0x17d   :  { %v1460_v32 = vmul.f32 -1.442695, %v479_v29 }
 0x17e   :  { %v1561_v36 = vpop.eup %1560 }
 0x17f   :  { %v1563_v37 = vpop.eup %1562  ;;  %v483_v42 = vadd.f32 1.0, %v1561_v36  ;;  %1564 = vpow2.f32 %v1460_v32 }
 0x180   :  { %v502_v43 = vadd.f32 1.0, %v1563_v37 }
 0x181   :  { %1566 = vrcp.f32 %v483_v42  ;;  %v495_v58 = vand.u32 2147483648, %v483_v42  ;;  %v493_v17 = vand.u32 2147483647, %v483_v42  ;;  %vm489_vm14 = vweird.f32 %v483_v42 }
 0x182   :  { %1568 = vrcp.f32 %v502_v43  ;;  %v461_v47 = vpop.f32.mrf.mxu2  ;;  %v474_v50 = vpop.f32.mrf.mxu3  ;;  %v514_v15 = vand.u32 2147483648, %v502_v43  ;;  %v512_v19 = vand.u32 2147483647, %v502_v43  ;;  %vm508_vm15 = vweird.f32 %v502_v43 }
 0x183   :  { %v496_v24 = vor.u32 1.1754944e-38, %v495_v58  ;;  %vm494_vm2 = vcmp.eq.f32.partialorder %v493_v17, 8.507059e+37  ;;  %v1463_v58 = vld [vmem:[%s2254_s0 + $0x48] sm:$0xff] }
 0x184   :  { %v515_v29 = vor.u32 1.1754944e-38, %v514_v15  ;;  %vm513_vm3 = vcmp.eq.f32.partialorder %v512_v19, 8.507059e+37 }
 0x185   :  { %v1565_v45 = vpop.eup %1564 }
 0x186   :  { %v522_v46 = vadd.f32 1.0, %v1565_v45 }
 0x187   :  { %v1567_v59 = vpop.eup %1566 }
 0x188   :  { %v1569_v63 = vpop.eup %1568  ;;  %v485_v3 = vmul.f32 %v1567_v59, %v483_v42  ;;  %1570 = vrcp.f32 %v522_v46  ;;  %vm490_vm12 = vweird.f32 %v1567_v59  ;;  %vm528_vm5 = vweird.f32 %v522_v46 }
 0x189   :  { %v504_v62 = vmul.f32 %v1569_v63, %v502_v43  ;;  %1572 = vtanh.f32 %v478_v61  ;;  %vm509_vm13 = vweird.f32 %v1569_v63  ;;  %vm491_vm0 = vmor %vm489_vm14, %vm490_vm12  ;;  %v534_v61 = vand.u32 2147483648, %v522_v46 }
 0x18a   :  { %v486_v8 = vsub.f32 1.0, %v485_v3  ;;  %vm510_vm1 = vmor %vm508_vm15, %vm509_vm13 }
 0x18b   :  { %v505_v11 = vsub.f32 1.0, %v504_v62  ;;  %v535_v62 = vor.u32 1.1754944e-38, %v534_v61 }
 0x18c   :  { %v487_v16 = vmul.f32 %v1567_v59, %v486_v8 }
 0x18d   :  { %v506_v18 = vmul.f32 %v1569_v63, %v505_v11 }
 0x18e   :  { %v1571_v20 = vpop.eup %1570  ;;  %v488_v23 = vadd.f32 %v1567_v59, %v487_v16 }
 0x18f   :  { %v507_v27 = vadd.f32 %v1569_v63, %v506_v18  ;;  %v524_v28 = vmul.f32 %v1571_v20, %v522_v46  ;;  %v1573_v31 = vpop.eup %1572  ;;  %vm529_vm4 = vweird.f32 %v1571_v20 }
 0x190   :  { %v492_v30 = vsel %vm491_vm0, %v1567_v59, %v488_v23  ;;  %v532_v59 = vand.u32 2147483647, %v522_v46  ;;  %vm530_vm6 = vmor %vm528_vm5, %vm529_vm4  ;;  %v1462_v46 = vld [vmem:[%s2254_s0 + $0x40] sm:$0xff]  ;;  %v1465_v23 = vld [vmem:[%s2254_s0 + $0x58] sm:$0xff] }
 0x191   :  { %v497_v32 = vsel %vm494_vm2, %v496_v24, %v492_v30  ;;  %v511_v36 = vsel %vm510_vm1, %v1569_v63, %v507_v27  ;;  %v525_v37 = vsub.f32 1.0, %v524_v28 }
 0x192   :  { %v516_v47 = vsel %vm513_vm3, %v515_v29, %v511_v36  ;;  %v539_v50 = vmul.f32 %v1573_v31, %v497_v32  ;;  %vm533_vm7 = vcmp.eq.f32.partialorder %v532_v59, 8.507059e+37 }
 0x193   :  { %v538_v54 = vmul.f32 %v516_v47, %v1958_v55  ;;  %v526_v45 = vmul.f32 %v1571_v20, %v525_v37 }
 0x195   :  { %v2009_v42 = vadd.f32 %v539_v50, %v538_v54  ;;  %v527_v43 = vadd.f32 %v1571_v20, %v526_v45  ;;  %v1464_v45 = vld [vmem:[%s2254_s0 + $0x50] sm:$0xff] }
 0x197   :  { %1574 = vtanh.f32 %v2009_v42  ;;  %v531_v3 = vsel %vm530_vm6, %v1571_v20, %v527_v43 }
 0x198   :  { %v536_v8 = vsel %vm533_vm7, %v535_v62, %v531_v3 }
 0x19d   :  { %v1575_v63 = vpop.eup %1574 }
 0x19e   :  { %v542_v11 = vmul.f32 %v1575_v63, %v536_v8 }
 0x1a0   :  { %1461 = vst [vmem:[%s2256_s2 + $0x8] sm:$0xff] %v542_v11  ;;  %v550_v55 = vpack.c.bf16 %v542_v11, %v542_v11 }
 0x1a2   :  { %559 = vmatmul.bf16.vlgmr.msra.gmra.mxu0 %v550_v55  ;;  %572 = vmatmul.bf16.vlgmr.msra.gmra.mxu1 %v550_v55 }
 0x1a3   :  { %585 = vmatmul.bf16.vlgmr.msra.gmra.mxu2 %v550_v55  ;;  %598 = vmatmul.bf16.vlgmr.msra.gmra.mxu3 %v550_v55 }
 0x1a4   :  { %805 = vmatpush.bf16.msra.mxu0 %v1786_v35  ;;  %818 = vmatpush.bf16.msra.mxu1 %v1788_v39 }
 0x1a5   :  { %831 = vmatpush.bf16.msra.mxu2 %v1801_v53  ;;  %844 = vmatpush.bf16.msra.mxu3 %v1790_v40 }
 0x1a8   :  { %806 = vmatpush.bf16.msra.mxu0 %v1793_v44  ;;  %819 = vmatpush.bf16.msra.mxu1 %v1797_v48 }
 0x1a9   :  { %832 = vmatpush.bf16.msra.mxu2 %v1813_v2  ;;  %845 = vmatpush.bf16.msra.mxu3 %v1799_v49 }
 0x1ac   :  { %807 = vmatpush.bf16.msra.mxu0 %v1805_v60  ;;  %820 = vmatpush.bf16.msra.mxu1 %v1809_v0 }
 0x1ad   :  { %833 = vmatpush.bf16.msra.mxu2 %v1819_v10  ;;  %846 = vmatpush.bf16.msra.mxu3 %v1811_v1 }
 0x1b0   :  { %808 = vmatpush.bf16.msra.mxu0 %v1817_v9  ;;  %821 = vmatpush.bf16.msra.mxu1 %v1823_v13 }
 0x1b1   :  { %834 = vmatpush.bf16.msra.mxu2 %v1831_v22  ;;  %847 = vmatpush.bf16.msra.mxu3 %v1825_v14 }
 0x1b4   :  { %809 = vmatpush.bf16.msra.mxu0 %v1829_v21  ;;  %822 = vmatpush.bf16.msra.mxu1 %v1835_v25 }
 0x1b5   :  { %835 = vmatpush.bf16.msra.mxu2 %v1843_v34  ;;  %848 = vmatpush.bf16.msra.mxu3 %v1837_v26 }
 0x1b8   :  { %810 = vmatpush.bf16.msra.mxu0 %v1841_v33  ;;  %823 = vmatpush.bf16.msra.mxu1 %v1847_v38 }
 0x1b9   :  { %836 = vmatpush.bf16.msra.mxu2 %v1855_v52  ;;  %849 = vmatpush.bf16.msra.mxu3 %v1849_v41 }
 0x1bc   :  { %811 = vmatpush.bf16.msra.mxu0 %v1853_v51  ;;  %824 = vmatpush.bf16.msra.mxu1 %v1859_v56 }
 0x1bd   :  { %837 = vmatpush.bf16.msra.mxu2 %v1867_v5  ;;  %850 = vmatpush.bf16.msra.mxu3 %v1861_v57 }
 0x1c0   :  { %812 = vmatpush.bf16.msra.mxu0 %v1865_v4  ;;  %825 = vmatpush.bf16.msra.mxu1 %v1871_v6 }
 0x1c1   :  { %838 = vmatpush.bf16.msra.mxu2 %v1879_v12  ;;  %851 = vmatpush.bf16.msra.mxu3 %v1873_v7 }
 0x21f   :  { %v560_v15 = vpop.f32.mrf.mxu0  ;;  %v573_v16 = vpop.f32.mrf.mxu1 }
 0x220   :  { %v603_v17 = vadd.f32 %v1462_v46, %v560_v15  ;;  %v604_v18 = vadd.f32 %v1463_v58, %v573_v16 }
 0x222   :  { %v1466_v19 = vmul.f32 -1.442695, %v603_v17  ;;  %v1467_v20 = vmul.f32 -1.442695, %v604_v18 }
 0x224   :  { %1576 = vpow2.f32 %v1466_v19 }
 0x225   :  { %1578 = vpow2.f32 %v1467_v20 }
 0x226   :  { %v586_v24 = vpop.f32.mrf.mxu2  ;;  %v599_v27 = vpop.f32.mrf.mxu3 }
 0x227   :  { %v606_v28 = vadd.f32 %v1465_v23, %v599_v27  ;;  %v562_v29 = vpop.f32.mrf.mxu0  ;;  %v575_v30 = vpop.f32.mrf.mxu1  ;;  %v605_v3 = vadd.f32 %v1464_v45, %v586_v24 }
 0x229   :  { %v1468_v31 = vmul.f32 -1.442695, %v606_v28 }
 0x22a   :  { %v1577_v32 = vpop.eup %1576 }
 0x22b   :  { %v1579_v36 = vpop.eup %1578  ;;  %v610_v37 = vadd.f32 1.0, %v1577_v32  ;;  %1580 = vpow2.f32 %v1468_v31 }
 0x22c   :  { %v629_v47 = vadd.f32 1.0, %v1579_v36 }
 0x22d   :  { %1582 = vrcp.f32 %v610_v37  ;;  %v622_v46 = vand.u32 2147483648, %v610_v37  ;;  %v620_v16 = vand.u32 2147483647, %v610_v37  ;;  %vm616_vm10 = vweird.f32 %v610_v37 }
 0x22e   :  { %1584 = vrcp.f32 %v629_v47  ;;  %v588_v50 = vpop.f32.mrf.mxu2  ;;  %v601_v54 = vpop.f32.mrf.mxu3  ;;  %v641_v58 = vand.u32 2147483648, %v629_v47  ;;  %v639_v18 = vand.u32 2147483647, %v629_v47  ;;  %vm635_vm11 = vweird.f32 %v629_v47 }
 0x22f   :  { %v623_v23 = vor.u32 1.1754944e-38, %v622_v46  ;;  %vm621_vm14 = vcmp.eq.f32.partialorder %v620_v16, 8.507059e+37  ;;  %v1471_v46 = vld [vmem:[%s2254_s0 + $0x68] sm:$0xff] }
 0x230   :  { %v642_v28 = vor.u32 1.1754944e-38, %v641_v58  ;;  %vm640_vm15 = vcmp.eq.f32.partialorder %v639_v18, 8.507059e+37 }
 0x231   :  { %v1581_v43 = vpop.eup %1580 }
 0x232   :  { %v649_v61 = vadd.f32 1.0, %v1581_v43 }
 0x233   :  { %v1583_v59 = vpop.eup %1582 }
 0x234   :  { %v1585_v62 = vpop.eup %1584  ;;  %v612_v63 = vmul.f32 %v1583_v59, %v610_v37  ;;  %1586 = vrcp.f32 %v649_v61  ;;  %vm617_vm8 = vweird.f32 %v1583_v59  ;;  %vm655_vm1 = vweird.f32 %v649_v61 }
 0x235   :  { %v631_v8 = vmul.f32 %v1585_v62, %v629_v47  ;;  %1588 = vtanh.f32 %v605_v3  ;;  %vm636_vm9 = vweird.f32 %v1585_v62  ;;  %vm618_vm12 = vmor %vm616_vm10, %vm617_vm8  ;;  %v661_v3 = vand.u32 2147483648, %v649_v61 }
 0x236   :  { %v613_v11 = vsub.f32 1.0, %v612_v63  ;;  %vm637_vm13 = vmor %vm635_vm11, %vm636_vm9 }
 0x237   :  { %v632_v55 = vsub.f32 1.0, %v631_v8  ;;  %v662_v8 = vor.u32 1.1754944e-38, %v661_v3 }
 0x238   :  { %v614_v15 = vmul.f32 %v1583_v59, %v613_v11 }
 0x239   :  { %v633_v17 = vmul.f32 %v1585_v62, %v632_v55 }
 0x23a   :  { %v1587_v19 = vpop.eup %1586  ;;  %v615_v20 = vadd.f32 %v1583_v59, %v614_v15 }
 0x23b   :  { %v634_v24 = vadd.f32 %v1585_v62, %v633_v17  ;;  %v651_v27 = vmul.f32 %v1587_v19, %v649_v61  ;;  %v1589_v30 = vpop.eup %1588  ;;  %vm656_vm0 = vweird.f32 %v1587_v19 }
 0x23c   :  { %v619_v29 = vsel %vm618_vm12, %v1583_v59, %v615_v20  ;;  %v659_v59 = vand.u32 2147483647, %v649_v61  ;;  %vm657_vm2 = vmor %vm655_vm1, %vm656_vm0  ;;  %v1470_v61 = vld [vmem:[%s2254_s0 + $0x60] sm:$0xff]  ;;  %v1473_v20 = vld [vmem:[%s2254_s0 + $0x78] sm:$0xff] }
 0x23d   :  { %v624_v31 = vsel %vm621_vm14, %v623_v23, %v619_v29  ;;  %v638_v32 = vsel %vm637_vm13, %v1585_v62, %v634_v24  ;;  %v652_v36 = vsub.f32 1.0, %v651_v27 }
 0x23e   :  { %v643_v50 = vsel %vm640_vm15, %v642_v28, %v638_v32  ;;  %v666_v54 = vmul.f32 %v1589_v30, %v624_v31  ;;  %vm660_vm3 = vcmp.eq.f32.partialorder %v659_v59, 8.507059e+37 }
 0x23f   :  { %v665_v45 = vmul.f32 %v643_v50, %v2009_v42  ;;  %v653_v43 = vmul.f32 %v1587_v19, %v652_v36 }
 0x241   :  { %v2060_v37 = vadd.f32 %v666_v54, %v665_v45  ;;  %v654_v47 = vadd.f32 %v1587_v19, %v653_v43  ;;  %v1472_v43 = vld [vmem:[%s2254_s0 + $0x70] sm:$0xff] }
 0x243   :  { %1590 = vtanh.f32 %v2060_v37  ;;  %v658_v63 = vsel %vm657_vm2, %v1587_v19, %v654_v47 }
 0x244   :  { %v663_v11 = vsel %vm660_vm3, %v662_v8, %v658_v63 }
 0x249   :  { %v1591_v62 = vpop.eup %1590 }
 0x24a   :  { %v669_v55 = vmul.f32 %v1591_v62, %v663_v11 }
 0x24c   :  { %1469 = vst [vmem:[%s2256_s2 + $0x10] sm:$0xff] %v669_v55  ;;  %v677_v42 = vpack.c.bf16 %v669_v55, %v669_v55 }
 0x24e   :  { %686 = vmatmul.bf16.vlgmr.msrb.gmra.mxu0 %v677_v42  ;;  %699 = vmatmul.bf16.vlgmr.msrb.gmra.mxu1 %v677_v42 }
 0x24f   :  { %712 = vmatmul.bf16.vlgmr.msrb.gmra.mxu2 %v677_v42  ;;  %725 = vmatmul.bf16.vlgmr.msrb.gmra.mxu3 %v677_v42 }
 0x250   :  { %932 = vmatpush.bf16.msrb.mxu0 %v1786_v35  ;;  %945 = vmatpush.bf16.msrb.mxu1 %v1788_v39 }
 0x251   :  { %958 = vmatpush.bf16.msrb.mxu2 %v1801_v53  ;;  %971 = vmatpush.bf16.msrb.mxu3 %v1790_v40 }
 0x254   :  { %933 = vmatpush.bf16.msrb.mxu0 %v1793_v44  ;;  %946 = vmatpush.bf16.msrb.mxu1 %v1797_v48 }
 0x255   :  { %959 = vmatpush.bf16.msrb.mxu2 %v1813_v2  ;;  %972 = vmatpush.bf16.msrb.mxu3 %v1799_v49 }
 0x258   :  { %934 = vmatpush.bf16.msrb.mxu0 %v1805_v60  ;;  %947 = vmatpush.bf16.msrb.mxu1 %v1809_v0 }
 0x259   :  { %960 = vmatpush.bf16.msrb.mxu2 %v1819_v10  ;;  %973 = vmatpush.bf16.msrb.mxu3 %v1811_v1 }
 0x25c   :  { %935 = vmatpush.bf16.msrb.mxu0 %v1817_v9  ;;  %948 = vmatpush.bf16.msrb.mxu1 %v1823_v13 }
 0x25d   :  { %961 = vmatpush.bf16.msrb.mxu2 %v1831_v22  ;;  %974 = vmatpush.bf16.msrb.mxu3 %v1825_v14 }
 0x260   :  { %936 = vmatpush.bf16.msrb.mxu0 %v1829_v21  ;;  %949 = vmatpush.bf16.msrb.mxu1 %v1835_v25 }
 0x261   :  { %962 = vmatpush.bf16.msrb.mxu2 %v1843_v34  ;;  %975 = vmatpush.bf16.msrb.mxu3 %v1837_v26 }
 0x264   :  { %937 = vmatpush.bf16.msrb.mxu0 %v1841_v33  ;;  %950 = vmatpush.bf16.msrb.mxu1 %v1847_v38 }
 0x265   :  { %963 = vmatpush.bf16.msrb.mxu2 %v1855_v52  ;;  %976 = vmatpush.bf16.msrb.mxu3 %v1849_v41 }
 0x268   :  { %938 = vmatpush.bf16.msrb.mxu0 %v1853_v51  ;;  %951 = vmatpush.bf16.msrb.mxu1 %v1859_v56 }
 0x269   :  { %964 = vmatpush.bf16.msrb.mxu2 %v1867_v5  ;;  %977 = vmatpush.bf16.msrb.mxu3 %v1861_v57 }
 0x26c   :  { %939 = vmatpush.bf16.msrb.mxu0 %v1865_v4  ;;  %952 = vmatpush.bf16.msrb.mxu1 %v1871_v6 }
 0x26d   :  { %965 = vmatpush.bf16.msrb.mxu2 %v1879_v12  ;;  %978 = vmatpush.bf16.msrb.mxu3 %v1873_v7 }
 0x2cb   :  { %v687_v58 = vpop.f32.mrf.mxu0  ;;  %v700_v15 = vpop.f32.mrf.mxu1 }
 0x2cc   :  { %v730_v16 = vadd.f32 %v1470_v61, %v687_v58  ;;  %v731_v17 = vadd.f32 %v1471_v46, %v700_v15 }
 0x2ce   :  { %v1474_v18 = vmul.f32 -1.442695, %v730_v16  ;;  %v1475_v19 = vmul.f32 -1.442695, %v731_v17 }
 0x2d0   :  { %1592 = vpow2.f32 %v1474_v18 }
 0x2d1   :  { %1594 = vpow2.f32 %v1475_v19 }
 0x2d2   :  { %v713_v23 = vpop.f32.mrf.mxu2  ;;  %v726_v24 = vpop.f32.mrf.mxu3 }
 0x2d3   :  { %v733_v27 = vadd.f32 %v1473_v20, %v726_v24  ;;  %v689_v28 = vpop.f32.mrf.mxu0  ;;  %v702_v29 = vpop.f32.mrf.mxu1  ;;  %v732_v63 = vadd.f32 %v1472_v43, %v713_v23 }
 0x2d5   :  { %v1476_v30 = vmul.f32 -1.442695, %v733_v27 }
 0x2d6   :  { %v1593_v31 = vpop.eup %1592 }
 0x2d7   :  { %v1595_v32 = vpop.eup %1594  ;;  %v737_v36 = vadd.f32 1.0, %v1593_v31  ;;  %1596 = vpow2.f32 %v1476_v30 }
 0x2d8   :  { %v756_v50 = vadd.f32 1.0, %v1595_v32 }
 0x2d9   :  { %1598 = vrcp.f32 %v737_v36  ;;  %v749_v61 = vand.u32 2147483648, %v737_v36  ;;  %v747_v15 = vand.u32 2147483647, %v737_v36  ;;  %vm743_vm6 = vweird.f32 %v737_v36 }
 0x2da   :  { %1600 = vrcp.f32 %v756_v50  ;;  %v715_v54 = vpop.f32.mrf.mxu2  ;;  %v728_v45 = vpop.f32.mrf.mxu3  ;;  %v768_v46 = vand.u32 2147483648, %v756_v50  ;;  %v766_v17 = vand.u32 2147483647, %v756_v50  ;;  %vm762_vm7 = vweird.f32 %v756_v50 }
 0x2db   :  { %v750_v20 = vor.u32 1.1754944e-38, %v749_v61  ;;  %vm748_vm10 = vcmp.eq.f32.partialorder %v747_v15, 8.507059e+37  ;;  %v1479_v61 = vld [vmem:[%s2254_s0 + $0x88] sm:$0xff] }
 0x2dc   :  { %v769_v27 = vor.u32 1.1754944e-38, %v768_v46  ;;  %vm767_vm11 = vcmp.eq.f32.partialorder %v766_v17, 8.507059e+37 }
 0x2dd   :  { %v1597_v47 = vpop.eup %1596 }
 0x2de   :  { %v776_v3 = vadd.f32 1.0, %v1597_v47 }
 0x2df   :  { %v1599_v59 = vpop.eup %1598 }
 0x2e0   :  { %v1601_v8 = vpop.eup %1600  ;;  %v739_v62 = vmul.f32 %v1599_v59, %v737_v36  ;;  %1602 = vrcp.f32 %v776_v3  ;;  %vm744_vm4 = vweird.f32 %v1599_v59  ;;  %vm782_vm13 = vweird.f32 %v776_v3 }
 0x2e1   :  { %v758_v11 = vmul.f32 %v1601_v8, %v756_v50  ;;  %1604 = vtanh.f32 %v732_v63  ;;  %vm763_vm5 = vweird.f32 %v1601_v8  ;;  %vm745_vm8 = vmor %vm743_vm6, %vm744_vm4  ;;  %v788_v63 = vand.u32 2147483648, %v776_v3 }
 0x2e2   :  { %v740_v55 = vsub.f32 1.0, %v739_v62  ;;  %vm764_vm9 = vmor %vm762_vm7, %vm763_vm5 }
 0x2e3   :  { %v759_v42 = vsub.f32 1.0, %v758_v11  ;;  %v789_v11 = vor.u32 1.1754944e-38, %v788_v63 }
 0x2e4   :  { %v741_v58 = vmul.f32 %v1599_v59, %v740_v55 }
 0x2e5   :  { %v760_v16 = vmul.f32 %v1601_v8, %v759_v42 }
 0x2e6   :  { %v1603_v18 = vpop.eup %1602  ;;  %v742_v19 = vadd.f32 %v1599_v59, %v741_v58 }
 0x2e7   :  { %v761_v23 = vadd.f32 %v1601_v8, %v760_v16  ;;  %v778_v24 = vmul.f32 %v1603_v18, %v776_v3  ;;  %v1605_v29 = vpop.eup %1604  ;;  %vm783_vm12 = vweird.f32 %v1603_v18 }
 0x2e8   :  { %v746_v28 = vsel %vm745_vm8, %v1599_v59, %v742_v19  ;;  %v786_v59 = vand.u32 2147483647, %v776_v3  ;;  %vm784_vm14 = vmor %vm782_vm13, %vm783_vm12  ;;  %v1478_v3 = vld [vmem:[%s2254_s0 + $0x80] sm:$0xff]  ;;  %v1481_v19 = vld [vmem:[%s2254_s0 + $0x98] sm:$0xff] }
 0x2e9   :  { %v751_v30 = vsel %vm748_vm10, %v750_v20, %v746_v28  ;;  %v765_v31 = vsel %vm764_vm9, %v1601_v8, %v761_v23  ;;  %v779_v32 = vsub.f32 1.0, %v778_v24 }
 0x2ea   :  { %v770_v54 = vsel %vm767_vm11, %v769_v27, %v765_v31  ;;  %v793_v45 = vmul.f32 %v1605_v29, %v751_v30  ;;  %vm787_vm15 = vcmp.eq.f32.partialorder %v786_v59, 8.507059e+37 }
 0x2eb   :  { %v792_v43 = vmul.f32 %v770_v54, %v2060_v37  ;;  %v780_v47 = vmul.f32 %v1603_v18, %v779_v32 }
 0x2ed   :  { %v2111_v36 = vadd.f32 %v793_v45, %v792_v43  ;;  %v781_v50 = vadd.f32 %v1603_v18, %v780_v47  ;;  %v1480_v47 = vld [vmem:[%s2254_s0 + $0x90] sm:$0xff] }
 0x2ef   :  { %1606 = vtanh.f32 %v2111_v36  ;;  %v785_v62 = vsel %vm784_vm14, %v1603_v18, %v781_v50 }
 0x2f0   :  { %v790_v55 = vsel %vm787_vm15, %v789_v11, %v785_v62 }
 0x2f5   :  { %v1607_v8 = vpop.eup %1606 }
 0x2f6   :  { %v796_v42 = vmul.f32 %v1607_v8, %v790_v55 }
 0x2f8   :  { %1477 = vst [vmem:[%s2256_s2 + $0x18] sm:$0xff] %v796_v42  ;;  %v804_v37 = vpack.c.bf16 %v796_v42, %v796_v42 }
 0x2fa   :  { %813 = vmatmul.bf16.vlgmr.msra.gmra.mxu0 %v804_v37  ;;  %826 = vmatmul.bf16.vlgmr.msra.gmra.mxu1 %v804_v37 }
 0x2fb   :  { %839 = vmatmul.bf16.vlgmr.msra.gmra.mxu2 %v804_v37  ;;  %852 = vmatmul.bf16.vlgmr.msra.gmra.mxu3 %v804_v37 }
 0x2fc   :  { %1059 = vmatpush.bf16.msra.mxu0 %v1786_v35  ;;  %1072 = vmatpush.bf16.msra.mxu1 %v1788_v39 }
 0x2fd   :  { %1085 = vmatpush.bf16.msra.mxu2 %v1801_v53  ;;  %1098 = vmatpush.bf16.msra.mxu3 %v1790_v40 }
 0x300   :  { %1060 = vmatpush.bf16.msra.mxu0 %v1793_v44  ;;  %1073 = vmatpush.bf16.msra.mxu1 %v1797_v48 }
 0x301   :  { %1086 = vmatpush.bf16.msra.mxu2 %v1813_v2  ;;  %1099 = vmatpush.bf16.msra.mxu3 %v1799_v49 }
 0x304   :  { %1061 = vmatpush.bf16.msra.mxu0 %v1805_v60  ;;  %1074 = vmatpush.bf16.msra.mxu1 %v1809_v0 }
 0x305   :  { %1087 = vmatpush.bf16.msra.mxu2 %v1819_v10  ;;  %1100 = vmatpush.bf16.msra.mxu3 %v1811_v1 }
 0x308   :  { %1062 = vmatpush.bf16.msra.mxu0 %v1817_v9  ;;  %1075 = vmatpush.bf16.msra.mxu1 %v1823_v13 }
 0x309   :  { %1088 = vmatpush.bf16.msra.mxu2 %v1831_v22  ;;  %1101 = vmatpush.bf16.msra.mxu3 %v1825_v14 }
 0x30c   :  { %1063 = vmatpush.bf16.msra.mxu0 %v1829_v21  ;;  %1076 = vmatpush.bf16.msra.mxu1 %v1835_v25 }
 0x30d   :  { %1089 = vmatpush.bf16.msra.mxu2 %v1843_v34  ;;  %1102 = vmatpush.bf16.msra.mxu3 %v1837_v26 }
 0x310   :  { %1064 = vmatpush.bf16.msra.mxu0 %v1841_v33  ;;  %1077 = vmatpush.bf16.msra.mxu1 %v1847_v38 }
 0x311   :  { %1090 = vmatpush.bf16.msra.mxu2 %v1855_v52  ;;  %1103 = vmatpush.bf16.msra.mxu3 %v1849_v41 }
 0x314   :  { %1065 = vmatpush.bf16.msra.mxu0 %v1853_v51  ;;  %1078 = vmatpush.bf16.msra.mxu1 %v1859_v56 }
 0x315   :  { %1091 = vmatpush.bf16.msra.mxu2 %v1867_v5  ;;  %1104 = vmatpush.bf16.msra.mxu3 %v1861_v57 }
 0x318   :  { %1066 = vmatpush.bf16.msra.mxu0 %v1865_v4  ;;  %1079 = vmatpush.bf16.msra.mxu1 %v1871_v6 }
 0x319   :  { %1092 = vmatpush.bf16.msra.mxu2 %v1879_v12  ;;  %1105 = vmatpush.bf16.msra.mxu3 %v1873_v7 }
 0x377   :  { %v814_v46 = vpop.f32.mrf.mxu0  ;;  %v827_v58 = vpop.f32.mrf.mxu1 }
 0x378   :  { %v857_v15 = vadd.f32 %v1478_v3, %v814_v46  ;;  %v858_v16 = vadd.f32 %v1479_v61, %v827_v58 }
 0x37a   :  { %v1482_v17 = vmul.f32 -1.442695, %v857_v15  ;;  %v1483_v18 = vmul.f32 -1.442695, %v858_v16 }
 0x37c   :  { %1608 = vpow2.f32 %v1482_v17 }
 0x37d   :  { %1610 = vpow2.f32 %v1483_v18 }
 0x37e   :  { %v840_v20 = vpop.f32.mrf.mxu2  ;;  %v853_v23 = vpop.f32.mrf.mxu3 }
 0x37f   :  { %v860_v24 = vadd.f32 %v1481_v19, %v853_v23  ;;  %v816_v27 = vpop.f32.mrf.mxu0  ;;  %v829_v28 = vpop.f32.mrf.mxu1  ;;  %v859_v62 = vadd.f32 %v1480_v47, %v840_v20 }
 0x381   :  { %v1484_v29 = vmul.f32 -1.442695, %v860_v24 }
 0x382   :  { %v1609_v30 = vpop.eup %1608 }
 0x383   :  { %v1611_v31 = vpop.eup %1610  ;;  %v864_v32 = vadd.f32 1.0, %v1609_v30  ;;  %1612 = vpow2.f32 %v1484_v29 }
 0x384   :  { %v883_v54 = vadd.f32 1.0, %v1611_v31 }
 0x385   :  { %1614 = vrcp.f32 %v864_v32  ;;  %v876_v3 = vand.u32 2147483648, %v864_v32  ;;  %v874_v58 = vand.u32 2147483647, %v864_v32  ;;  %vm870_vm2 = vweird.f32 %v864_v32 }
 0x386   :  { %1616 = vrcp.f32 %v883_v54  ;;  %v842_v45 = vpop.f32.mrf.mxu2  ;;  %v855_v43 = vpop.f32.mrf.mxu3  ;;  %v895_v61 = vand.u32 2147483648, %v883_v54  ;;  %v893_v16 = vand.u32 2147483647, %v883_v54  ;;  %vm889_vm3 = vweird.f32 %v883_v54 }
 0x387   :  { %v877_v19 = vor.u32 1.1754944e-38, %v876_v3  ;;  %vm875_vm6 = vcmp.eq.f32.partialorder %v874_v58, 8.507059e+37 }
 0x388   :  { %v896_v24 = vor.u32 1.1754944e-38, %v895_v61  ;;  %vm894_vm7 = vcmp.eq.f32.partialorder %v893_v16, 8.507059e+37 }
 0x389   :  { %v1613_v50 = vpop.eup %1612 }
 0x38a   :  { %v903_v63 = vadd.f32 1.0, %v1613_v50 }
 0x38b   :  { %v1615_v59 = vpop.eup %1614 }
 0x38c   :  { %v1617_v11 = vpop.eup %1616  ;;  %v866_v8 = vmul.f32 %v1615_v59, %v864_v32  ;;  %1618 = vrcp.f32 %v903_v63  ;;  %vm871_vm0 = vweird.f32 %v1615_v59  ;;  %vm909_vm9 = vweird.f32 %v903_v63 }
 0x38d   :  { %v885_v55 = vmul.f32 %v1617_v11, %v883_v54  ;;  %1620 = vtanh.f32 %v859_v62  ;;  %vm890_vm1 = vweird.f32 %v1617_v11  ;;  %vm872_vm4 = vmor %vm870_vm2, %vm871_vm0  ;;  %v915_v62 = vand.u32 2147483648, %v903_v63 }
 0x38e   :  { %v867_v42 = vsub.f32 1.0, %v866_v8  ;;  %vm891_vm5 = vmor %vm889_vm3, %vm890_vm1 }
 0x38f   :  { %v886_v37 = vsub.f32 1.0, %v885_v55  ;;  %v916_v55 = vor.u32 1.1754944e-38, %v915_v62 }
 0x390   :  { %v868_v46 = vmul.f32 %v1615_v59, %v867_v42 }
 0x391   :  { %v887_v15 = vmul.f32 %v1617_v11, %v886_v37 }
 0x392   :  { %v1619_v17 = vpop.eup %1618  ;;  %v869_v18 = vadd.f32 %v1615_v59, %v868_v46 }
 0x393   :  { %v888_v20 = vadd.f32 %v1617_v11, %v887_v15  ;;  %v905_v23 = vmul.f32 %v1619_v17, %v903_v63  ;;  %v1621_v28 = vpop.eup %1620  ;;  %vm910_vm8 = vweird.f32 %v1619_v17 }
 0x394   :  { %v873_v27 = vsel %vm872_vm4, %v1615_v59, %v869_v18  ;;  %v913_v59 = vand.u32 2147483647, %v903_v63  ;;  %vm911_vm10 = vmor %vm909_vm9, %vm910_vm8 }
 0x395   :  { %v878_v29 = vsel %vm875_vm6, %v877_v19, %v873_v27  ;;  %v892_v30 = vsel %vm891_vm5, %v1617_v11, %v888_v20  ;;  %v906_v31 = vsub.f32 1.0, %v905_v23 }
 0x396   :  { %v897_v45 = vsel %vm894_vm7, %v896_v24, %v892_v30  ;;  %v920_v43 = vmul.f32 %v1621_v28, %v878_v29  ;;  %vm914_vm11 = vcmp.eq.f32.partialorder %v913_v59, 8.507059e+37 }
 0x397   :  { %v919_v47 = vmul.f32 %v897_v45, %v2111_v36  ;;  %v907_v50 = vmul.f32 %v1619_v17, %v906_v31 }
 0x399   :  { %v2162_v32 = vadd.f32 %v920_v43, %v919_v47  ;;  %v908_v54 = vadd.f32 %v1619_v17, %v907_v50 }
 0x39b   :  { %1622 = vtanh.f32 %v2162_v32  ;;  %v912_v8 = vsel %vm911_vm10, %v1619_v17, %v908_v54 }
 0x39c   :  { %v917_v42 = vsel %vm914_vm11, %v916_v55, %v912_v8 }
 0x3a1   :  { %v1623_v11 = vpop.eup %1622 }
 0x3a2   :  { %v923_v37 = vmul.f32 %v1623_v11, %v917_v42 }
 0x3a4   :  { %1485 = vst [vmem:[%s2256_s2 + $0x20] sm:$0xff] %v923_v37  ;;  %v931_v36 = vpack.c.bf16 %v923_v37, %v923_v37  ;;  %v1494_v37 = vld [vmem:[%s2254_s0 + $0xc0] sm:$0xff] }
 0x3a6   :  { %940 = vmatmul.bf16.vlgmr.msrb.gmra.mxu0 %v931_v36  ;;  %953 = vmatmul.bf16.vlgmr.msrb.gmra.mxu1 %v931_v36 }
 0x3a7   :  { %966 = vmatmul.bf16.vlgmr.msrb.gmra.mxu2 %v931_v36  ;;  %979 = vmatmul.bf16.vlgmr.msrb.gmra.mxu3 %v931_v36  ;;  %v1495_v36 = vld [vmem:[%s2254_s0 + $0xc8] sm:$0xff] }
 0x3a8   :  { %1186 = vmatpush.bf16.msrb.mxu0 %v1786_v35  ;;  %1199 = vmatpush.bf16.msrb.mxu1 %v1788_v39  ;;  %v1486_v35 = vld [vmem:[%s2254_s0 + $0xa0] sm:$0xff]  ;;  %v1487_v39 = vld [vmem:[%s2254_s0 + $0xa8] sm:$0xff] }
 0x3a9   :  { %1212 = vmatpush.bf16.msrb.mxu2 %v1801_v53  ;;  %1225 = vmatpush.bf16.msrb.mxu3 %v1790_v40 }
 0x3ac   :  { %1187 = vmatpush.bf16.msrb.mxu0 %v1793_v44  ;;  %1200 = vmatpush.bf16.msrb.mxu1 %v1797_v48 }
 0x3ad   :  { %1213 = vmatpush.bf16.msrb.mxu2 %v1813_v2  ;;  %1226 = vmatpush.bf16.msrb.mxu3 %v1799_v49 }
 0x3b0   :  { %1188 = vmatpush.bf16.msrb.mxu0 %v1805_v60  ;;  %1201 = vmatpush.bf16.msrb.mxu1 %v1809_v0  ;;  %v1489_v0 = vld [vmem:[%s2254_s0 + $0xb8] sm:$0xff] }
 0x3b1   :  { %1214 = vmatpush.bf16.msrb.mxu2 %v1819_v10  ;;  %1227 = vmatpush.bf16.msrb.mxu3 %v1811_v1 }
 0x3b4   :  { %1189 = vmatpush.bf16.msrb.mxu0 %v1817_v9  ;;  %1202 = vmatpush.bf16.msrb.mxu1 %v1823_v13 }
 0x3b5   :  { %1215 = vmatpush.bf16.msrb.mxu2 %v1831_v22  ;;  %1228 = vmatpush.bf16.msrb.mxu3 %v1825_v14 }
 0x3b8   :  { %1190 = vmatpush.bf16.msrb.mxu0 %v1829_v21  ;;  %1203 = vmatpush.bf16.msrb.mxu1 %v1835_v25 }
 0x3b9   :  { %1216 = vmatpush.bf16.msrb.mxu2 %v1843_v34  ;;  %1229 = vmatpush.bf16.msrb.mxu3 %v1837_v26 }
 0x3bc   :  { %1191 = vmatpush.bf16.msrb.mxu0 %v1841_v33  ;;  %1204 = vmatpush.bf16.msrb.mxu1 %v1847_v38  ;;  %v1488_v38 = vld [vmem:[%s2254_s0 + $0xb0] sm:$0xff] }
 0x3bd   :  { %1217 = vmatpush.bf16.msrb.mxu2 %v1855_v52  ;;  %1230 = vmatpush.bf16.msrb.mxu3 %v1849_v41 }
 0x3c0   :  { %1192 = vmatpush.bf16.msrb.mxu0 %v1853_v51  ;;  %1205 = vmatpush.bf16.msrb.mxu1 %v1859_v56 }
 0x3c1   :  { %1218 = vmatpush.bf16.msrb.mxu2 %v1867_v5  ;;  %1231 = vmatpush.bf16.msrb.mxu3 %v1861_v57 }
 0x3c4   :  { %1193 = vmatpush.bf16.msrb.mxu0 %v1865_v4  ;;  %1206 = vmatpush.bf16.msrb.mxu1 %v1871_v6 }
 0x3c5   :  { %1219 = vmatpush.bf16.msrb.mxu2 %v1879_v12  ;;  %1232 = vmatpush.bf16.msrb.mxu3 %v1873_v7 }
 0x423   :  { %v941_v40 = vpop.f32.mrf.mxu0  ;;  %v954_v44 = vpop.f32.mrf.mxu1 }
 0x424   :  { %v984_v48 = vadd.f32 %v1486_v35, %v941_v40  ;;  %v985_v49 = vadd.f32 %v1487_v39, %v954_v44 }
 0x426   :  { %v1490_v53 = vmul.f32 -1.442695, %v984_v48  ;;  %v1491_v60 = vmul.f32 -1.442695, %v985_v49 }
 0x428   :  { %1624 = vpow2.f32 %v1490_v53  ;;  %v1497_v53 = vld [vmem:[%s2254_s0 + $0xd8] sm:$0xff] }
 0x429   :  { %1626 = vpow2.f32 %v1491_v60 }
 0x42a   :  { %v967_v1 = vpop.f32.mrf.mxu2  ;;  %v980_v2 = vpop.f32.mrf.mxu3 }
 0x42b   :  { %v987_v9 = vadd.f32 %v1489_v0, %v980_v2  ;;  %v943_v10 = vpop.f32.mrf.mxu0  ;;  %v956_v13 = vpop.f32.mrf.mxu1  ;;  %v986_v56 = vadd.f32 %v1488_v38, %v967_v1 }
 0x42d   :  { %v1492_v14 = vmul.f32 -1.442695, %v987_v9 }
 0x42e   :  { %v1625_v21 = vpop.eup %1624 }
 0x42f   :  { %v1627_v22 = vpop.eup %1626  ;;  %v991_v25 = vadd.f32 1.0, %v1625_v21  ;;  %1628 = vpow2.f32 %v1492_v14 }
 0x430   :  { %v1010_v26 = vadd.f32 1.0, %v1627_v22 }
 0x431   :  { %1630 = vrcp.f32 %v991_v25  ;;  %v1003_v12 = vand.u32 2147483648, %v991_v25  ;;  %v1001_v61 = vand.u32 2147483647, %v991_v25  ;;  %vm997_vm14 = vweird.f32 %v991_v25 }
 0x432   :  { %1632 = vrcp.f32 %v1010_v26  ;;  %v969_v33 = vpop.f32.mrf.mxu2  ;;  %v982_v34 = vpop.f32.mrf.mxu3  ;;  %v1022_v63 = vand.u32 2147483648, %v1010_v26  ;;  %v1020_v58 = vand.u32 2147483647, %v1010_v26  ;;  %vm1016_vm15 = vweird.f32 %v1010_v26 }
 0x433   :  { %v1004_v17 = vor.u32 1.1754944e-38, %v1003_v12  ;;  %vm1002_vm2 = vcmp.eq.f32.partialorder %v1001_v61, 8.507059e+37  ;;  %v1496_v33 = vld [vmem:[%s2254_s0 + $0xd0] sm:$0xff] }
 0x434   :  { %v1023_v20 = vor.u32 1.1754944e-38, %v1022_v63  ;;  %vm1021_vm3 = vcmp.eq.f32.partialorder %v1020_v58, 8.507059e+37 }
 0x435   :  { %v1629_v41 = vpop.eup %1628 }
 0x436   :  { %v1030_v51 = vadd.f32 1.0, %v1629_v41 }
 0x437   :  { %v1631_v52 = vpop.eup %1630 }
 0x438   :  { %v1633_v57 = vpop.eup %1632  ;;  %v993_v4 = vmul.f32 %v1631_v52, %v991_v25  ;;  %1634 = vrcp.f32 %v1030_v51  ;;  %vm998_vm12 = vweird.f32 %v1631_v52  ;;  %v1042_v54 = vand.u32 2147483648, %v1030_v51 }
 0x439   :  { %v1012_v5 = vmul.f32 %v1633_v57, %v1010_v26  ;;  %1636 = vtanh.f32 %v986_v56  ;;  %vm1017_vm13 = vweird.f32 %v1633_v57  ;;  %vm999_vm0 = vmor %vm997_vm14, %vm998_vm12  ;;  %vm1036_vm5 = vweird.f32 %v1030_v51 }
 0x43a   :  { %v994_v6 = vsub.f32 1.0, %v993_v4  ;;  %vm1018_vm1 = vmor %vm1016_vm15, %vm1017_vm13  ;;  %v1040_v62 = vand.u32 2147483647, %v1030_v51  ;;  %v1043_v8 = vor.u32 1.1754944e-38, %v1042_v54 }
 0x43b   :  { %v1013_v7 = vsub.f32 1.0, %v1012_v5 }
 0x43c   :  { %v995_v3 = vmul.f32 %v1631_v52, %v994_v6  ;;  %vm1041_vm7 = vcmp.eq.f32.partialorder %v1040_v62, 8.507059e+37 }
 0x43d   :  { %v1014_v46 = vmul.f32 %v1633_v57, %v1013_v7 }
 0x43e   :  { %v1635_v15 = vpop.eup %1634  ;;  %v996_v16 = vadd.f32 %v1631_v52, %v995_v3 }
 0x43f   :  { %v1015_v18 = vadd.f32 %v1633_v57, %v1014_v46  ;;  %v1032_v19 = vmul.f32 %v1635_v15, %v1030_v51  ;;  %v1637_v24 = vpop.eup %1636  ;;  %vm1037_vm4 = vweird.f32 %v1635_v15 }
 0x440   :  { %v1000_v23 = vsel %vm999_vm0, %v1631_v52, %v996_v16  ;;  %vm1038_vm6 = vmor %vm1036_vm5, %vm1037_vm4 }
 0x441   :  { %v1005_v27 = vsel %vm1002_vm2, %v1004_v17, %v1000_v23  ;;  %v1019_v28 = vsel %vm1018_vm1, %v1633_v57, %v1015_v18  ;;  %v1033_v29 = vsub.f32 1.0, %v1032_v19 }
 0x442   :  { %v1024_v30 = vsel %vm1021_vm3, %v1023_v20, %v1019_v28  ;;  %v1047_v31 = vmul.f32 %v1637_v24, %v1005_v27 }
 0x443   :  { %v1046_v45 = vmul.f32 %v1024_v30, %v2162_v32  ;;  %v1034_v43 = vmul.f32 %v1635_v15, %v1033_v29 }
 0x445   :  { %v2213_v47 = vadd.f32 %v1047_v31, %v1046_v45  ;;  %v1035_v50 = vadd.f32 %v1635_v15, %v1034_v43 }
 0x447   :  { %1638 = vtanh.f32 %v2213_v47  ;;  %v1039_v59 = vsel %vm1038_vm6, %v1635_v15, %v1035_v50 }
 0x448   :  { %v1044_v11 = vsel %vm1041_vm7, %v1043_v8, %v1039_v59 }
 0x44d   :  { %v1639_v55 = vpop.eup %1638 }
 0x44e   :  { %v1050_v42 = vmul.f32 %v1639_v55, %v1044_v11 }
 0x450   :  { %1493 = vst [vmem:[%s2256_s2 + $0x28] sm:$0xff] %v1050_v42  ;;  %v1058_v32 = vpack.c.bf16 %v1050_v42, %v1050_v42  ;;  %v1502_v42 = vld [vmem:[%s2254_s0 + $0xe0] sm:$0xff] }
 0x452   :  { %1067 = vmatmul.bf16.vlgmr.msra.gmra.mxu0 %v1058_v32  ;;  %1080 = vmatmul.bf16.vlgmr.msra.gmra.mxu1 %v1058_v32 }
 0x453   :  { %1093 = vmatmul.bf16.vlgmr.msra.gmra.mxu2 %v1058_v32  ;;  %1106 = vmatmul.bf16.vlgmr.msra.gmra.mxu3 %v1058_v32  ;;  %v1503_v32 = vld [vmem:[%s2254_s0 + $0xe8] sm:$0xff] }
 0x4cf   :  { %v1068_v35 = vpop.f32.mrf.mxu0  ;;  %v1081_v39 = vpop.f32.mrf.mxu1 }
 0x4d0   :  { %v1111_v40 = vadd.f32 %v1494_v37, %v1068_v35  ;;  %v1112_v44 = vadd.f32 %v1495_v36, %v1081_v39 }
 0x4d2   :  { %v1498_v48 = vmul.f32 -1.442695, %v1111_v40  ;;  %v1499_v49 = vmul.f32 -1.442695, %v1112_v44 }
 0x4d4   :  { %1640 = vpow2.f32 %v1498_v48  ;;  %v1505_v48 = vld [vmem:[%s2254_s0 + $0xf8] sm:$0xff] }
 0x4d5   :  { %1642 = vpow2.f32 %v1499_v49 }
 0x4d6   :  { %v1094_v60 = vpop.f32.mrf.mxu2  ;;  %v1107_v0 = vpop.f32.mrf.mxu3 }
 0x4d7   :  { %v1114_v1 = vadd.f32 %v1497_v53, %v1107_v0  ;;  %v1070_v2 = vpop.f32.mrf.mxu0  ;;  %v1083_v9 = vpop.f32.mrf.mxu1  ;;  %v1113_v51 = vadd.f32 %v1496_v33, %v1094_v60 }
 0x4d9   :  { %v1500_v10 = vmul.f32 -1.442695, %v1114_v1 }
 0x4da   :  { %v1641_v13 = vpop.eup %1640 }
 0x4db   :  { %v1643_v14 = vpop.eup %1642  ;;  %v1118_v21 = vadd.f32 1.0, %v1641_v13  ;;  %1644 = vpow2.f32 %v1500_v10 }
 0x4dc   :  { %v1137_v22 = vadd.f32 1.0, %v1643_v14 }
 0x4dd   :  { %1646 = vrcp.f32 %v1118_v21  ;;  %v1130_v6 = vand.u32 2147483648, %v1118_v21  ;;  %v1128_v63 = vand.u32 2147483647, %v1118_v21  ;;  %vm1124_vm10 = vweird.f32 %v1118_v21 }
 0x4de   :  { %1648 = vrcp.f32 %v1137_v22  ;;  %v1096_v25 = vpop.f32.mrf.mxu2  ;;  %v1109_v26 = vpop.f32.mrf.mxu3  ;;  %v1149_v7 = vand.u32 2147483648, %v1137_v22  ;;  %v1147_v61 = vand.u32 2147483647, %v1137_v22  ;;  %vm1143_vm11 = vweird.f32 %v1137_v22 }
 0x4df   :  { %v1131_v15 = vor.u32 1.1754944e-38, %v1130_v6  ;;  %vm1129_vm14 = vcmp.eq.f32.partialorder %v1128_v63, 8.507059e+37  ;;  %v1504_v25 = vld [vmem:[%s2254_s0 + $0xf0] sm:$0xff] }
 0x4e0   :  { %v1150_v18 = vor.u32 1.1754944e-38, %v1149_v7  ;;  %vm1148_vm15 = vcmp.eq.f32.partialorder %v1147_v61, 8.507059e+37 }
 0x4e1   :  { %v1645_v34 = vpop.eup %1644 }
 0x4e2   :  { %v1157_v38 = vadd.f32 1.0, %v1645_v34 }
 0x4e3   :  { %v1647_v41 = vpop.eup %1646 }
 0x4e4   :  { %v1649_v52 = vpop.eup %1648  ;;  %v1120_v56 = vmul.f32 %v1647_v41, %v1118_v21  ;;  %1650 = vrcp.f32 %v1157_v38  ;;  %vm1125_vm8 = vweird.f32 %v1647_v41  ;;  %v1169_v50 = vand.u32 2147483648, %v1157_v38 }
 0x4e5   :  { %v1139_v57 = vmul.f32 %v1649_v52, %v1137_v22  ;;  %1652 = vtanh.f32 %v1113_v51  ;;  %vm1144_vm9 = vweird.f32 %v1649_v52  ;;  %vm1126_vm12 = vmor %vm1124_vm10, %vm1125_vm8  ;;  %vm1163_vm1 = vweird.f32 %v1157_v38 }
 0x4e6   :  { %v1121_v4 = vsub.f32 1.0, %v1120_v56  ;;  %vm1145_vm13 = vmor %vm1143_vm11, %vm1144_vm9  ;;  %v1167_v54 = vand.u32 2147483647, %v1157_v38  ;;  %v1170_v59 = vor.u32 1.1754944e-38, %v1169_v50 }
 0x4e7   :  { %v1140_v5 = vsub.f32 1.0, %v1139_v57 }
 0x4e8   :  { %v1122_v12 = vmul.f32 %v1647_v41, %v1121_v4  ;;  %vm1168_vm3 = vcmp.eq.f32.partialorder %v1167_v54, 8.507059e+37 }
 0x4e9   :  { %v1141_v3 = vmul.f32 %v1649_v52, %v1140_v5 }
 0x4ea   :  { %v1651_v46 = vpop.eup %1650  ;;  %v1123_v58 = vadd.f32 %v1647_v41, %v1122_v12 }
 0x4eb   :  { %v1142_v16 = vadd.f32 %v1649_v52, %v1141_v3  ;;  %v1159_v17 = vmul.f32 %v1651_v46, %v1157_v38  ;;  %v1653_v20 = vpop.eup %1652  ;;  %vm1164_vm0 = vweird.f32 %v1651_v46 }
 0x4ec   :  { %v1127_v19 = vsel %vm1126_vm12, %v1647_v41, %v1123_v58  ;;  %vm1165_vm2 = vmor %vm1163_vm1, %vm1164_vm0 }
 0x4ed   :  { %v1132_v23 = vsel %vm1129_vm14, %v1131_v15, %v1127_v19  ;;  %v1146_v24 = vsel %vm1145_vm13, %v1649_v52, %v1142_v16  ;;  %v1160_v27 = vsub.f32 1.0, %v1159_v17 }
 0x4ee   :  { %v1151_v28 = vsel %vm1148_vm15, %v1150_v18, %v1146_v24  ;;  %v1174_v29 = vmul.f32 %v1653_v20, %v1132_v23 }
 0x4ef   :  { %v1173_v30 = vmul.f32 %v1151_v28, %v2213_v47  ;;  %v1161_v31 = vmul.f32 %v1651_v46, %v1160_v27 }
 0x4f1   :  { %v2232_v45 = vadd.f32 %v1174_v29, %v1173_v30  ;;  %v1162_v43 = vadd.f32 %v1651_v46, %v1161_v31 }
 0x4f3   :  { %1654 = vtanh.f32 %v2232_v45  ;;  %v1166_v62 = vsel %vm1165_vm2, %v1651_v46, %v1162_v43 }
 0x4f4   :  { %v1171_v55 = vsel %vm1168_vm3, %v1170_v59, %v1166_v62 }
 0x4f9   :  { %v1655_v8 = vpop.eup %1654 }
 0x4fa   :  { %v1177_v11 = vmul.f32 %v1655_v8, %v1171_v55 }
 0x4fc   :  { %1501 = vst [vmem:[%s2256_s2 + $0x30] sm:$0xff] %v1177_v11  ;;  %v1185_v47 = vpack.c.bf16 %v1177_v11, %v1177_v11 }
 0x4fe   :  { %1194 = vmatmul.bf16.vlgmr.msrb.gmra.mxu0 %v1185_v47  ;;  %1207 = vmatmul.bf16.vlgmr.msrb.gmra.mxu1 %v1185_v47 }
 0x4ff   :  { %1220 = vmatmul.bf16.vlgmr.msrb.gmra.mxu2 %v1185_v47  ;;  %1233 = vmatmul.bf16.vlgmr.msrb.gmra.mxu3 %v1185_v47 }
 0x57b   :  { %v1195_v37 = vpop.f32.mrf.mxu0  ;;  %v1208_v36 = vpop.f32.mrf.mxu1 }
 0x57c   :  { %v1238_v35 = vadd.f32 %v1502_v42, %v1195_v37  ;;  %v1239_v39 = vadd.f32 %v1503_v32, %v1208_v36 }
 0x57e   :  { %v1506_v40 = vmul.f32 -1.442695, %v1238_v35  ;;  %v1507_v44 = vmul.f32 -1.442695, %v1239_v39 }
 0x580   :  { %1656 = vpow2.f32 %v1506_v40 }
 0x581   :  { %1658 = vpow2.f32 %v1507_v44 }
 0x582   :  { %v1221_v49 = vpop.f32.mrf.mxu2  ;;  %v1234_v53 = vpop.f32.mrf.mxu3 }
 0x583   :  { %v1241_v60 = vadd.f32 %v1505_v48, %v1234_v53  ;;  %v1197_v0 = vpop.f32.mrf.mxu0  ;;  %v1210_v1 = vpop.f32.mrf.mxu1  ;;  %v1240_v38 = vadd.f32 %v1504_v25, %v1221_v49 }
 0x585   :  { %v1508_v2 = vmul.f32 -1.442695, %v1241_v60 }
 0x586   :  { %v1657_v9 = vpop.eup %1656 }
 0x587   :  { %v1659_v10 = vpop.eup %1658  ;;  %v1245_v13 = vadd.f32 1.0, %v1657_v9  ;;  %1660 = vpow2.f32 %v1508_v2 }
 0x588   :  { %v1264_v14 = vadd.f32 1.0, %v1659_v10 }
 0x589   :  { %1662 = vrcp.f32 %v1245_v13  ;;  %v1257_v4 = vand.u32 2147483648, %v1245_v13  ;;  %v1255_v7 = vand.u32 2147483647, %v1245_v13  ;;  %vm1251_vm6 = vweird.f32 %v1245_v13 }
 0x58a   :  { %1664 = vrcp.f32 %v1264_v14  ;;  %v1223_v21 = vpop.f32.mrf.mxu2  ;;  %v1236_v22 = vpop.f32.mrf.mxu3  ;;  %v1276_v5 = vand.u32 2147483648, %v1264_v14  ;;  %v1274_v63 = vand.u32 2147483647, %v1264_v14  ;;  %vm1270_vm7 = vweird.f32 %v1264_v14 }
 0x58b   :  { %v1258_v46 = vor.u32 1.1754944e-38, %v1257_v4  ;;  %vm1256_vm10 = vcmp.eq.f32.partialorder %v1255_v7, 8.507059e+37 }
 0x58c   :  { %v1277_v16 = vor.u32 1.1754944e-38, %v1276_v5  ;;  %vm1275_vm11 = vcmp.eq.f32.partialorder %v1274_v63, 8.507059e+37 }
 0x58d   :  { %v1661_v26 = vpop.eup %1660 }
 0x58e   :  { %v1284_v33 = vadd.f32 1.0, %v1661_v26 }
 0x58f   :  { %v1663_v34 = vpop.eup %1662 }
 0x590   :  { %v1665_v41 = vpop.eup %1664  ;;  %v1247_v51 = vmul.f32 %v1663_v34, %v1245_v13  ;;  %1666 = vrcp.f32 %v1284_v33  ;;  %vm1252_vm4 = vweird.f32 %v1663_v34  ;;  %v1296_v43 = vand.u32 2147483648, %v1284_v33 }
 0x591   :  { %v1266_v52 = vmul.f32 %v1665_v41, %v1264_v14  ;;  %1668 = vtanh.f32 %v1240_v38  ;;  %vm1271_vm5 = vweird.f32 %v1665_v41  ;;  %vm1253_vm8 = vmor %vm1251_vm6, %vm1252_vm4  ;;  %vm1290_vm13 = vweird.f32 %v1284_v33 }
 0x592   :  { %v1248_v56 = vsub.f32 1.0, %v1247_v51  ;;  %vm1272_vm9 = vmor %vm1270_vm7, %vm1271_vm5  ;;  %v1294_v50 = vand.u32 2147483647, %v1284_v33  ;;  %v1297_v62 = vor.u32 1.1754944e-38, %v1296_v43 }
 0x593   :  { %v1267_v57 = vsub.f32 1.0, %v1266_v52 }
 0x594   :  { %v1249_v6 = vmul.f32 %v1663_v34, %v1248_v56  ;;  %vm1295_vm15 = vcmp.eq.f32.partialorder %v1294_v50, 8.507059e+37 }
 0x595   :  { %v1268_v12 = vmul.f32 %v1665_v41, %v1267_v57 }
 0x596   :  { %v1667_v3 = vpop.eup %1666  ;;  %v1250_v61 = vadd.f32 %v1663_v34, %v1249_v6 }
 0x597   :  { %v1269_v58 = vadd.f32 %v1665_v41, %v1268_v12  ;;  %v1286_v15 = vmul.f32 %v1667_v3, %v1284_v33  ;;  %v1669_v18 = vpop.eup %1668  ;;  %vm1291_vm12 = vweird.f32 %v1667_v3 }
 0x598   :  { %v1254_v17 = vsel %vm1253_vm8, %v1663_v34, %v1250_v61  ;;  %vm1292_vm14 = vmor %vm1290_vm13, %vm1291_vm12 }
 0x599   :  { %v1259_v19 = vsel %vm1256_vm10, %v1258_v46, %v1254_v17  ;;  %v1273_v20 = vsel %vm1272_vm9, %v1665_v41, %v1269_v58  ;;  %v1287_v23 = vsub.f32 1.0, %v1286_v15 }
 0x59a   :  { %v1278_v24 = vsel %vm1275_vm11, %v1277_v16, %v1273_v20  ;;  %v1301_v27 = vmul.f32 %v1669_v18, %v1259_v19 }
 0x59b   :  { %v1300_v28 = vmul.f32 %v1278_v24, %v2232_v45  ;;  %v1288_v29 = vmul.f32 %v1667_v3, %v1287_v23 }
 0x59d   :  { %v1302_v30 = vadd.f32 %v1301_v27, %v1300_v28  ;;  %v1289_v31 = vadd.f32 %v1667_v3, %v1288_v29 }
 0x59f   :  { %1670 = vtanh.f32 %v1302_v30  ;;  %v1293_v54 = vsel %vm1292_vm14, %v1667_v3, %v1289_v31 }
 0x5a0   :  { %v1298_v8 = vsel %vm1295_vm15, %v1297_v62, %v1293_v54 }
 0x5a5   :  { %v1671_v59 = vpop.eup %1670 }
 0x5a6   :  { %v1304_v55 = vmul.f32 %v1671_v59, %v1298_v8 }
 0x5a8   :  { %1509 = vst [vmem:[%s2256_s2 + $0x38] sm:$0xff] %v1304_v55 }
 0x5a9   :  { %1313 = vsyncmov [#allocation5] }
 0x5ac   :  { %s1314_s9 = vpop.sfrf %1313 }
 0x5ad   :  { %p1510_p0 = scmp.ne.s32.totalorder %s1314_s9, 0 }
 0x5af   :  { %1318 = shalt.err (%p1510_p0)  }

// kernel: lstm_model_forward.3
= control target key start
LH: loop header
LB: loop body
LE: loop exit
PB: predicated region body
PF: predicated region fallthrough
CT: control target
= control target key end

     0   :  { %s2324_s0 = inlined_call_operand.vmem [shape: f32[8,8,512], index: 0, kind: input, shape index: {}]   ;;  %s2325_s1 = inlined_call_operand.vmem [shape: bf16[128,512], index: 1, kind: input, shape index: {}]   ;;  %s2326_s2 = inlined_call_operand.vmem [shape: f32[128,128], index: 2, kind: input, shape index: {}]   ;;  %s2327_s3 = inlined_call_operand.vmem [shape: f32[1,128], index: 3, kind: input, shape index: {}]   ;;  %s2328_s4 = inlined_call_operand.vmem [shape: f32[8,128], index: 4, kind: output, shape index: {}]  }
   0x1   :  { %v29_v0 = vld [vmem:[%s2325_s1] sm:$0xff]  ;;  %v31_v1 = vld [vmem:[%s2325_s1 + $0x8] sm:$0xff]  ;;  %v33_v2 = vld [vmem:[%s2325_s1 + $0x10] sm:$0xff] }
   0x2   :  { %30 = vst [vmem:[#allocation2] sm:$0xff] %v29_v0  ;;  %v35_v3 = vld [vmem:[%s2325_s1 + $0x18] sm:$0xff]  ;;  %v37_v4 = vld [vmem:[%s2325_s1 + $0x20] sm:$0xff]  ;;  %v39_v5 = vld [vmem:[%s2325_s1 + $0x28] sm:$0xff] }
   0x3   :  { %32 = vst [vmem:[#allocation2 + $0x8] sm:$0xff] %v31_v1  ;;  %v41_v6 = vld [vmem:[%s2325_s1 + $0x30] sm:$0xff]  ;;  %v43_v7 = vld [vmem:[%s2325_s1 + $0x38] sm:$0xff]  ;;  %v45_v8 = vld [vmem:[%s2325_s1 + $0x40] sm:$0xff] }
   0x4   :  { %34 = vst [vmem:[#allocation2 + $0x10] sm:$0xff] %v33_v2  ;;  %v47_v9 = vld [vmem:[%s2325_s1 + $0x48] sm:$0xff]  ;;  %v49_v10 = vld [vmem:[%s2325_s1 + $0x50] sm:$0xff]  ;;  %v51_v11 = vld [vmem:[%s2325_s1 + $0x58] sm:$0xff] }
   0x5   :  { %36 = vst [vmem:[#allocation2 + $0x18] sm:$0xff] %v35_v3  ;;  %v53_v12 = vld [vmem:[%s2325_s1 + $0x60] sm:$0xff]  ;;  %v55_v13 = vld [vmem:[%s2325_s1 + $0x68] sm:$0xff]  ;;  %v57_v14 = vld [vmem:[%s2325_s1 + $0x70] sm:$0xff] }
   0x6   :  { %38 = vst [vmem:[#allocation2 + $0x20] sm:$0xff] %v37_v4  ;;  %v59_v15 = vld [vmem:[%s2325_s1 + $0x78] sm:$0xff]  ;;  %v61_v16 = vld [vmem:[%s2325_s1 + $0x80] sm:$0xff]  ;;  %v63_v17 = vld [vmem:[%s2325_s1 + $0x88] sm:$0xff] }
   0x7   :  { %40 = vst [vmem:[#allocation2 + $0x28] sm:$0xff] %v39_v5  ;;  %v65_v18 = vld [vmem:[%s2325_s1 + $0x90] sm:$0xff]  ;;  %v67_v19 = vld [vmem:[%s2325_s1 + $0x98] sm:$0xff]  ;;  %v69_v20 = vld [vmem:[%s2325_s1 + $0xa0] sm:$0xff] }
   0x8   :  { %42 = vst [vmem:[#allocation2 + $0x30] sm:$0xff] %v41_v6  ;;  %v71_v21 = vld [vmem:[%s2325_s1 + $0xa8] sm:$0xff]  ;;  %v73_v22 = vld [vmem:[%s2325_s1 + $0xb0] sm:$0xff]  ;;  %v75_v23 = vld [vmem:[%s2325_s1 + $0xb8] sm:$0xff] }
   0x9   :  { %44 = vst [vmem:[#allocation2 + $0x38] sm:$0xff] %v43_v7  ;;  %v77_v24 = vld [vmem:[%s2325_s1 + $0xc0] sm:$0xff]  ;;  %v79_v25 = vld [vmem:[%s2325_s1 + $0xc8] sm:$0xff]  ;;  %v81_v26 = vld [vmem:[%s2325_s1 + $0xd0] sm:$0xff] }
   0xa   :  { %46 = vst [vmem:[#allocation2 + $0x40] sm:$0xff] %v45_v8  ;;  %v83_v27 = vld [vmem:[%s2325_s1 + $0xd8] sm:$0xff]  ;;  %v85_v28 = vld [vmem:[%s2325_s1 + $0xe0] sm:$0xff]  ;;  %v87_v29 = vld [vmem:[%s2325_s1 + $0xe8] sm:$0xff] }
   0xb   :  { %48 = vst [vmem:[#allocation2 + $0x48] sm:$0xff] %v47_v9  ;;  %v89_v30 = vld [vmem:[%s2325_s1 + $0xf0] sm:$0xff]  ;;  %v91_v31 = vld [vmem:[%s2325_s1 + $0xf8] sm:$0xff] }
   0xc   :  { %50 = vst [vmem:[#allocation2 + $0x50] sm:$0xff] %v49_v10 }
   0xd   :  { %52 = vst [vmem:[#allocation2 + $0x58] sm:$0xff] %v51_v11 }
   0xe   :  { %54 = vst [vmem:[#allocation2 + $0x60] sm:$0xff] %v53_v12 }
   0xf   :  { %56 = vst [vmem:[#allocation2 + $0x68] sm:$0xff] %v55_v13 }
  0x10   :  { %58 = vst [vmem:[#allocation2 + $0x70] sm:$0xff] %v57_v14 }
  0x11   :  { %60 = vst [vmem:[#allocation2 + $0x78] sm:$0xff] %v59_v15 }
  0x12   :  { %62 = vst [vmem:[#allocation2 + $0x80] sm:$0xff] %v61_v16 }
  0x13   :  { %64 = vst [vmem:[#allocation2 + $0x88] sm:$0xff] %v63_v17 }
  0x14   :  { %66 = vst [vmem:[#allocation2 + $0x90] sm:$0xff] %v65_v18 }
  0x15   :  { %68 = vst [vmem:[#allocation2 + $0x98] sm:$0xff] %v67_v19 }
  0x16   :  { %70 = vst [vmem:[#allocation2 + $0xa0] sm:$0xff] %v69_v20 }
  0x17   :  { %72 = vst [vmem:[#allocation2 + $0xa8] sm:$0xff] %v71_v21 }
  0x18   :  { %74 = vst [vmem:[#allocation2 + $0xb0] sm:$0xff] %v73_v22 }
  0x19   :  { %76 = vst [vmem:[#allocation2 + $0xb8] sm:$0xff] %v75_v23 }
  0x1a   :  { %78 = vst [vmem:[#allocation2 + $0xc0] sm:$0xff] %v77_v24 }
  0x1b   :  { %80 = vst [vmem:[#allocation2 + $0xc8] sm:$0xff] %v79_v25 }
  0x1c   :  { %82 = vst [vmem:[#allocation2 + $0xd0] sm:$0xff] %v81_v26 }
  0x1d   :  { %84 = vst [vmem:[#allocation2 + $0xd8] sm:$0xff] %v83_v27 }
  0x1e   :  { %86 = vst [vmem:[#allocation2 + $0xe0] sm:$0xff] %v85_v28 }
  0x1f   :  { %88 = vst [vmem:[#allocation2 + $0xe8] sm:$0xff] %v87_v29 }
  0x20   :  { %90 = vst [vmem:[#allocation2 + $0xf0] sm:$0xff] %v89_v30 }
  0x21   :  { %92 = vst [vmem:[#allocation2 + $0xf8] sm:$0xff] %v91_v31 }
  0x22   :  { %98 = vsyncadd [#allocation5], 4096 }
  0x23   :  { %1702 = dma.done.wait [#allocation5], 4096 }
  0x24   :  { %1703 = vsyncadd [#allocation5], 4294963200  ;;  %v1457_v41 = vld [vmem:[#allocation2 + $0xc0] sm:$0xf]  ;;  %v1566_v42 = vld [vmem:[#allocation2 + $0xcc] sm:$0xf0] }
  0x25   :  { %v1473_v32 = vld [vmem:[#allocation2 + $0xe0] sm:$0xf]  ;;  %v1568_v34 = vld [vmem:[#allocation2 + $0xe4] sm:$0xf]  ;;  %v1833_v44 = vor.u32 %v1566_v42, %v1457_v41  ;;  %v1459_v45 = vld [vmem:[#allocation2 + $0xd0] sm:$0xf0] }
  0x26   :  { %v1569_v37 = vld [vmem:[#allocation2 + $0xec] sm:$0xf]  ;;  %v1564_v43 = vld [vmem:[#allocation2 + $0xc4] sm:$0xf]  ;;  %v1467_v47 = vld [vmem:[#allocation2 + $0xd8] sm:$0xf0] }
  0x27   :  { %v1570_v33 = vld [vmem:[#allocation2 + $0xec] sm:$0xf0]  ;;  %v1475_v36 = vld [vmem:[#allocation2 + $0xf0] sm:$0xf0]  ;;  %v1565_v46 = vld [vmem:[#allocation2 + $0xcc] sm:$0xf]  ;;  %v1837_v48 = vor.u32 %v1564_v43, %v1459_v45 }
  0x28   :  { %v1826_v35 = vor.u32 %v1570_v33, %v1473_v32  ;;  %v1483_v38 = vld [vmem:[#allocation2 + $0xf8] sm:$0xf0]  ;;  %v1828_v39 = vor.u32 %v1568_v34, %v1475_v36  ;;  %v1839_v49 = vor.u32 %v1565_v46, %v1467_v47  ;;  %v1481_v50 = vld [vmem:[#allocation2 + $0xe8] sm:$0xf]  ;;  %v1571_v51 = vld [vmem:[#allocation2 + $0xf4] sm:$0xf0] }
  0x29   :  { %v1830_v40 = vor.u32 %v1569_v37, %v1483_v38  ;;  %v1441_v52 = vld [vmem:[#allocation2 + $0xa0] sm:$0xf]  ;;  %v1841_v53 = vor.u32 %v1571_v51, %v1481_v50  ;;  %v1562_v54 = vld [vmem:[#allocation2 + $0xac] sm:$0xf0]  ;;  %v1560_v55 = vld [vmem:[#allocation2 + $0xa4] sm:$0xf] }
  0x2a   :  { %304 = vmatpush.bf16.msra.mxu0 %v1826_v35  ;;  %317 = vmatpush.bf16.msra.mxu1 %v1828_v39  ;;  %v1443_v56 = vld [vmem:[#allocation2 + $0xb0] sm:$0xf0]  ;;  %v1561_v57 = vld [vmem:[#allocation2 + $0xac] sm:$0xf]  ;;  %v1451_v58 = vld [vmem:[#allocation2 + $0xb8] sm:$0xf0]  ;;  %v1845_v60 = vor.u32 %v1562_v54, %v1441_v52 }
  0x2b   :  { %343 = vmatpush.bf16.msra.mxu3 %v1830_v40  ;;  %v1465_v59 = vld [vmem:[#allocation2 + $0xc8] sm:$0xf]  ;;  %330 = vmatpush.bf16.msra.mxu2 %v1841_v53  ;;  %v1567_v61 = vld [vmem:[#allocation2 + $0xd4] sm:$0xf0]  ;;  %v1425_v62 = vld [vmem:[#allocation2 + $0x80] sm:$0xf]  ;;  %v1849_v0 = vor.u32 %v1560_v55, %v1443_v56  ;;  %v1851_v1 = vor.u32 %v1561_v57, %v1451_v58 }
  0x2c   :  { %v1558_v63 = vld [vmem:[#allocation2 + $0x8c] sm:$0xf0]  ;;  %v1853_v2 = vor.u32 %v1567_v61, %v1465_v59  ;;  %v1556_v3 = vld [vmem:[#allocation2 + $0x84] sm:$0xf]  ;;  %v1427_v4 = vld [vmem:[#allocation2 + $0x90] sm:$0xf0] }
  0x2d   :  { %v1557_v5 = vld [vmem:[#allocation2 + $0x8c] sm:$0xf]  ;;  %v1435_v6 = vld [vmem:[#allocation2 + $0x98] sm:$0xf0]  ;;  %v1449_v7 = vld [vmem:[#allocation2 + $0xa8] sm:$0xf]  ;;  %v1857_v9 = vor.u32 %v1558_v63, %v1425_v62  ;;  %v1863_v13 = vor.u32 %v1556_v3, %v1427_v4 }
  0x2e   :  { %305 = vmatpush.bf16.msra.mxu0 %v1833_v44  ;;  %318 = vmatpush.bf16.msra.mxu1 %v1837_v48  ;;  %v1563_v8 = vld [vmem:[#allocation2 + $0xb4] sm:$0xf0]  ;;  %v1409_v11 = vld [vmem:[#allocation2 + $0x60] sm:$0xf]  ;;  %v1554_v12 = vld [vmem:[#allocation2 + $0x6c] sm:$0xf0]  ;;  %v1865_v14 = vor.u32 %v1557_v5, %v1435_v6 }
  0x2f   :  { %344 = vmatpush.bf16.msra.mxu3 %v1839_v49  ;;  %331 = vmatpush.bf16.msra.mxu2 %v1853_v2  ;;  %v1859_v10 = vor.u32 %v1563_v8, %v1449_v7  ;;  %v1552_v15 = vld [vmem:[#allocation2 + $0x64] sm:$0xf]  ;;  %v1433_v16 = vld [vmem:[#allocation2 + $0x88] sm:$0xf]  ;;  %v1559_v17 = vld [vmem:[#allocation2 + $0x94] sm:$0xf0]  ;;  %v1869_v21 = vor.u32 %v1554_v12, %v1409_v11 }
  0x30   :  { %v1411_v18 = vld [vmem:[#allocation2 + $0x70] sm:$0xf0]  ;;  %v1553_v19 = vld [vmem:[#allocation2 + $0x6c] sm:$0xf]  ;;  %v1419_v20 = vld [vmem:[#allocation2 + $0x78] sm:$0xf0]  ;;  %v1871_v22 = vor.u32 %v1559_v17, %v1433_v16 }
  0x31   :  { %v1393_v23 = vld [vmem:[#allocation2 + $0x40] sm:$0xf]  ;;  %v1550_v24 = vld [vmem:[#allocation2 + $0x4c] sm:$0xf0]  ;;  %v1875_v25 = vor.u32 %v1552_v15, %v1411_v18  ;;  %v1877_v26 = vor.u32 %v1553_v19, %v1419_v20  ;;  %v1548_v27 = vld [vmem:[#allocation2 + $0x44] sm:$0xf] }
  0x32   :  { %306 = vmatpush.bf16.msra.mxu0 %v1845_v60  ;;  %319 = vmatpush.bf16.msra.mxu1 %v1849_v0  ;;  %v1417_v28 = vld [vmem:[#allocation2 + $0x68] sm:$0xf]  ;;  %v1555_v29 = vld [vmem:[#allocation2 + $0x74] sm:$0xf0]  ;;  %v1395_v30 = vld [vmem:[#allocation2 + $0x50] sm:$0xf0]  ;;  %v1881_v33 = vor.u32 %v1550_v24, %v1393_v23 }
  0x33   :  { %345 = vmatpush.bf16.msra.mxu3 %v1851_v1  ;;  %332 = vmatpush.bf16.msra.mxu2 %v1859_v10  ;;  %v1549_v31 = vld [vmem:[#allocation2 + $0x4c] sm:$0xf]  ;;  %v1403_v32 = vld [vmem:[#allocation2 + $0x58] sm:$0xf0]  ;;  %v1883_v34 = vor.u32 %v1555_v29, %v1417_v28  ;;  %v1377_v36 = vld [vmem:[#allocation2 + $0x20] sm:$0xf]  ;;  %v1887_v41 = vor.u32 %v1548_v27, %v1395_v30 }
  0x34   :  { %v1546_v37 = vld [vmem:[#allocation2 + $0x2c] sm:$0xf0]  ;;  %v1544_v38 = vld [vmem:[#allocation2 + $0x24] sm:$0xf]  ;;  %v1889_v42 = vor.u32 %v1549_v31, %v1403_v32  ;;  %v1379_v43 = vld [vmem:[#allocation2 + $0x30] sm:$0xf0] }
  0x35   :  { %v1401_v45 = vld [vmem:[#allocation2 + $0x48] sm:$0xf]  ;;  %v1551_v46 = vld [vmem:[#allocation2 + $0x54] sm:$0xf0]  ;;  %v1545_v47 = vld [vmem:[#allocation2 + $0x2c] sm:$0xf]  ;;  %v1893_v51 = vor.u32 %v1546_v37, %v1377_v36  ;;  %v1899_v56 = vor.u32 %v1544_v38, %v1379_v43 }
  0x36   :  { %307 = vmatpush.bf16.msra.mxu0 %v1857_v9  ;;  %320 = vmatpush.bf16.msra.mxu1 %v1863_v13  ;;  %v1387_v50 = vld [vmem:[#allocation2 + $0x38] sm:$0xf0]  ;;  %v1895_v52 = vor.u32 %v1551_v46, %v1401_v45  ;;  %v1361_v54 = vld [vmem:[#allocation2] sm:$0xf]  ;;  %v1542_v55 = vld [vmem:[#allocation2 + $0xc] sm:$0xf0] }
  0x37   :  { %346 = vmatpush.bf16.msra.mxu3 %v1865_v14  ;;  %333 = vmatpush.bf16.msra.mxu2 %v1871_v22  ;;  %v1901_v57 = vor.u32 %v1545_v47, %v1387_v50  ;;  %v1540_v58 = vld [vmem:[#allocation2 + $0x4] sm:$0xf]  ;;  %v1385_v59 = vld [vmem:[#allocation2 + $0x28] sm:$0xf]  ;;  %v1547_v61 = vld [vmem:[#allocation2 + $0x34] sm:$0xf0]  ;;  %v1905_v4 = vor.u32 %v1542_v55, %v1361_v54 }
  0x38   :  { %v1363_v62 = vld [vmem:[#allocation2 + $0x10] sm:$0xf0]  ;;  %v1541_v63 = vld [vmem:[#allocation2 + $0xc] sm:$0xf]  ;;  %v1371_v3 = vld [vmem:[#allocation2 + $0x18] sm:$0xf0]  ;;  %v1907_v5 = vor.u32 %v1547_v61, %v1385_v59 }
  0x39   :  { %v1911_v6 = vor.u32 %v1540_v58, %v1363_v62  ;;  %v1913_v7 = vor.u32 %v1541_v63, %v1371_v3  ;;  %v1369_v8 = vld [vmem:[#allocation2 + $0x8] sm:$0xf]  ;;  %v1543_v11 = vld [vmem:[#allocation2 + $0x14] sm:$0xf0]  ;;  %v1704_v15 = vmov 0.0|0.0   ;;  %v139_v16 = vld [vmem:[%s2324_s0] sm:$0xff] }
  0x3a   :  { %308 = vmatpush.bf16.msra.mxu0 %v1869_v21  ;;  %321 = vmatpush.bf16.msra.mxu1 %v1875_v25  ;;  %v1919_v12 = vor.u32 %v1543_v11, %v1369_v8  ;;  %v140_v17 = vld [vmem:[%s2324_s0 + $0x8] sm:$0xff]  ;;  %v142_v28 = vld [vmem:[%s2324_s0 + $0x18] sm:$0xff]  ;;  %v141_v47 = vld [vmem:[%s2324_s0 + $0x10] sm:$0xff] }
  0x3b   :  { %347 = vmatpush.bf16.msra.mxu3 %v1877_v26  ;;  %334 = vmatpush.bf16.msra.mxu2 %v1883_v34 }
  0x3e   :  { %309 = vmatpush.bf16.msra.mxu0 %v1881_v33  ;;  %322 = vmatpush.bf16.msra.mxu1 %v1887_v41 }
  0x3f   :  { %348 = vmatpush.bf16.msra.mxu3 %v1889_v42  ;;  %335 = vmatpush.bf16.msra.mxu2 %v1895_v52 }
  0x42   :  { %310 = vmatpush.bf16.msra.mxu0 %v1893_v51  ;;  %323 = vmatpush.bf16.msra.mxu1 %v1899_v56 }
  0x43   :  { %349 = vmatpush.bf16.msra.mxu3 %v1901_v57  ;;  %336 = vmatpush.bf16.msra.mxu2 %v1907_v5 }
  0x46   :  { %311 = vmatpush.bf16.msra.mxu0 %v1905_v4  ;;  %324 = vmatpush.bf16.msra.mxu1 %v1911_v6 }
  0x47   :  { %350 = vmatpush.bf16.msra.mxu3 %v1913_v7  ;;  %337 = vmatpush.bf16.msra.mxu2 %v1919_v12 }
  0x49   :  { %312 = vmatmul.bf16.vlgmr.msra.gmra.mxu0 %v1704_v15  ;;  %325 = vmatmul.bf16.vlgmr.msra.gmra.mxu1 %v1704_v15 }
  0x4a   :  { %429 = vmatpush.bf16.msrb.mxu0 %v1826_v35  ;;  %442 = vmatpush.bf16.msrb.mxu1 %v1828_v39 }
  0x4b   :  { %468 = vmatpush.bf16.msrb.mxu3 %v1830_v40  ;;  %455 = vmatpush.bf16.msrb.mxu2 %v1841_v53 }
  0x4c   :  { %351 = vmatmul.bf16.vlgmr.msra.gmra.mxu3 %v1704_v15  ;;  %338 = vmatmul.bf16.vlgmr.msra.gmra.mxu2 %v1704_v15 }
  0x4e   :  { %430 = vmatpush.bf16.msrb.mxu0 %v1833_v44  ;;  %443 = vmatpush.bf16.msrb.mxu1 %v1837_v48 }
  0x4f   :  { %469 = vmatpush.bf16.msrb.mxu3 %v1839_v49  ;;  %456 = vmatpush.bf16.msrb.mxu2 %v1853_v2 }
  0x52   :  { %431 = vmatpush.bf16.msrb.mxu0 %v1845_v60  ;;  %444 = vmatpush.bf16.msrb.mxu1 %v1849_v0 }
  0x53   :  { %470 = vmatpush.bf16.msrb.mxu3 %v1851_v1  ;;  %457 = vmatpush.bf16.msrb.mxu2 %v1859_v10 }
  0x56   :  { %432 = vmatpush.bf16.msrb.mxu0 %v1857_v9  ;;  %445 = vmatpush.bf16.msrb.mxu1 %v1863_v13 }
  0x57   :  { %471 = vmatpush.bf16.msrb.mxu3 %v1865_v14  ;;  %458 = vmatpush.bf16.msrb.mxu2 %v1871_v22 }
  0x5a   :  { %433 = vmatpush.bf16.msrb.mxu0 %v1869_v21  ;;  %446 = vmatpush.bf16.msrb.mxu1 %v1875_v25 }
  0x5b   :  { %472 = vmatpush.bf16.msrb.mxu3 %v1877_v26  ;;  %459 = vmatpush.bf16.msrb.mxu2 %v1883_v34 }
  0x5e   :  { %434 = vmatpush.bf16.msrb.mxu0 %v1881_v33  ;;  %447 = vmatpush.bf16.msrb.mxu1 %v1887_v41 }
  0x5f   :  { %473 = vmatpush.bf16.msrb.mxu3 %v1889_v42  ;;  %460 = vmatpush.bf16.msrb.mxu2 %v1895_v52 }
  0x62   :  { %435 = vmatpush.bf16.msrb.mxu0 %v1893_v51  ;;  %448 = vmatpush.bf16.msrb.mxu1 %v1899_v56 }
  0x63   :  { %474 = vmatpush.bf16.msrb.mxu3 %v1901_v57  ;;  %461 = vmatpush.bf16.msrb.mxu2 %v1907_v5 }
  0x66   :  { %436 = vmatpush.bf16.msrb.mxu0 %v1905_v4  ;;  %449 = vmatpush.bf16.msrb.mxu1 %v1911_v6 }
  0x67   :  { %475 = vmatpush.bf16.msrb.mxu3 %v1913_v7  ;;  %462 = vmatpush.bf16.msrb.mxu2 %v1919_v12 }
  0x6a   :  { %554 = vmatpush.bf16.msra.mxu0 %v1826_v35  ;;  %567 = vmatpush.bf16.msra.mxu1 %v1828_v39 }
  0x6b   :  { %593 = vmatpush.bf16.msra.mxu3 %v1830_v40  ;;  %580 = vmatpush.bf16.msra.mxu2 %v1841_v53 }
  0x6e   :  { %555 = vmatpush.bf16.msra.mxu0 %v1833_v44  ;;  %568 = vmatpush.bf16.msra.mxu1 %v1837_v48 }
  0x6f   :  { %594 = vmatpush.bf16.msra.mxu3 %v1839_v49  ;;  %581 = vmatpush.bf16.msra.mxu2 %v1853_v2 }
  0x72   :  { %556 = vmatpush.bf16.msra.mxu0 %v1845_v60  ;;  %569 = vmatpush.bf16.msra.mxu1 %v1849_v0 }
  0x73   :  { %595 = vmatpush.bf16.msra.mxu3 %v1851_v1  ;;  %582 = vmatpush.bf16.msra.mxu2 %v1859_v10 }
  0x76   :  { %557 = vmatpush.bf16.msra.mxu0 %v1857_v9  ;;  %570 = vmatpush.bf16.msra.mxu1 %v1863_v13 }
  0x77   :  { %596 = vmatpush.bf16.msra.mxu3 %v1865_v14  ;;  %583 = vmatpush.bf16.msra.mxu2 %v1871_v22 }
  0x7a   :  { %558 = vmatpush.bf16.msra.mxu0 %v1869_v21  ;;  %571 = vmatpush.bf16.msra.mxu1 %v1875_v25 }
  0x7b   :  { %597 = vmatpush.bf16.msra.mxu3 %v1877_v26  ;;  %584 = vmatpush.bf16.msra.mxu2 %v1883_v34 }
  0x7e   :  { %559 = vmatpush.bf16.msra.mxu0 %v1881_v33  ;;  %572 = vmatpush.bf16.msra.mxu1 %v1887_v41 }
  0x7f   :  { %598 = vmatpush.bf16.msra.mxu3 %v1889_v42  ;;  %585 = vmatpush.bf16.msra.mxu2 %v1895_v52 }
  0x82   :  { %560 = vmatpush.bf16.msra.mxu0 %v1893_v51  ;;  %573 = vmatpush.bf16.msra.mxu1 %v1899_v56 }
  0x83   :  { %599 = vmatpush.bf16.msra.mxu3 %v1901_v57  ;;  %586 = vmatpush.bf16.msra.mxu2 %v1907_v5 }
  0x86   :  { %561 = vmatpush.bf16.msra.mxu0 %v1905_v4  ;;  %574 = vmatpush.bf16.msra.mxu1 %v1911_v6 }
  0x87   :  { %600 = vmatpush.bf16.msra.mxu3 %v1913_v7  ;;  %587 = vmatpush.bf16.msra.mxu2 %v1919_v12 }
  0xc6   :  { %v313_v18 = vpop.f32.mrf.mxu0  ;;  %v326_v20 = vpop.f32.mrf.mxu1 }
  0xc7   :  { %v356_v19 = vadd.f32 %v313_v18, %v139_v16  ;;  %v357_v23 = vadd.f32 %v326_v20, %v140_v17 }
  0xc9   :  { %v1487_v24 = vmul.f32 -1.442695, %v356_v19  ;;  %v1488_v27 = vmul.f32 -1.442695, %v357_v23 }
  0xcb   :  { %1574 = vpow2.f32 %v1487_v24 }
  0xcc   :  { %1576 = vpow2.f32 %v1488_v27 }
  0xce   :  { %v315_v31 = vpop.f32.mrf.mxu0  ;;  %v328_v32 = vpop.f32.mrf.mxu1 }
  0xcf   :  { %v352_v29 = vpop.f32.mrf.mxu3  ;;  %v339_v38 = vpop.f32.mrf.mxu2 }
  0xd0   :  { %v359_v30 = vadd.f32 %v352_v29, %v142_v28  ;;  %v358_v55 = vadd.f32 %v339_v38, %v141_v47 }
  0xd1   :  { %v1575_v37 = vpop.eup %1574 }
  0xd2   :  { %v1489_v36 = vmul.f32 -1.442695, %v359_v30  ;;  %v1577_v43 = vpop.eup %1576  ;;  %v363_v45 = vadd.f32 1.0, %v1575_v37 }
  0xd3   :  { %v382_v46 = vadd.f32 1.0, %v1577_v43 }
  0xd4   :  { %1578 = vpow2.f32 %v1489_v36  ;;  %v375_v15 = vand.u32 2147483648, %v363_v45  ;;  %v373_v18 = vand.u32 2147483647, %v363_v45  ;;  %vm369_vm2 = vweird.f32 %v363_v45 }
  0xd5   :  { %1580 = vrcp.f32 %v363_v45  ;;  %v394_v16 = vand.u32 2147483648, %v382_v46  ;;  %v392_v20 = vand.u32 2147483647, %v382_v46  ;;  %vm388_vm3 = vweird.f32 %v382_v46 }
  0xd6   :  { %1582 = vrcp.f32 %v382_v46  ;;  %v376_v29 = vor.u32 1.1754944e-38, %v375_v15  ;;  %vm374_vm5 = vcmp.eq.f32.partialorder %v373_v18, 8.507059e+37  ;;  %v1491_v15 = vld [vmem:[%s2324_s0 + $0x28] sm:$0xff] }
  0xd7   :  { %v354_v50 = vpop.f32.mrf.mxu3  ;;  %v341_v59 = vpop.f32.mrf.mxu2  ;;  %v395_v31 = vor.u32 1.1754944e-38, %v394_v16  ;;  %vm393_vm7 = vcmp.eq.f32.partialorder %v392_v20, 8.507059e+37 }
  0xda   :  { %v1579_v54 = vpop.eup %1578 }
  0xdb   :  { %v402_v58 = vadd.f32 1.0, %v1579_v54  ;;  %v1581_v61 = vpop.eup %1580 }
  0xdc   :  { %v1583_v62 = vpop.eup %1582  ;;  %v365_v63 = vmul.f32 %v1581_v61, %v363_v45  ;;  %vm370_vm0 = vweird.f32 %v1581_v61 }
  0xdd   :  { %1584 = vrcp.f32 %v402_v58  ;;  %v384_v3 = vmul.f32 %v1583_v62, %v382_v46  ;;  %vm389_vm1 = vweird.f32 %v1583_v62  ;;  %vm371_vm4 = vmor %vm369_vm2, %vm370_vm0  ;;  %v414_v46 = vand.u32 2147483648, %v402_v58 }
  0xde   :  { %1586 = vtanh.f32 %v358_v55  ;;  %v366_v8 = vsub.f32 1.0, %v365_v63  ;;  %vm390_vm6 = vmor %vm388_vm3, %vm389_vm1  ;;  %vm408_vm9 = vweird.f32 %v402_v58  ;;  %v412_v59 = vand.u32 2147483647, %v402_v58 }
  0xdf   :  { %v385_v11 = vsub.f32 1.0, %v384_v3  ;;  %v415_v63 = vor.u32 1.1754944e-38, %v414_v46 }
  0xe0   :  { %v367_v17 = vmul.f32 %v1581_v61, %v366_v8  ;;  %vm413_vm11 = vcmp.eq.f32.partialorder %v412_v59, 8.507059e+37 }
  0xe1   :  { %v386_v19 = vmul.f32 %v1583_v62, %v385_v11 }
  0xe2   :  { %v368_v24 = vadd.f32 %v1581_v61, %v367_v17 }
  0xe3   :  { %v1585_v23 = vpop.eup %1584  ;;  %v387_v30 = vadd.f32 %v1583_v62, %v386_v19 }
  0xe4   :  { %v1587_v27 = vpop.eup %1586  ;;  %v404_v28 = vmul.f32 %v1585_v23, %v402_v58  ;;  %v372_v32 = vsel %vm371_vm4, %v1581_v61, %v368_v24  ;;  %vm409_vm8 = vweird.f32 %v1585_v23  ;;  %v1490_v58 = vld [vmem:[%s2324_s0 + $0x20] sm:$0xff]  ;;  %v1493_v24 = vld [vmem:[%s2324_s0 + $0x38] sm:$0xff] }
  0xe5   :  { %v377_v37 = vsel %vm374_vm5, %v376_v29, %v372_v32  ;;  %v391_v38 = vsel %vm390_vm6, %v1583_v62, %v387_v30  ;;  %vm410_vm10 = vmor %vm408_vm9, %vm409_vm8 }
  0xe6   :  { %v405_v36 = vsub.f32 1.0, %v404_v28  ;;  %v396_v43 = vsel %vm393_vm7, %v395_v31, %v391_v38  ;;  %v419_v47 = vmul.f32 %v1587_v27, %v377_v37 }
  0xe7   :  { %v418_v50 = vmul.f32 0.0, %v396_v43 }
  0xe8   :  { %v406_v54 = vmul.f32 %v1585_v23, %v405_v36 }
  0xe9   :  { %v1998_v55 = vadd.f32 %v419_v47, %v418_v50 }
  0xea   :  { %v407_v45 = vadd.f32 %v1585_v23, %v406_v54  ;;  %v1492_v54 = vld [vmem:[%s2324_s0 + $0x30] sm:$0xff] }
  0xeb   :  { %1588 = vtanh.f32 %v1998_v55 }
  0xec   :  { %v411_v61 = vsel %vm410_vm10, %v1585_v23, %v407_v45 }
  0xed   :  { %v416_v62 = vsel %vm413_vm11, %v415_v63, %v411_v61 }
  0xf1   :  { %v1589_v3 = vpop.eup %1588 }
  0xf2   :  { %v422_v8 = vmul.f32 %v1589_v3, %v416_v62 }
  0xf4   :  { %v428_v11 = vpack.c.bf16 %v422_v8, %v422_v8 }
  0xf6   :  { %437 = vmatmul.bf16.vlgmr.msrb.gmra.mxu0 %v428_v11  ;;  %450 = vmatmul.bf16.vlgmr.msrb.gmra.mxu1 %v428_v11 }
  0xf7   :  { %463 = vmatmul.bf16.vlgmr.msrb.gmra.mxu2 %v428_v11  ;;  %476 = vmatmul.bf16.vlgmr.msrb.gmra.mxu3 %v428_v11 }
  0xf8   :  { %679 = vmatpush.bf16.msrb.mxu0 %v1826_v35  ;;  %692 = vmatpush.bf16.msrb.mxu1 %v1828_v39 }
  0xf9   :  { %705 = vmatpush.bf16.msrb.mxu2 %v1841_v53  ;;  %718 = vmatpush.bf16.msrb.mxu3 %v1830_v40 }
  0xfc   :  { %680 = vmatpush.bf16.msrb.mxu0 %v1833_v44  ;;  %693 = vmatpush.bf16.msrb.mxu1 %v1837_v48 }
  0xfd   :  { %706 = vmatpush.bf16.msrb.mxu2 %v1853_v2  ;;  %719 = vmatpush.bf16.msrb.mxu3 %v1839_v49 }
 0x100   :  { %681 = vmatpush.bf16.msrb.mxu0 %v1845_v60  ;;  %694 = vmatpush.bf16.msrb.mxu1 %v1849_v0 }
 0x101   :  { %707 = vmatpush.bf16.msrb.mxu2 %v1859_v10  ;;  %720 = vmatpush.bf16.msrb.mxu3 %v1851_v1 }
 0x104   :  { %682 = vmatpush.bf16.msrb.mxu0 %v1857_v9  ;;  %695 = vmatpush.bf16.msrb.mxu1 %v1863_v13 }
 0x105   :  { %708 = vmatpush.bf16.msrb.mxu2 %v1871_v22  ;;  %721 = vmatpush.bf16.msrb.mxu3 %v1865_v14 }
 0x108   :  { %683 = vmatpush.bf16.msrb.mxu0 %v1869_v21  ;;  %696 = vmatpush.bf16.msrb.mxu1 %v1875_v25 }
 0x109   :  { %709 = vmatpush.bf16.msrb.mxu2 %v1883_v34  ;;  %722 = vmatpush.bf16.msrb.mxu3 %v1877_v26 }
 0x10c   :  { %684 = vmatpush.bf16.msrb.mxu0 %v1881_v33  ;;  %697 = vmatpush.bf16.msrb.mxu1 %v1887_v41 }
 0x10d   :  { %710 = vmatpush.bf16.msrb.mxu2 %v1895_v52  ;;  %723 = vmatpush.bf16.msrb.mxu3 %v1889_v42 }
 0x110   :  { %685 = vmatpush.bf16.msrb.mxu0 %v1893_v51  ;;  %698 = vmatpush.bf16.msrb.mxu1 %v1899_v56 }
 0x111   :  { %711 = vmatpush.bf16.msrb.mxu2 %v1907_v5  ;;  %724 = vmatpush.bf16.msrb.mxu3 %v1901_v57 }
 0x114   :  { %686 = vmatpush.bf16.msrb.mxu0 %v1905_v4  ;;  %699 = vmatpush.bf16.msrb.mxu1 %v1911_v6 }
 0x115   :  { %712 = vmatpush.bf16.msrb.mxu2 %v1919_v12  ;;  %725 = vmatpush.bf16.msrb.mxu3 %v1913_v7 }
 0x173   :  { %v438_v16 = vpop.f32.mrf.mxu0  ;;  %v451_v17 = vpop.f32.mrf.mxu1 }
 0x174   :  { %v481_v18 = vadd.f32 %v1490_v58, %v438_v16  ;;  %v482_v19 = vadd.f32 %v1491_v15, %v451_v17 }
 0x176   :  { %v1494_v20 = vmul.f32 -1.442695, %v481_v18  ;;  %v1495_v23 = vmul.f32 -1.442695, %v482_v19 }
 0x178   :  { %1590 = vpow2.f32 %v1494_v20 }
 0x179   :  { %1592 = vpow2.f32 %v1495_v23 }
 0x17a   :  { %v464_v27 = vpop.f32.mrf.mxu2  ;;  %v477_v28 = vpop.f32.mrf.mxu3 }
 0x17b   :  { %v484_v29 = vadd.f32 %v1493_v24, %v477_v28  ;;  %v440_v30 = vpop.f32.mrf.mxu0  ;;  %v453_v31 = vpop.f32.mrf.mxu1  ;;  %v483_v61 = vadd.f32 %v1492_v54, %v464_v27 }
 0x17d   :  { %v1496_v32 = vmul.f32 -1.442695, %v484_v29 }
 0x17e   :  { %v1591_v36 = vpop.eup %1590 }
 0x17f   :  { %v1593_v37 = vpop.eup %1592  ;;  %v488_v38 = vadd.f32 1.0, %v1591_v36  ;;  %1594 = vpow2.f32 %v1496_v32 }
 0x180   :  { %v507_v43 = vadd.f32 1.0, %v1593_v37 }
 0x181   :  { %1596 = vrcp.f32 %v488_v38  ;;  %v500_v58 = vand.u32 2147483648, %v488_v38  ;;  %v498_v17 = vand.u32 2147483647, %v488_v38  ;;  %vm494_vm14 = vweird.f32 %v488_v38 }
 0x182   :  { %1598 = vrcp.f32 %v507_v43  ;;  %v466_v47 = vpop.f32.mrf.mxu2  ;;  %v479_v50 = vpop.f32.mrf.mxu3  ;;  %v519_v15 = vand.u32 2147483648, %v507_v43  ;;  %v517_v19 = vand.u32 2147483647, %v507_v43  ;;  %vm513_vm15 = vweird.f32 %v507_v43 }
 0x183   :  { %v501_v24 = vor.u32 1.1754944e-38, %v500_v58  ;;  %vm499_vm2 = vcmp.eq.f32.partialorder %v498_v17, 8.507059e+37 }
 0x184   :  { %v520_v29 = vor.u32 1.1754944e-38, %v519_v15  ;;  %vm518_vm3 = vcmp.eq.f32.partialorder %v517_v19, 8.507059e+37 }
 0x185   :  { %v1595_v45 = vpop.eup %1594 }
 0x186   :  { %v527_v46 = vadd.f32 1.0, %v1595_v45 }
 0x187   :  { %v1597_v59 = vpop.eup %1596 }
 0x188   :  { %v1599_v63 = vpop.eup %1598  ;;  %v490_v3 = vmul.f32 %v1597_v59, %v488_v38  ;;  %1600 = vrcp.f32 %v527_v46  ;;  %vm495_vm12 = vweird.f32 %v1597_v59  ;;  %vm533_vm5 = vweird.f32 %v527_v46 }
 0x189   :  { %v509_v62 = vmul.f32 %v1599_v63, %v507_v43  ;;  %1602 = vtanh.f32 %v483_v61  ;;  %vm514_vm13 = vweird.f32 %v1599_v63  ;;  %vm496_vm0 = vmor %vm494_vm14, %vm495_vm12  ;;  %v539_v61 = vand.u32 2147483648, %v527_v46 }
 0x18a   :  { %v491_v8 = vsub.f32 1.0, %v490_v3  ;;  %vm515_vm1 = vmor %vm513_vm15, %vm514_vm13 }
 0x18b   :  { %v510_v11 = vsub.f32 1.0, %v509_v62  ;;  %v540_v62 = vor.u32 1.1754944e-38, %v539_v61 }
 0x18c   :  { %v492_v16 = vmul.f32 %v1597_v59, %v491_v8 }
 0x18d   :  { %v511_v18 = vmul.f32 %v1599_v63, %v510_v11 }
 0x18e   :  { %v1601_v20 = vpop.eup %1600  ;;  %v493_v23 = vadd.f32 %v1597_v59, %v492_v16 }
 0x18f   :  { %v512_v27 = vadd.f32 %v1599_v63, %v511_v18  ;;  %v529_v28 = vmul.f32 %v1601_v20, %v527_v46  ;;  %v1603_v31 = vpop.eup %1602  ;;  %vm534_vm4 = vweird.f32 %v1601_v20 }
 0x190   :  { %v497_v30 = vsel %vm496_vm0, %v1597_v59, %v493_v23  ;;  %v537_v59 = vand.u32 2147483647, %v527_v46  ;;  %vm535_vm6 = vmor %vm533_vm5, %vm534_vm4  ;;  %v1498_v46 = vld [vmem:[%s2324_s0 + $0x48] sm:$0xff]  ;;  %v1500_v23 = vld [vmem:[%s2324_s0 + $0x58] sm:$0xff] }
 0x191   :  { %v502_v32 = vsel %vm499_vm2, %v501_v24, %v497_v30  ;;  %v516_v36 = vsel %vm515_vm1, %v1599_v63, %v512_v27  ;;  %v530_v37 = vsub.f32 1.0, %v529_v28 }
 0x192   :  { %v521_v47 = vsel %vm518_vm3, %v520_v29, %v516_v36  ;;  %v544_v50 = vmul.f32 %v1603_v31, %v502_v32  ;;  %vm538_vm7 = vcmp.eq.f32.partialorder %v537_v59, 8.507059e+37 }
 0x193   :  { %v543_v54 = vmul.f32 %v521_v47, %v1998_v55  ;;  %v531_v45 = vmul.f32 %v1601_v20, %v530_v37  ;;  %v1497_v55 = vld [vmem:[%s2324_s0 + $0x40] sm:$0xff] }
 0x195   :  { %v2046_v38 = vadd.f32 %v544_v50, %v543_v54  ;;  %v532_v43 = vadd.f32 %v1601_v20, %v531_v45  ;;  %v1499_v45 = vld [vmem:[%s2324_s0 + $0x50] sm:$0xff] }
 0x197   :  { %1604 = vtanh.f32 %v2046_v38  ;;  %v536_v3 = vsel %vm535_vm6, %v1601_v20, %v532_v43 }
 0x198   :  { %v541_v8 = vsel %vm538_vm7, %v540_v62, %v536_v3 }
 0x19d   :  { %v1605_v63 = vpop.eup %1604 }
 0x19e   :  { %v547_v11 = vmul.f32 %v1605_v63, %v541_v8 }
 0x1a0   :  { %v553_v58 = vpack.c.bf16 %v547_v11, %v547_v11 }
 0x1a2   :  { %562 = vmatmul.bf16.vlgmr.msra.gmra.mxu0 %v553_v58  ;;  %575 = vmatmul.bf16.vlgmr.msra.gmra.mxu1 %v553_v58 }
 0x1a3   :  { %588 = vmatmul.bf16.vlgmr.msra.gmra.mxu2 %v553_v58  ;;  %601 = vmatmul.bf16.vlgmr.msra.gmra.mxu3 %v553_v58 }
 0x1a4   :  { %804 = vmatpush.bf16.msra.mxu0 %v1826_v35  ;;  %817 = vmatpush.bf16.msra.mxu1 %v1828_v39 }
 0x1a5   :  { %830 = vmatpush.bf16.msra.mxu2 %v1841_v53  ;;  %843 = vmatpush.bf16.msra.mxu3 %v1830_v40 }
 0x1a8   :  { %805 = vmatpush.bf16.msra.mxu0 %v1833_v44  ;;  %818 = vmatpush.bf16.msra.mxu1 %v1837_v48 }
 0x1a9   :  { %831 = vmatpush.bf16.msra.mxu2 %v1853_v2  ;;  %844 = vmatpush.bf16.msra.mxu3 %v1839_v49 }
 0x1ac   :  { %806 = vmatpush.bf16.msra.mxu0 %v1845_v60  ;;  %819 = vmatpush.bf16.msra.mxu1 %v1849_v0 }
 0x1ad   :  { %832 = vmatpush.bf16.msra.mxu2 %v1859_v10  ;;  %845 = vmatpush.bf16.msra.mxu3 %v1851_v1 }
 0x1b0   :  { %807 = vmatpush.bf16.msra.mxu0 %v1857_v9  ;;  %820 = vmatpush.bf16.msra.mxu1 %v1863_v13 }
 0x1b1   :  { %833 = vmatpush.bf16.msra.mxu2 %v1871_v22  ;;  %846 = vmatpush.bf16.msra.mxu3 %v1865_v14 }
 0x1b4   :  { %808 = vmatpush.bf16.msra.mxu0 %v1869_v21  ;;  %821 = vmatpush.bf16.msra.mxu1 %v1875_v25 }
 0x1b5   :  { %834 = vmatpush.bf16.msra.mxu2 %v1883_v34  ;;  %847 = vmatpush.bf16.msra.mxu3 %v1877_v26 }
 0x1b8   :  { %809 = vmatpush.bf16.msra.mxu0 %v1881_v33  ;;  %822 = vmatpush.bf16.msra.mxu1 %v1887_v41 }
 0x1b9   :  { %835 = vmatpush.bf16.msra.mxu2 %v1895_v52  ;;  %848 = vmatpush.bf16.msra.mxu3 %v1889_v42 }
 0x1bc   :  { %810 = vmatpush.bf16.msra.mxu0 %v1893_v51  ;;  %823 = vmatpush.bf16.msra.mxu1 %v1899_v56 }
 0x1bd   :  { %836 = vmatpush.bf16.msra.mxu2 %v1907_v5  ;;  %849 = vmatpush.bf16.msra.mxu3 %v1901_v57 }
 0x1c0   :  { %811 = vmatpush.bf16.msra.mxu0 %v1905_v4  ;;  %824 = vmatpush.bf16.msra.mxu1 %v1911_v6 }
 0x1c1   :  { %837 = vmatpush.bf16.msra.mxu2 %v1919_v12  ;;  %850 = vmatpush.bf16.msra.mxu3 %v1913_v7 }
 0x21f   :  { %v563_v15 = vpop.f32.mrf.mxu0  ;;  %v576_v16 = vpop.f32.mrf.mxu1 }
 0x220   :  { %v606_v17 = vadd.f32 %v1497_v55, %v563_v15  ;;  %v607_v18 = vadd.f32 %v1498_v46, %v576_v16 }
 0x222   :  { %v1501_v19 = vmul.f32 -1.442695, %v606_v17  ;;  %v1502_v20 = vmul.f32 -1.442695, %v607_v18 }
 0x224   :  { %1606 = vpow2.f32 %v1501_v19 }
 0x225   :  { %1608 = vpow2.f32 %v1502_v20 }
 0x226   :  { %v589_v24 = vpop.f32.mrf.mxu2  ;;  %v602_v27 = vpop.f32.mrf.mxu3 }
 0x227   :  { %v609_v28 = vadd.f32 %v1500_v23, %v602_v27  ;;  %v565_v29 = vpop.f32.mrf.mxu0  ;;  %v578_v30 = vpop.f32.mrf.mxu1  ;;  %v608_v3 = vadd.f32 %v1499_v45, %v589_v24 }
 0x229   :  { %v1503_v31 = vmul.f32 -1.442695, %v609_v28 }
 0x22a   :  { %v1607_v32 = vpop.eup %1606 }
 0x22b   :  { %v1609_v36 = vpop.eup %1608  ;;  %v613_v37 = vadd.f32 1.0, %v1607_v32  ;;  %1610 = vpow2.f32 %v1503_v31 }
 0x22c   :  { %v632_v47 = vadd.f32 1.0, %v1609_v36 }
 0x22d   :  { %1612 = vrcp.f32 %v613_v37  ;;  %v625_v55 = vand.u32 2147483648, %v613_v37  ;;  %v623_v16 = vand.u32 2147483647, %v613_v37  ;;  %vm619_vm10 = vweird.f32 %v613_v37 }
 0x22e   :  { %1614 = vrcp.f32 %v632_v47  ;;  %v591_v50 = vpop.f32.mrf.mxu2  ;;  %v604_v54 = vpop.f32.mrf.mxu3  ;;  %v644_v46 = vand.u32 2147483648, %v632_v47  ;;  %v642_v18 = vand.u32 2147483647, %v632_v47  ;;  %vm638_vm11 = vweird.f32 %v632_v47 }
 0x22f   :  { %v626_v23 = vor.u32 1.1754944e-38, %v625_v55  ;;  %vm624_vm14 = vcmp.eq.f32.partialorder %v623_v16, 8.507059e+37 }
 0x230   :  { %v645_v28 = vor.u32 1.1754944e-38, %v644_v46  ;;  %vm643_vm15 = vcmp.eq.f32.partialorder %v642_v18, 8.507059e+37 }
 0x231   :  { %v1611_v43 = vpop.eup %1610 }
 0x232   :  { %v652_v61 = vadd.f32 1.0, %v1611_v43 }
 0x233   :  { %v1613_v59 = vpop.eup %1612 }
 0x234   :  { %v1615_v62 = vpop.eup %1614  ;;  %v615_v63 = vmul.f32 %v1613_v59, %v613_v37  ;;  %1616 = vrcp.f32 %v652_v61  ;;  %vm620_vm8 = vweird.f32 %v1613_v59  ;;  %vm658_vm1 = vweird.f32 %v652_v61 }
 0x235   :  { %v634_v8 = vmul.f32 %v1615_v62, %v632_v47  ;;  %1618 = vtanh.f32 %v608_v3  ;;  %vm639_vm9 = vweird.f32 %v1615_v62  ;;  %vm621_vm12 = vmor %vm619_vm10, %vm620_vm8  ;;  %v664_v3 = vand.u32 2147483648, %v652_v61 }
 0x236   :  { %v616_v11 = vsub.f32 1.0, %v615_v63  ;;  %vm640_vm13 = vmor %vm638_vm11, %vm639_vm9 }
 0x237   :  { %v635_v58 = vsub.f32 1.0, %v634_v8  ;;  %v665_v8 = vor.u32 1.1754944e-38, %v664_v3 }
 0x238   :  { %v617_v15 = vmul.f32 %v1613_v59, %v616_v11 }
 0x239   :  { %v636_v17 = vmul.f32 %v1615_v62, %v635_v58 }
 0x23a   :  { %v1617_v19 = vpop.eup %1616  ;;  %v618_v20 = vadd.f32 %v1613_v59, %v617_v15 }
 0x23b   :  { %v637_v24 = vadd.f32 %v1615_v62, %v636_v17  ;;  %v654_v27 = vmul.f32 %v1617_v19, %v652_v61  ;;  %v1619_v30 = vpop.eup %1618  ;;  %vm659_vm0 = vweird.f32 %v1617_v19 }
 0x23c   :  { %v622_v29 = vsel %vm621_vm12, %v1613_v59, %v618_v20  ;;  %v662_v59 = vand.u32 2147483647, %v652_v61  ;;  %vm660_vm2 = vmor %vm658_vm1, %vm659_vm0  ;;  %v1505_v61 = vld [vmem:[%s2324_s0 + $0x68] sm:$0xff]  ;;  %v1507_v20 = vld [vmem:[%s2324_s0 + $0x78] sm:$0xff] }
 0x23d   :  { %v627_v31 = vsel %vm624_vm14, %v626_v23, %v622_v29  ;;  %v641_v32 = vsel %vm640_vm13, %v1615_v62, %v637_v24  ;;  %v655_v36 = vsub.f32 1.0, %v654_v27 }
 0x23e   :  { %v646_v50 = vsel %vm643_vm15, %v645_v28, %v641_v32  ;;  %v669_v54 = vmul.f32 %v1619_v30, %v627_v31  ;;  %vm663_vm3 = vcmp.eq.f32.partialorder %v662_v59, 8.507059e+37 }
 0x23f   :  { %v668_v45 = vmul.f32 %v646_v50, %v2046_v38  ;;  %v656_v43 = vmul.f32 %v1617_v19, %v655_v36  ;;  %v1504_v38 = vld [vmem:[%s2324_s0 + $0x60] sm:$0xff] }
 0x241   :  { %v2094_v37 = vadd.f32 %v669_v54, %v668_v45  ;;  %v657_v47 = vadd.f32 %v1617_v19, %v656_v43  ;;  %v1506_v43 = vld [vmem:[%s2324_s0 + $0x70] sm:$0xff] }
 0x243   :  { %1620 = vtanh.f32 %v2094_v37  ;;  %v661_v63 = vsel %vm660_vm2, %v1617_v19, %v657_v47 }
 0x244   :  { %v666_v11 = vsel %vm663_vm3, %v665_v8, %v661_v63 }
 0x249   :  { %v1621_v62 = vpop.eup %1620 }
 0x24a   :  { %v672_v58 = vmul.f32 %v1621_v62, %v666_v11 }
 0x24c   :  { %v678_v55 = vpack.c.bf16 %v672_v58, %v672_v58 }
 0x24e   :  { %687 = vmatmul.bf16.vlgmr.msrb.gmra.mxu0 %v678_v55  ;;  %700 = vmatmul.bf16.vlgmr.msrb.gmra.mxu1 %v678_v55 }
 0x24f   :  { %713 = vmatmul.bf16.vlgmr.msrb.gmra.mxu2 %v678_v55  ;;  %726 = vmatmul.bf16.vlgmr.msrb.gmra.mxu3 %v678_v55 }
 0x250   :  { %929 = vmatpush.bf16.msrb.mxu0 %v1826_v35  ;;  %942 = vmatpush.bf16.msrb.mxu1 %v1828_v39 }
 0x251   :  { %955 = vmatpush.bf16.msrb.mxu2 %v1841_v53  ;;  %968 = vmatpush.bf16.msrb.mxu3 %v1830_v40 }
 0x254   :  { %930 = vmatpush.bf16.msrb.mxu0 %v1833_v44  ;;  %943 = vmatpush.bf16.msrb.mxu1 %v1837_v48 }
 0x255   :  { %956 = vmatpush.bf16.msrb.mxu2 %v1853_v2  ;;  %969 = vmatpush.bf16.msrb.mxu3 %v1839_v49 }
 0x258   :  { %931 = vmatpush.bf16.msrb.mxu0 %v1845_v60  ;;  %944 = vmatpush.bf16.msrb.mxu1 %v1849_v0 }
 0x259   :  { %957 = vmatpush.bf16.msrb.mxu2 %v1859_v10  ;;  %970 = vmatpush.bf16.msrb.mxu3 %v1851_v1 }
 0x25c   :  { %932 = vmatpush.bf16.msrb.mxu0 %v1857_v9  ;;  %945 = vmatpush.bf16.msrb.mxu1 %v1863_v13 }
 0x25d   :  { %958 = vmatpush.bf16.msrb.mxu2 %v1871_v22  ;;  %971 = vmatpush.bf16.msrb.mxu3 %v1865_v14 }
 0x260   :  { %933 = vmatpush.bf16.msrb.mxu0 %v1869_v21  ;;  %946 = vmatpush.bf16.msrb.mxu1 %v1875_v25 }
 0x261   :  { %959 = vmatpush.bf16.msrb.mxu2 %v1883_v34  ;;  %972 = vmatpush.bf16.msrb.mxu3 %v1877_v26 }
 0x264   :  { %934 = vmatpush.bf16.msrb.mxu0 %v1881_v33  ;;  %947 = vmatpush.bf16.msrb.mxu1 %v1887_v41 }
 0x265   :  { %960 = vmatpush.bf16.msrb.mxu2 %v1895_v52  ;;  %973 = vmatpush.bf16.msrb.mxu3 %v1889_v42 }
 0x268   :  { %935 = vmatpush.bf16.msrb.mxu0 %v1893_v51  ;;  %948 = vmatpush.bf16.msrb.mxu1 %v1899_v56 }
 0x269   :  { %961 = vmatpush.bf16.msrb.mxu2 %v1907_v5  ;;  %974 = vmatpush.bf16.msrb.mxu3 %v1901_v57 }
 0x26c   :  { %936 = vmatpush.bf16.msrb.mxu0 %v1905_v4  ;;  %949 = vmatpush.bf16.msrb.mxu1 %v1911_v6 }
 0x26d   :  { %962 = vmatpush.bf16.msrb.mxu2 %v1919_v12  ;;  %975 = vmatpush.bf16.msrb.mxu3 %v1913_v7 }
 0x2cb   :  { %v688_v46 = vpop.f32.mrf.mxu0  ;;  %v701_v15 = vpop.f32.mrf.mxu1 }
 0x2cc   :  { %v731_v16 = vadd.f32 %v1504_v38, %v688_v46  ;;  %v732_v17 = vadd.f32 %v1505_v61, %v701_v15 }
 0x2ce   :  { %v1508_v18 = vmul.f32 -1.442695, %v731_v16  ;;  %v1509_v19 = vmul.f32 -1.442695, %v732_v17 }
 0x2d0   :  { %1622 = vpow2.f32 %v1508_v18 }
 0x2d1   :  { %1624 = vpow2.f32 %v1509_v19 }
 0x2d2   :  { %v714_v23 = vpop.f32.mrf.mxu2  ;;  %v727_v24 = vpop.f32.mrf.mxu3 }
 0x2d3   :  { %v734_v27 = vadd.f32 %v1507_v20, %v727_v24  ;;  %v690_v28 = vpop.f32.mrf.mxu0  ;;  %v703_v29 = vpop.f32.mrf.mxu1  ;;  %v733_v63 = vadd.f32 %v1506_v43, %v714_v23 }
 0x2d5   :  { %v1510_v30 = vmul.f32 -1.442695, %v734_v27 }
 0x2d6   :  { %v1623_v31 = vpop.eup %1622 }
 0x2d7   :  { %v1625_v32 = vpop.eup %1624  ;;  %v738_v36 = vadd.f32 1.0, %v1623_v31  ;;  %1626 = vpow2.f32 %v1510_v30 }
 0x2d8   :  { %v757_v50 = vadd.f32 1.0, %v1625_v32 }
 0x2d9   :  { %1628 = vrcp.f32 %v738_v36  ;;  %v750_v38 = vand.u32 2147483648, %v738_v36  ;;  %v748_v15 = vand.u32 2147483647, %v738_v36  ;;  %vm744_vm6 = vweird.f32 %v738_v36 }
 0x2da   :  { %1630 = vrcp.f32 %v757_v50  ;;  %v716_v54 = vpop.f32.mrf.mxu2  ;;  %v729_v45 = vpop.f32.mrf.mxu3  ;;  %v769_v61 = vand.u32 2147483648, %v757_v50  ;;  %v767_v17 = vand.u32 2147483647, %v757_v50  ;;  %vm763_vm7 = vweird.f32 %v757_v50 }
 0x2db   :  { %v751_v20 = vor.u32 1.1754944e-38, %v750_v38  ;;  %vm749_vm10 = vcmp.eq.f32.partialorder %v748_v15, 8.507059e+37 }
 0x2dc   :  { %v770_v27 = vor.u32 1.1754944e-38, %v769_v61  ;;  %vm768_vm11 = vcmp.eq.f32.partialorder %v767_v17, 8.507059e+37 }
 0x2dd   :  { %v1627_v47 = vpop.eup %1626 }
 0x2de   :  { %v777_v3 = vadd.f32 1.0, %v1627_v47 }
 0x2df   :  { %v1629_v59 = vpop.eup %1628 }
 0x2e0   :  { %v1631_v8 = vpop.eup %1630  ;;  %v740_v62 = vmul.f32 %v1629_v59, %v738_v36  ;;  %1632 = vrcp.f32 %v777_v3  ;;  %vm745_vm4 = vweird.f32 %v1629_v59  ;;  %vm783_vm13 = vweird.f32 %v777_v3 }
 0x2e1   :  { %v759_v11 = vmul.f32 %v1631_v8, %v757_v50  ;;  %1634 = vtanh.f32 %v733_v63  ;;  %vm764_vm5 = vweird.f32 %v1631_v8  ;;  %vm746_vm8 = vmor %vm744_vm6, %vm745_vm4  ;;  %v789_v63 = vand.u32 2147483648, %v777_v3 }
 0x2e2   :  { %v741_v58 = vsub.f32 1.0, %v740_v62  ;;  %vm765_vm9 = vmor %vm763_vm7, %vm764_vm5 }
 0x2e3   :  { %v760_v55 = vsub.f32 1.0, %v759_v11  ;;  %v790_v11 = vor.u32 1.1754944e-38, %v789_v63 }
 0x2e4   :  { %v742_v46 = vmul.f32 %v1629_v59, %v741_v58 }
 0x2e5   :  { %v761_v16 = vmul.f32 %v1631_v8, %v760_v55 }
 0x2e6   :  { %v1633_v18 = vpop.eup %1632  ;;  %v743_v19 = vadd.f32 %v1629_v59, %v742_v46 }
 0x2e7   :  { %v762_v23 = vadd.f32 %v1631_v8, %v761_v16  ;;  %v779_v24 = vmul.f32 %v1633_v18, %v777_v3  ;;  %v1635_v29 = vpop.eup %1634  ;;  %vm784_vm12 = vweird.f32 %v1633_v18 }
 0x2e8   :  { %v747_v28 = vsel %vm746_vm8, %v1629_v59, %v743_v19  ;;  %v787_v59 = vand.u32 2147483647, %v777_v3  ;;  %vm785_vm14 = vmor %vm783_vm13, %vm784_vm12  ;;  %v1512_v3 = vld [vmem:[%s2324_s0 + $0x88] sm:$0xff]  ;;  %v1514_v19 = vld [vmem:[%s2324_s0 + $0x98] sm:$0xff] }
 0x2e9   :  { %v752_v30 = vsel %vm749_vm10, %v751_v20, %v747_v28  ;;  %v766_v31 = vsel %vm765_vm9, %v1631_v8, %v762_v23  ;;  %v780_v32 = vsub.f32 1.0, %v779_v24 }
 0x2ea   :  { %v771_v54 = vsel %vm768_vm11, %v770_v27, %v766_v31  ;;  %v794_v45 = vmul.f32 %v1635_v29, %v752_v30  ;;  %vm788_vm15 = vcmp.eq.f32.partialorder %v787_v59, 8.507059e+37 }
 0x2eb   :  { %v793_v43 = vmul.f32 %v771_v54, %v2094_v37  ;;  %v781_v47 = vmul.f32 %v1633_v18, %v780_v32  ;;  %v1511_v37 = vld [vmem:[%s2324_s0 + $0x80] sm:$0xff] }
 0x2ed   :  { %v2142_v36 = vadd.f32 %v794_v45, %v793_v43  ;;  %v782_v50 = vadd.f32 %v1633_v18, %v781_v47  ;;  %v1513_v47 = vld [vmem:[%s2324_s0 + $0x90] sm:$0xff] }
 0x2ef   :  { %1636 = vtanh.f32 %v2142_v36  ;;  %v786_v62 = vsel %vm785_vm14, %v1633_v18, %v782_v50 }
 0x2f0   :  { %v791_v58 = vsel %vm788_vm15, %v790_v11, %v786_v62 }
 0x2f5   :  { %v1637_v8 = vpop.eup %1636 }
 0x2f6   :  { %v797_v55 = vmul.f32 %v1637_v8, %v791_v58 }
 0x2f8   :  { %v803_v38 = vpack.c.bf16 %v797_v55, %v797_v55 }
 0x2fa   :  { %812 = vmatmul.bf16.vlgmr.msra.gmra.mxu0 %v803_v38  ;;  %825 = vmatmul.bf16.vlgmr.msra.gmra.mxu1 %v803_v38 }
 0x2fb   :  { %838 = vmatmul.bf16.vlgmr.msra.gmra.mxu2 %v803_v38  ;;  %851 = vmatmul.bf16.vlgmr.msra.gmra.mxu3 %v803_v38 }
 0x2fc   :  { %1054 = vmatpush.bf16.msra.mxu0 %v1826_v35  ;;  %1067 = vmatpush.bf16.msra.mxu1 %v1828_v39 }
 0x2fd   :  { %1080 = vmatpush.bf16.msra.mxu2 %v1841_v53  ;;  %1093 = vmatpush.bf16.msra.mxu3 %v1830_v40 }
 0x300   :  { %1055 = vmatpush.bf16.msra.mxu0 %v1833_v44  ;;  %1068 = vmatpush.bf16.msra.mxu1 %v1837_v48 }
 0x301   :  { %1081 = vmatpush.bf16.msra.mxu2 %v1853_v2  ;;  %1094 = vmatpush.bf16.msra.mxu3 %v1839_v49 }
 0x304   :  { %1056 = vmatpush.bf16.msra.mxu0 %v1845_v60  ;;  %1069 = vmatpush.bf16.msra.mxu1 %v1849_v0 }
 0x305   :  { %1082 = vmatpush.bf16.msra.mxu2 %v1859_v10  ;;  %1095 = vmatpush.bf16.msra.mxu3 %v1851_v1 }
 0x308   :  { %1057 = vmatpush.bf16.msra.mxu0 %v1857_v9  ;;  %1070 = vmatpush.bf16.msra.mxu1 %v1863_v13 }
 0x309   :  { %1083 = vmatpush.bf16.msra.mxu2 %v1871_v22  ;;  %1096 = vmatpush.bf16.msra.mxu3 %v1865_v14 }
 0x30c   :  { %1058 = vmatpush.bf16.msra.mxu0 %v1869_v21  ;;  %1071 = vmatpush.bf16.msra.mxu1 %v1875_v25 }
 0x30d   :  { %1084 = vmatpush.bf16.msra.mxu2 %v1883_v34  ;;  %1097 = vmatpush.bf16.msra.mxu3 %v1877_v26 }
 0x310   :  { %1059 = vmatpush.bf16.msra.mxu0 %v1881_v33  ;;  %1072 = vmatpush.bf16.msra.mxu1 %v1887_v41 }
 0x311   :  { %1085 = vmatpush.bf16.msra.mxu2 %v1895_v52  ;;  %1098 = vmatpush.bf16.msra.mxu3 %v1889_v42 }
 0x314   :  { %1060 = vmatpush.bf16.msra.mxu0 %v1893_v51  ;;  %1073 = vmatpush.bf16.msra.mxu1 %v1899_v56 }
 0x315   :  { %1086 = vmatpush.bf16.msra.mxu2 %v1907_v5  ;;  %1099 = vmatpush.bf16.msra.mxu3 %v1901_v57 }
 0x318   :  { %1061 = vmatpush.bf16.msra.mxu0 %v1905_v4  ;;  %1074 = vmatpush.bf16.msra.mxu1 %v1911_v6 }
 0x319   :  { %1087 = vmatpush.bf16.msra.mxu2 %v1919_v12  ;;  %1100 = vmatpush.bf16.msra.mxu3 %v1913_v7 }
 0x377   :  { %v813_v61 = vpop.f32.mrf.mxu0  ;;  %v826_v46 = vpop.f32.mrf.mxu1 }
 0x378   :  { %v856_v15 = vadd.f32 %v1511_v37, %v813_v61  ;;  %v857_v16 = vadd.f32 %v1512_v3, %v826_v46 }
 0x37a   :  { %v1515_v17 = vmul.f32 -1.442695, %v856_v15  ;;  %v1516_v18 = vmul.f32 -1.442695, %v857_v16 }
 0x37c   :  { %1638 = vpow2.f32 %v1515_v17 }
 0x37d   :  { %1640 = vpow2.f32 %v1516_v18 }
 0x37e   :  { %v839_v20 = vpop.f32.mrf.mxu2  ;;  %v852_v23 = vpop.f32.mrf.mxu3 }
 0x37f   :  { %v859_v24 = vadd.f32 %v1514_v19, %v852_v23  ;;  %v815_v27 = vpop.f32.mrf.mxu0  ;;  %v828_v28 = vpop.f32.mrf.mxu1  ;;  %v858_v62 = vadd.f32 %v1513_v47, %v839_v20 }
 0x381   :  { %v1517_v29 = vmul.f32 -1.442695, %v859_v24 }
 0x382   :  { %v1639_v30 = vpop.eup %1638 }
 0x383   :  { %v1641_v31 = vpop.eup %1640  ;;  %v863_v32 = vadd.f32 1.0, %v1639_v30  ;;  %1642 = vpow2.f32 %v1517_v29 }
 0x384   :  { %v882_v54 = vadd.f32 1.0, %v1641_v31 }
 0x385   :  { %1644 = vrcp.f32 %v863_v32  ;;  %v875_v37 = vand.u32 2147483648, %v863_v32  ;;  %v873_v46 = vand.u32 2147483647, %v863_v32  ;;  %vm869_vm2 = vweird.f32 %v863_v32 }
 0x386   :  { %1646 = vrcp.f32 %v882_v54  ;;  %v841_v45 = vpop.f32.mrf.mxu2  ;;  %v854_v43 = vpop.f32.mrf.mxu3  ;;  %v894_v3 = vand.u32 2147483648, %v882_v54  ;;  %v892_v16 = vand.u32 2147483647, %v882_v54  ;;  %vm888_vm3 = vweird.f32 %v882_v54 }
 0x387   :  { %v876_v19 = vor.u32 1.1754944e-38, %v875_v37  ;;  %vm874_vm6 = vcmp.eq.f32.partialorder %v873_v46, 8.507059e+37 }
 0x388   :  { %v895_v24 = vor.u32 1.1754944e-38, %v894_v3  ;;  %vm893_vm7 = vcmp.eq.f32.partialorder %v892_v16, 8.507059e+37 }
 0x389   :  { %v1643_v50 = vpop.eup %1642 }
 0x38a   :  { %v902_v63 = vadd.f32 1.0, %v1643_v50 }
 0x38b   :  { %v1645_v59 = vpop.eup %1644 }
 0x38c   :  { %v1647_v11 = vpop.eup %1646  ;;  %v865_v8 = vmul.f32 %v1645_v59, %v863_v32  ;;  %1648 = vrcp.f32 %v902_v63  ;;  %vm870_vm0 = vweird.f32 %v1645_v59  ;;  %vm908_vm9 = vweird.f32 %v902_v63 }
 0x38d   :  { %v884_v58 = vmul.f32 %v1647_v11, %v882_v54  ;;  %1650 = vtanh.f32 %v858_v62  ;;  %vm889_vm1 = vweird.f32 %v1647_v11  ;;  %vm871_vm4 = vmor %vm869_vm2, %vm870_vm0  ;;  %v914_v62 = vand.u32 2147483648, %v902_v63 }
 0x38e   :  { %v866_v55 = vsub.f32 1.0, %v865_v8  ;;  %vm890_vm5 = vmor %vm888_vm3, %vm889_vm1 }
 0x38f   :  { %v885_v38 = vsub.f32 1.0, %v884_v58  ;;  %v915_v58 = vor.u32 1.1754944e-38, %v914_v62 }
 0x390   :  { %v867_v61 = vmul.f32 %v1645_v59, %v866_v55 }
 0x391   :  { %v886_v15 = vmul.f32 %v1647_v11, %v885_v38 }
 0x392   :  { %v1649_v17 = vpop.eup %1648  ;;  %v868_v18 = vadd.f32 %v1645_v59, %v867_v61 }
 0x393   :  { %v887_v20 = vadd.f32 %v1647_v11, %v886_v15  ;;  %v904_v23 = vmul.f32 %v1649_v17, %v902_v63  ;;  %v1651_v28 = vpop.eup %1650  ;;  %vm909_vm8 = vweird.f32 %v1649_v17 }
 0x394   :  { %v872_v27 = vsel %vm871_vm4, %v1645_v59, %v868_v18  ;;  %v912_v59 = vand.u32 2147483647, %v902_v63  ;;  %vm910_vm10 = vmor %vm908_vm9, %vm909_vm8 }
 0x395   :  { %v877_v29 = vsel %vm874_vm6, %v876_v19, %v872_v27  ;;  %v891_v30 = vsel %vm890_vm5, %v1647_v11, %v887_v20  ;;  %v905_v31 = vsub.f32 1.0, %v904_v23 }
 0x396   :  { %v896_v45 = vsel %vm893_vm7, %v895_v24, %v891_v30  ;;  %v919_v43 = vmul.f32 %v1651_v28, %v877_v29  ;;  %vm913_vm11 = vcmp.eq.f32.partialorder %v912_v59, 8.507059e+37 }
 0x397   :  { %v918_v47 = vmul.f32 %v896_v45, %v2142_v36  ;;  %v906_v50 = vmul.f32 %v1649_v17, %v905_v31 }
 0x399   :  { %v2190_v32 = vadd.f32 %v919_v43, %v918_v47  ;;  %v907_v54 = vadd.f32 %v1649_v17, %v906_v50 }
 0x39b   :  { %1652 = vtanh.f32 %v2190_v32  ;;  %v911_v8 = vsel %vm910_vm10, %v1649_v17, %v907_v54 }
 0x39c   :  { %v916_v55 = vsel %vm913_vm11, %v915_v58, %v911_v8 }
 0x3a1   :  { %v1653_v11 = vpop.eup %1652 }
 0x3a2   :  { %v922_v38 = vmul.f32 %v1653_v11, %v916_v55 }
 0x3a4   :  { %v928_v37 = vpack.c.bf16 %v922_v38, %v922_v38 }
 0x3a6   :  { %937 = vmatmul.bf16.vlgmr.msrb.gmra.mxu0 %v928_v37  ;;  %950 = vmatmul.bf16.vlgmr.msrb.gmra.mxu1 %v928_v37 }
 0x3a7   :  { %963 = vmatmul.bf16.vlgmr.msrb.gmra.mxu2 %v928_v37  ;;  %976 = vmatmul.bf16.vlgmr.msrb.gmra.mxu3 %v928_v37  ;;  %v1526_v37 = vld [vmem:[%s2324_s0 + $0xc8] sm:$0xff] }
 0x3a8   :  { %1179 = vmatpush.bf16.msrb.mxu0 %v1826_v35  ;;  %1192 = vmatpush.bf16.msrb.mxu1 %v1828_v39  ;;  %v1518_v35 = vld [vmem:[%s2324_s0 + $0xa0] sm:$0xff]  ;;  %v1519_v39 = vld [vmem:[%s2324_s0 + $0xa8] sm:$0xff] }
 0x3a9   :  { %1205 = vmatpush.bf16.msrb.mxu2 %v1841_v53  ;;  %1218 = vmatpush.bf16.msrb.mxu3 %v1830_v40 }
 0x3ac   :  { %1180 = vmatpush.bf16.msrb.mxu0 %v1833_v44  ;;  %1193 = vmatpush.bf16.msrb.mxu1 %v1837_v48 }
 0x3ad   :  { %1206 = vmatpush.bf16.msrb.mxu2 %v1853_v2  ;;  %1219 = vmatpush.bf16.msrb.mxu3 %v1839_v49 }
 0x3b0   :  { %1181 = vmatpush.bf16.msrb.mxu0 %v1845_v60  ;;  %1194 = vmatpush.bf16.msrb.mxu1 %v1849_v0  ;;  %v1521_v0 = vld [vmem:[%s2324_s0 + $0xb8] sm:$0xff] }
 0x3b1   :  { %1207 = vmatpush.bf16.msrb.mxu2 %v1859_v10  ;;  %1220 = vmatpush.bf16.msrb.mxu3 %v1851_v1 }
 0x3b4   :  { %1182 = vmatpush.bf16.msrb.mxu0 %v1857_v9  ;;  %1195 = vmatpush.bf16.msrb.mxu1 %v1863_v13 }
 0x3b5   :  { %1208 = vmatpush.bf16.msrb.mxu2 %v1871_v22  ;;  %1221 = vmatpush.bf16.msrb.mxu3 %v1865_v14 }
 0x3b8   :  { %1183 = vmatpush.bf16.msrb.mxu0 %v1869_v21  ;;  %1196 = vmatpush.bf16.msrb.mxu1 %v1875_v25 }
 0x3b9   :  { %1209 = vmatpush.bf16.msrb.mxu2 %v1883_v34  ;;  %1222 = vmatpush.bf16.msrb.mxu3 %v1877_v26 }
 0x3bc   :  { %1184 = vmatpush.bf16.msrb.mxu0 %v1881_v33  ;;  %1197 = vmatpush.bf16.msrb.mxu1 %v1887_v41  ;;  %v1520_v41 = vld [vmem:[%s2324_s0 + $0xb0] sm:$0xff] }
 0x3bd   :  { %1210 = vmatpush.bf16.msrb.mxu2 %v1895_v52  ;;  %1223 = vmatpush.bf16.msrb.mxu3 %v1889_v42 }
 0x3c0   :  { %1185 = vmatpush.bf16.msrb.mxu0 %v1893_v51  ;;  %1198 = vmatpush.bf16.msrb.mxu1 %v1899_v56 }
 0x3c1   :  { %1211 = vmatpush.bf16.msrb.mxu2 %v1907_v5  ;;  %1224 = vmatpush.bf16.msrb.mxu3 %v1901_v57 }
 0x3c4   :  { %1186 = vmatpush.bf16.msrb.mxu0 %v1905_v4  ;;  %1199 = vmatpush.bf16.msrb.mxu1 %v1911_v6 }
 0x3c5   :  { %1212 = vmatpush.bf16.msrb.mxu2 %v1919_v12  ;;  %1225 = vmatpush.bf16.msrb.mxu3 %v1913_v7 }
 0x423   :  { %v938_v40 = vpop.f32.mrf.mxu0  ;;  %v951_v44 = vpop.f32.mrf.mxu1 }
 0x424   :  { %v981_v48 = vadd.f32 %v1518_v35, %v938_v40  ;;  %v982_v49 = vadd.f32 %v1519_v39, %v951_v44 }
 0x426   :  { %v1522_v53 = vmul.f32 -1.442695, %v981_v48  ;;  %v1523_v60 = vmul.f32 -1.442695, %v982_v49 }
 0x428   :  { %1654 = vpow2.f32 %v1522_v53  ;;  %v1528_v53 = vld [vmem:[%s2324_s0 + $0xd8] sm:$0xff] }
 0x429   :  { %1656 = vpow2.f32 %v1523_v60 }
 0x42a   :  { %v964_v1 = vpop.f32.mrf.mxu2  ;;  %v977_v2 = vpop.f32.mrf.mxu3 }
 0x42b   :  { %v984_v9 = vadd.f32 %v1521_v0, %v977_v2  ;;  %v940_v10 = vpop.f32.mrf.mxu0  ;;  %v953_v13 = vpop.f32.mrf.mxu1  ;;  %v983_v56 = vadd.f32 %v1520_v41, %v964_v1 }
 0x42d   :  { %v1524_v14 = vmul.f32 -1.442695, %v984_v9 }
 0x42e   :  { %v1655_v21 = vpop.eup %1654 }
 0x42f   :  { %v1657_v22 = vpop.eup %1656  ;;  %v988_v25 = vadd.f32 1.0, %v1655_v21  ;;  %1658 = vpow2.f32 %v1524_v14 }
 0x430   :  { %v1007_v26 = vadd.f32 1.0, %v1657_v22 }
 0x431   :  { %1660 = vrcp.f32 %v988_v25  ;;  %v1000_v12 = vand.u32 2147483648, %v988_v25  ;;  %v998_v3 = vand.u32 2147483647, %v988_v25  ;;  %vm994_vm14 = vweird.f32 %v988_v25 }
 0x432   :  { %1662 = vrcp.f32 %v1007_v26  ;;  %v966_v33 = vpop.f32.mrf.mxu2  ;;  %v979_v34 = vpop.f32.mrf.mxu3  ;;  %v1019_v36 = vand.u32 2147483648, %v1007_v26  ;;  %v1017_v46 = vand.u32 2147483647, %v1007_v26  ;;  %vm1013_vm15 = vweird.f32 %v1007_v26 }
 0x433   :  { %v1001_v17 = vor.u32 1.1754944e-38, %v1000_v12  ;;  %vm999_vm2 = vcmp.eq.f32.partialorder %v998_v3, 8.507059e+37  ;;  %v1527_v33 = vld [vmem:[%s2324_s0 + $0xd0] sm:$0xff] }
 0x434   :  { %v1020_v20 = vor.u32 1.1754944e-38, %v1019_v36  ;;  %vm1018_vm3 = vcmp.eq.f32.partialorder %v1017_v46, 8.507059e+37 }
 0x435   :  { %v1659_v42 = vpop.eup %1658 }
 0x436   :  { %v1027_v51 = vadd.f32 1.0, %v1659_v42 }
 0x437   :  { %v1661_v52 = vpop.eup %1660 }
 0x438   :  { %v1663_v57 = vpop.eup %1662  ;;  %v990_v4 = vmul.f32 %v1661_v52, %v988_v25  ;;  %1664 = vrcp.f32 %v1027_v51  ;;  %vm995_vm12 = vweird.f32 %v1661_v52  ;;  %v1039_v54 = vand.u32 2147483648, %v1027_v51 }
 0x439   :  { %v1009_v5 = vmul.f32 %v1663_v57, %v1007_v26  ;;  %1666 = vtanh.f32 %v983_v56  ;;  %vm1014_vm13 = vweird.f32 %v1663_v57  ;;  %vm996_vm0 = vmor %vm994_vm14, %vm995_vm12  ;;  %vm1033_vm5 = vweird.f32 %v1027_v51 }
 0x43a   :  { %v991_v6 = vsub.f32 1.0, %v990_v4  ;;  %vm1015_vm1 = vmor %vm1013_vm15, %vm1014_vm13  ;;  %v1037_v62 = vand.u32 2147483647, %v1027_v51  ;;  %v1040_v8 = vor.u32 1.1754944e-38, %v1039_v54 }
 0x43b   :  { %v1010_v7 = vsub.f32 1.0, %v1009_v5 }
 0x43c   :  { %v992_v63 = vmul.f32 %v1661_v52, %v991_v6  ;;  %vm1038_vm7 = vcmp.eq.f32.partialorder %v1037_v62, 8.507059e+37 }
 0x43d   :  { %v1011_v61 = vmul.f32 %v1663_v57, %v1010_v7 }
 0x43e   :  { %v1665_v15 = vpop.eup %1664  ;;  %v993_v16 = vadd.f32 %v1661_v52, %v992_v63 }
 0x43f   :  { %v1012_v18 = vadd.f32 %v1663_v57, %v1011_v61  ;;  %v1029_v19 = vmul.f32 %v1665_v15, %v1027_v51  ;;  %v1667_v24 = vpop.eup %1666  ;;  %vm1034_vm4 = vweird.f32 %v1665_v15 }
 0x440   :  { %v997_v23 = vsel %vm996_vm0, %v1661_v52, %v993_v16  ;;  %vm1035_vm6 = vmor %vm1033_vm5, %vm1034_vm4 }
 0x441   :  { %v1002_v27 = vsel %vm999_vm2, %v1001_v17, %v997_v23  ;;  %v1016_v28 = vsel %vm1015_vm1, %v1663_v57, %v1012_v18  ;;  %v1030_v29 = vsub.f32 1.0, %v1029_v19 }
 0x442   :  { %v1021_v30 = vsel %vm1018_vm3, %v1020_v20, %v1016_v28  ;;  %v1044_v31 = vmul.f32 %v1667_v24, %v1002_v27 }
 0x443   :  { %v1043_v45 = vmul.f32 %v1021_v30, %v2190_v32  ;;  %v1031_v43 = vmul.f32 %v1665_v15, %v1030_v29  ;;  %v1525_v32 = vld [vmem:[%s2324_s0 + $0xc0] sm:$0xff] }
 0x445   :  { %v2238_v47 = vadd.f32 %v1044_v31, %v1043_v45  ;;  %v1032_v50 = vadd.f32 %v1665_v15, %v1031_v43 }
 0x447   :  { %1668 = vtanh.f32 %v2238_v47  ;;  %v1036_v59 = vsel %vm1035_vm6, %v1665_v15, %v1032_v50 }
 0x448   :  { %v1041_v11 = vsel %vm1038_vm7, %v1040_v8, %v1036_v59 }
 0x44d   :  { %v1669_v58 = vpop.eup %1668 }
 0x44e   :  { %v1047_v55 = vmul.f32 %v1669_v58, %v1041_v11 }
 0x450   :  { %v1053_v38 = vpack.c.bf16 %v1047_v55, %v1047_v55 }
 0x452   :  { %1062 = vmatmul.bf16.vlgmr.msra.gmra.mxu0 %v1053_v38  ;;  %1075 = vmatmul.bf16.vlgmr.msra.gmra.mxu1 %v1053_v38 }
 0x453   :  { %1088 = vmatmul.bf16.vlgmr.msra.gmra.mxu2 %v1053_v38  ;;  %1101 = vmatmul.bf16.vlgmr.msra.gmra.mxu3 %v1053_v38  ;;  %v1318_v38 = vld [vmem:[%s2326_s2 + $0x70] sm:$0xff] }
 0x4cf   :  { %v1063_v35 = vpop.f32.mrf.mxu0  ;;  %v1076_v39 = vpop.f32.mrf.mxu1 }
 0x4d0   :  { %v1106_v40 = vadd.f32 %v1525_v32, %v1063_v35  ;;  %v1107_v44 = vadd.f32 %v1526_v37, %v1076_v39  ;;  %v1317_v32 = vld [vmem:[%s2326_s2 + $0x68] sm:$0xff]  ;;  %v1316_v37 = vld [vmem:[%s2326_s2 + $0x60] sm:$0xff]  ;;  %v1315_v35 = vld [vmem:[%s2326_s2 + $0x58] sm:$0xff] }
 0x4d1   :  { %v1314_v39 = vld [vmem:[%s2326_s2 + $0x50] sm:$0xff] }
 0x4d2   :  { %v1529_v48 = vmul.f32 -1.442695, %v1106_v40  ;;  %v1530_v49 = vmul.f32 -1.442695, %v1107_v44  ;;  %v1313_v40 = vld [vmem:[%s2326_s2 + $0x48] sm:$0xff]  ;;  %v1312_v44 = vld [vmem:[%s2326_s2 + $0x40] sm:$0xff] }
 0x4d4   :  { %1670 = vpow2.f32 %v1529_v48  ;;  %v1532_v48 = vld [vmem:[%s2324_s0 + $0xe0] sm:$0xff] }
 0x4d5   :  { %1672 = vpow2.f32 %v1530_v49  ;;  %v1533_v49 = vld [vmem:[%s2324_s0 + $0xe8] sm:$0xff] }
 0x4d6   :  { %v1089_v60 = vpop.f32.mrf.mxu2  ;;  %v1102_v0 = vpop.f32.mrf.mxu3 }
 0x4d7   :  { %v1109_v1 = vadd.f32 %v1528_v53, %v1102_v0  ;;  %v1065_v2 = vpop.f32.mrf.mxu0  ;;  %v1078_v9 = vpop.f32.mrf.mxu1  ;;  %v1108_v51 = vadd.f32 %v1527_v33, %v1089_v60  ;;  %v1311_v53 = vld [vmem:[%s2326_s2 + $0x38] sm:$0xff] }
 0x4d8   :  { %v1310_v9 = vld [vmem:[%s2326_s2 + $0x30] sm:$0xff] }
 0x4d9   :  { %v1531_v10 = vmul.f32 -1.442695, %v1109_v1 }
 0x4da   :  { %v1671_v13 = vpop.eup %1670 }
 0x4db   :  { %v1673_v14 = vpop.eup %1672  ;;  %v1113_v21 = vadd.f32 1.0, %v1671_v13  ;;  %1674 = vpow2.f32 %v1531_v10 }
 0x4dc   :  { %v1132_v22 = vadd.f32 1.0, %v1673_v14  ;;  %v1309_v14 = vld [vmem:[%s2326_s2 + $0x28] sm:$0xff] }
 0x4dd   :  { %1676 = vrcp.f32 %v1113_v21  ;;  %v1125_v6 = vand.u32 2147483648, %v1113_v21  ;;  %v1123_v36 = vand.u32 2147483647, %v1113_v21  ;;  %vm1119_vm10 = vweird.f32 %v1113_v21 }
 0x4de   :  { %1678 = vrcp.f32 %v1132_v22  ;;  %v1091_v25 = vpop.f32.mrf.mxu2  ;;  %v1104_v26 = vpop.f32.mrf.mxu3  ;;  %v1144_v7 = vand.u32 2147483648, %v1132_v22  ;;  %v1142_v3 = vand.u32 2147483647, %v1132_v22  ;;  %vm1138_vm11 = vweird.f32 %v1132_v22 }
 0x4df   :  { %v1126_v15 = vor.u32 1.1754944e-38, %v1125_v6  ;;  %vm1124_vm14 = vcmp.eq.f32.partialorder %v1123_v36, 8.507059e+37  ;;  %v1307_v25 = vld [vmem:[%s2326_s2 + $0x18] sm:$0xff] }
 0x4e0   :  { %v1145_v18 = vor.u32 1.1754944e-38, %v1144_v7  ;;  %vm1143_vm15 = vcmp.eq.f32.partialorder %v1142_v3, 8.507059e+37 }
 0x4e1   :  { %v1675_v34 = vpop.eup %1674 }
 0x4e2   :  { %v1152_v41 = vadd.f32 1.0, %v1675_v34  ;;  %v1306_v34 = vld [vmem:[%s2326_s2 + $0x10] sm:$0xff] }
 0x4e3   :  { %v1677_v42 = vpop.eup %1676 }
 0x4e4   :  { %v1679_v52 = vpop.eup %1678  ;;  %v1115_v56 = vmul.f32 %v1677_v42, %v1113_v21  ;;  %1680 = vrcp.f32 %v1152_v41  ;;  %vm1120_vm8 = vweird.f32 %v1677_v42  ;;  %v1164_v50 = vand.u32 2147483648, %v1152_v41  ;;  %v1308_v21 = vld [vmem:[%s2326_s2 + $0x20] sm:$0xff] }
 0x4e5   :  { %v1134_v57 = vmul.f32 %v1679_v52, %v1132_v22  ;;  %1682 = vtanh.f32 %v1108_v51  ;;  %vm1139_vm9 = vweird.f32 %v1679_v52  ;;  %vm1121_vm12 = vmor %vm1119_vm10, %vm1120_vm8  ;;  %vm1158_vm1 = vweird.f32 %v1152_v41  ;;  %v1535_v22 = vld [vmem:[%s2324_s0 + $0xf8] sm:$0xff] }
 0x4e6   :  { %v1116_v4 = vsub.f32 1.0, %v1115_v56  ;;  %vm1140_vm13 = vmor %vm1138_vm11, %vm1139_vm9  ;;  %v1162_v54 = vand.u32 2147483647, %v1152_v41  ;;  %v1165_v59 = vor.u32 1.1754944e-38, %v1164_v50 }
 0x4e7   :  { %v1135_v5 = vsub.f32 1.0, %v1134_v57 }
 0x4e8   :  { %v1117_v12 = vmul.f32 %v1677_v42, %v1116_v4  ;;  %vm1163_vm3 = vcmp.eq.f32.partialorder %v1162_v54, 8.507059e+37  ;;  %v1304_v4 = vld [vmem:[%s2326_s2] sm:$0xff] }
 0x4e9   :  { %v1136_v63 = vmul.f32 %v1679_v52, %v1135_v5 }
 0x4ea   :  { %v1681_v61 = vpop.eup %1680  ;;  %v1118_v46 = vadd.f32 %v1677_v42, %v1117_v12 }
 0x4eb   :  { %v1137_v16 = vadd.f32 %v1679_v52, %v1136_v63  ;;  %v1154_v17 = vmul.f32 %v1681_v61, %v1152_v41  ;;  %v1683_v20 = vpop.eup %1682  ;;  %vm1159_vm0 = vweird.f32 %v1681_v61  ;;  %v1534_v63 = vld [vmem:[%s2324_s0 + $0xf0] sm:$0xff] }
 0x4ec   :  { %v1122_v19 = vsel %vm1121_vm12, %v1677_v42, %v1118_v46  ;;  %vm1160_vm2 = vmor %vm1158_vm1, %vm1159_vm0 }
 0x4ed   :  { %v1127_v23 = vsel %vm1124_vm14, %v1126_v15, %v1122_v19  ;;  %v1141_v24 = vsel %vm1140_vm13, %v1679_v52, %v1137_v16  ;;  %v1155_v27 = vsub.f32 1.0, %v1154_v17  ;;  %v1305_v52 = vld [vmem:[%s2326_s2 + $0x8] sm:$0xff] }
 0x4ee   :  { %v1146_v28 = vsel %vm1143_vm15, %v1145_v18, %v1141_v24  ;;  %v1169_v29 = vmul.f32 %v1683_v20, %v1127_v23 }
 0x4ef   :  { %v1168_v30 = vmul.f32 %v1146_v28, %v2238_v47  ;;  %v1156_v31 = vmul.f32 %v1681_v61, %v1155_v27  ;;  %v1319_v47 = vld [vmem:[%s2326_s2 + $0x78] sm:$0xff] }
 0x4f0   :  { %1324 = vmatpush.msra.mxu0 %v1319_v47 }
 0x4f1   :  { %v2254_v45 = vadd.f32 %v1169_v29, %v1168_v30  ;;  %v1157_v43 = vadd.f32 %v1681_v61, %v1156_v31 }
 0x4f2   :  { %1325 = vmatpush.msra.mxu0 %v1318_v38 }
 0x4f3   :  { %1684 = vtanh.f32 %v2254_v45  ;;  %v1161_v62 = vsel %vm1160_vm2, %v1681_v61, %v1157_v43 }
 0x4f4   :  { %v1166_v58 = vsel %vm1163_vm3, %v1165_v59, %v1161_v62  ;;  %1326 = vmatpush.msra.mxu0 %v1317_v32 }
 0x4f6   :  { %1327 = vmatpush.msra.mxu0 %v1316_v37 }
 0x4f8   :  { %1328 = vmatpush.msra.mxu0 %v1315_v35 }
 0x4f9   :  { %v1685_v8 = vpop.eup %1684 }
 0x4fa   :  { %v1172_v11 = vmul.f32 %v1685_v8, %v1166_v58  ;;  %1329 = vmatpush.msra.mxu0 %v1314_v39 }
 0x4fc   :  { %v1178_v55 = vpack.c.bf16 %v1172_v11, %v1172_v11  ;;  %1330 = vmatpush.msra.mxu0 %v1313_v40 }
 0x4fe   :  { %1187 = vmatmul.bf16.vlgmr.msrb.gmra.mxu0 %v1178_v55  ;;  %1200 = vmatmul.bf16.vlgmr.msrb.gmra.mxu1 %v1178_v55 }
 0x4ff   :  { %1213 = vmatmul.bf16.vlgmr.msrb.gmra.mxu2 %v1178_v55  ;;  %1226 = vmatmul.bf16.vlgmr.msrb.gmra.mxu3 %v1178_v55 }
 0x500   :  { %1331 = vmatpush.msra.mxu0 %v1312_v44 }
 0x502   :  { %1332 = vmatpush.msra.mxu0 %v1311_v53 }
 0x504   :  { %1333 = vmatpush.msra.mxu0 %v1310_v9 }
 0x506   :  { %1334 = vmatpush.msra.mxu0 %v1309_v14 }
 0x508   :  { %1335 = vmatpush.msra.mxu0 %v1308_v21 }
 0x50a   :  { %1336 = vmatpush.msra.mxu0 %v1307_v25 }
 0x50c   :  { %1337 = vmatpush.msra.mxu0 %v1306_v34 }
 0x50e   :  { %1338 = vmatpush.msra.mxu0 %v1305_v52 }
 0x510   :  { %1339 = vmatpush.msra.mxu0 %v1304_v4 }
 0x57b   :  { %v1188_v60 = vpop.f32.mrf.mxu0  ;;  %v1201_v0 = vpop.f32.mrf.mxu1 }
 0x57c   :  { %v1231_v1 = vadd.f32 %v1532_v48, %v1188_v60  ;;  %v1232_v2 = vadd.f32 %v1533_v49, %v1201_v0 }
 0x57e   :  { %v1536_v10 = vmul.f32 -1.442695, %v1231_v1  ;;  %v1537_v13 = vmul.f32 -1.442695, %v1232_v2 }
 0x580   :  { %1686 = vpow2.f32 %v1536_v10 }
 0x581   :  { %1688 = vpow2.f32 %v1537_v13 }
 0x582   :  { %v1214_v26 = vpop.f32.mrf.mxu2  ;;  %v1227_v33 = vpop.f32.mrf.mxu3 }
 0x583   :  { %v1234_v41 = vadd.f32 %v1535_v22, %v1227_v33  ;;  %v1190_v42 = vpop.f32.mrf.mxu0  ;;  %v1203_v51 = vpop.f32.mrf.mxu1  ;;  %v1233_v15 = vadd.f32 %v1534_v63, %v1214_v26 }
 0x585   :  { %v1538_v56 = vmul.f32 -1.442695, %v1234_v41 }
 0x586   :  { %v1687_v57 = vpop.eup %1686 }
 0x587   :  { %v1689_v5 = vpop.eup %1688  ;;  %v1238_v6 = vadd.f32 1.0, %v1687_v57  ;;  %1690 = vpow2.f32 %v1538_v56 }
 0x588   :  { %v1257_v7 = vadd.f32 1.0, %v1689_v5 }
 0x589   :  { %1692 = vrcp.f32 %v1238_v6  ;;  %v1250_v23 = vand.u32 2147483648, %v1238_v6  ;;  %v1248_v28 = vand.u32 2147483647, %v1238_v6  ;;  %vm1244_vm6 = vweird.f32 %v1238_v6 }
 0x58a   :  { %1694 = vrcp.f32 %v1257_v7  ;;  %v1216_v12 = vpop.f32.mrf.mxu2  ;;  %v1229_v36 = vpop.f32.mrf.mxu3  ;;  %v1269_v24 = vand.u32 2147483648, %v1257_v7  ;;  %v1267_v30 = vand.u32 2147483647, %v1257_v7  ;;  %vm1263_vm7 = vweird.f32 %v1257_v7 }
 0x58b   :  { %v1251_v50 = vor.u32 1.1754944e-38, %v1250_v23  ;;  %vm1249_vm10 = vcmp.eq.f32.partialorder %v1248_v28, 8.507059e+37 }
 0x58c   :  { %v1270_v59 = vor.u32 1.1754944e-38, %v1269_v24  ;;  %vm1268_vm11 = vcmp.eq.f32.partialorder %v1267_v30, 8.507059e+37 }
 0x58d   :  { %v1691_v3 = vpop.eup %1690 }
 0x58e   :  { %v1277_v61 = vadd.f32 1.0, %v1691_v3 }
 0x58f   :  { %v1693_v46 = vpop.eup %1692 }
 0x590   :  { %v1695_v16 = vpop.eup %1694  ;;  %v1240_v17 = vmul.f32 %v1693_v46, %v1238_v6  ;;  %1696 = vrcp.f32 %v1277_v61  ;;  %vm1245_vm4 = vweird.f32 %v1693_v46  ;;  %v1289_v44 = vand.u32 2147483648, %v1277_v61 }
 0x591   :  { %v1259_v18 = vmul.f32 %v1695_v16, %v1257_v7  ;;  %1698 = vtanh.f32 %v1233_v15  ;;  %vm1264_vm5 = vweird.f32 %v1695_v16  ;;  %vm1246_vm8 = vmor %vm1244_vm6, %vm1245_vm4  ;;  %vm1283_vm13 = vweird.f32 %v1277_v61 }
 0x592   :  { %v1241_v19 = vsub.f32 1.0, %v1240_v17  ;;  %vm1265_vm9 = vmor %vm1263_vm7, %vm1264_vm5  ;;  %v1287_v48 = vand.u32 2147483647, %v1277_v61  ;;  %v1290_v53 = vor.u32 1.1754944e-38, %v1289_v44 }
 0x593   :  { %v1260_v20 = vsub.f32 1.0, %v1259_v18 }
 0x594   :  { %v1242_v27 = vmul.f32 %v1693_v46, %v1241_v19  ;;  %vm1288_vm15 = vcmp.eq.f32.partialorder %v1287_v48, 8.507059e+37 }
 0x595   :  { %v1261_v29 = vmul.f32 %v1695_v16, %v1260_v20 }
 0x596   :  { %v1697_v31 = vpop.eup %1696  ;;  %v1243_v43 = vadd.f32 %v1693_v46, %v1242_v27 }
 0x597   :  { %v1262_v54 = vadd.f32 %v1695_v16, %v1261_v29  ;;  %v1279_v62 = vmul.f32 %v1697_v31, %v1277_v61  ;;  %v1699_v58 = vpop.eup %1698  ;;  %vm1284_vm12 = vweird.f32 %v1697_v31 }
 0x598   :  { %v1247_v8 = vsel %vm1246_vm8, %v1693_v46, %v1243_v43  ;;  %vm1285_vm14 = vmor %vm1283_vm13, %vm1284_vm12 }
 0x599   :  { %v1252_v11 = vsel %vm1249_vm10, %v1251_v50, %v1247_v8  ;;  %v1266_v55 = vsel %vm1265_vm9, %v1695_v16, %v1262_v54  ;;  %v1280_v47 = vsub.f32 1.0, %v1279_v62 }
 0x59a   :  { %v1271_v38 = vsel %vm1268_vm11, %v1270_v59, %v1266_v55  ;;  %v1294_v32 = vmul.f32 %v1699_v58, %v1252_v11 }
 0x59b   :  { %v1293_v37 = vmul.f32 %v1271_v38, %v2254_v45  ;;  %v1281_v35 = vmul.f32 %v1697_v31, %v1280_v47  ;;  %v1573_v45 = vld [vmem:[%s2327_s3] ss:$0 sm:$0xff] }
 0x59d   :  { %v1295_v39 = vadd.f32 %v1294_v32, %v1293_v37  ;;  %v1282_v40 = vadd.f32 %v1697_v31, %v1281_v35 }
 0x59f   :  { %1700 = vtanh.f32 %v1295_v39  ;;  %v1286_v49 = vsel %vm1285_vm14, %v1697_v31, %v1282_v40 }
 0x5a0   :  { %v1291_v0 = vsel %vm1288_vm15, %v1290_v53, %v1286_v49 }
 0x5a5   :  { %v1701_v60 = vpop.eup %1700 }
 0x5a6   :  { %v1297_v1 = vmul.f32 %v1701_v60, %v1291_v0 }
 0x5a8   :  { %v1303_v2 = vmax.f32 %v1297_v1, 0.0 }
 0x5aa   :  { %1340 = vmatmul.f32.vlgmr.msra.gmra.mxu0 %v1303_v2 }
 0x627   :  { %v1341_v9 = vpop.f32.mrf.mxu0 }
 0x628   :  { %v1342_v10 = vadd.f32 %v1573_v45, %v1341_v9 }
 0x62a   :  { %1344 = vst [vmem:[%s2328_s4] sm:$0xff] %v1342_v10 }
 0x62b   :  { %1349 = vsyncmov [#allocation5] }
 0x62e   :  { %s1350_s17 = vpop.sfrf %1349 }
 0x62f   :  { %p1539_p0 = scmp.ne.s32.totalorder %s1350_s17, 0 }
 0x631   :  { %1354 = shalt.err (%p1539_p0)  }

</bundles_post_ra>
